<compile_context>
chip_gen: v5e
topology: v5e:2x2
jax: 0.10.0
libtpu: 0.0.40
codegen_flags: <defaults>
</compile_context>

<pallas_src>
import jax
import jax.numpy as jnp
import numpy as np
from jax.experimental import pallas as pl
from jax.experimental.pallas import tpu as pltpu


# ----------------------------- fused Pallas kernel -----------------------------

def fused_cnn_kernel(p1_ref, w1_ref, b1_ref, w2_ref, b2_ref, w3_ref, b3_ref,
                     sel2_ref, sel3_ref, wd1_ref, bd1_ref, wd2_ref, bd2_ref,
                     wd3_ref, bd3_ref, o_ref):
    f32 = jnp.float32

    # ---------------- stage 1: conv1 (pad=1) + ReLU + 2x2 maxpool ----------------
    # p1: (800, 9) = 4 pool parities x 200 rows (196 valid, 4 zero-pad) x 9 taps.
    y1 = jnp.dot(p1_ref[0], w1_ref[...], preferred_element_type=f32) + b1_ref[...]
    y1 = jnp.maximum(y1, 0.0)                                      # (800, 32)
    a2 = jnp.maximum(jnp.maximum(y1[0:196], y1[200:396]),
                     jnp.maximum(y1[400:596], y1[600:796]))        # (196,32) = 14x14x32
    # extra zero rows so shifted tap slabs stay in bounds (overruns only ever
    # feed garbage columns, which the pooling selection matrices never pick)
    a2 = jnp.concatenate([a2, jnp.zeros((4, 32), f32)], axis=0)    # (200, 32)

    # ---------------- stage 2: conv2 + ReLU + 2x2 maxpool ----------------
    y2 = jnp.dot(a2[0:168], w2_ref[0], preferred_element_type=f32)
    for t in range(1, 9):
        o = (t // 3) * 14 + (t % 3)
        y2 = y2 + jnp.dot(a2[o:o + 168], w2_ref[t], preferred_element_type=f32)
    y2 = jnp.maximum(y2 + b2_ref[...], 0.0)                        # (168, 32)
    a3 = jnp.dot(sel2_ref[0], y2, preferred_element_type=f32)
    for p in range(1, 4):
        a3 = jnp.maximum(a3, jnp.dot(sel2_ref[p], y2, preferred_element_type=f32))
    a3 = jnp.concatenate([a3, jnp.zeros((4, 32), f32)], axis=0)    # (40,32): 6x6x32+pad

    # ---------------- stage 3: conv3 + ReLU + 2x2 maxpool ----------------
    y3 = jnp.dot(a3[0:24], w3_ref[0], preferred_element_type=f32)
    for t in range(1, 9):
        o = (t // 3) * 6 + (t % 3)
        y3 = y3 + jnp.dot(a3[o:o + 24], w3_ref[t], preferred_element_type=f32)
    y3 = jnp.maximum(y3 + b3_ref[...], 0.0)                        # (24, 32)
    z = jnp.dot(sel3_ref[0], y3, preferred_element_type=f32)
    for p in range(1, 4):
        z = jnp.maximum(z, jnp.dot(sel3_ref[p], y3, preferred_element_type=f32))
    # z: (4, 32) = (spatial s = h*2 + w, channel)

    # -------- dense head (PyTorch flatten absorbed into wd1 row permutation) ----
    h = jnp.dot(z[0:1, :], wd1_ref[0:32, :], preferred_element_type=f32)
    for s in range(1, 4):
        h = h + jnp.dot(z[s:s + 1, :], wd1_ref[s * 32:(s + 1) * 32, :],
                        preferred_element_type=f32)
    h = jnp.maximum(h + bd1_ref[...], 0.0)                         # (1, 64)
    h = jnp.maximum(jnp.dot(h, wd2_ref[...], preferred_element_type=f32)
                    + bd2_ref[...], 0.0)                           # (1, 32)
    out = jnp.dot(h, wd3_ref[...], preferred_element_type=f32) + bd3_ref[...]
    o_ref[0] = out.astype(o_ref.dtype)                             # (1, 128) lane-dense


# ------------------------------- wrapper (JAX) --------------------------------

def _stage1_patches(x_nhwc):
    """Pool-parity im2col of the padded 28x28x1 input -> (B, 800, 9)."""
    B = x_nhwc.shape[0]
    xp = jnp.pad(x_nhwc, ((0, 0), (1, 1), (1, 1), (0, 0)))[..., 0]   # (B, 30, 30)
    blocks = []
    for ph in range(2):
        for pw in range(2):
            taps = [xp[:, ph + dy: ph + dy + 28: 2, pw + dx: pw + dx + 28: 2]
                    .reshape(B, 196) for dy in range(3) for dx in range(3)]
            blk = jnp.stack(taps, axis=-1)                           # (B, 196, 9)
            blocks.append(jnp.pad(blk, ((0, 0), (0, 4), (0, 0))))    # (B, 200, 9)
    return jnp.concatenate(blocks, axis=1)                           # (B, 800, 9)


def _pool_select_mats(Hh, Wh, Wi):
    """One-hot 2x2-maxpool selection matrices: (4, Hh*Wh, (2*Hh)*Wi) f32."""
    Ho = 2 * Hh
    r = np.arange(Hh * Wh)
    hh, ww = r // Wh, r % Wh
    cols = np.arange(Ho * Wi)
    sels = []
    for ph in range(2):
        for pw in range(2):
            src = (2 * hh + ph) * Wi + (2 * ww + pw)
            sels.append((cols[None, :] == src[:, None]).astype(np.float32))
    return jnp.asarray(np.stack(sels))


def cnn_forward(x_nchw, params):
    B = x_nchw.shape[0]
    assert x_nchw.shape[1:] == (1, 28, 28), "Linear(128,...) pins the input to 1x28x28"
    nc = params["w_d3"].shape[1]
    assert nc <= 128

    x = jnp.transpose(x_nchw, (0, 2, 3, 1)).astype(jnp.float32)      # NHWC

    patches = _stage1_patches(x)                                     # (B, 800, 9)
    sel2 = _pool_select_mats(6, 6, 14)                               # (4, 36, 168)
    sel3 = _pool_select_mats(2, 2, 6)                                # (4, 4, 24)

    w1 = params["w_c1"].reshape(9, 32)
    w2 = params["w_c2"].reshape(9, 32, 32)
    w3 = params["w_c3"].reshape(9, 32, 32)
    b1 = params["b_c1"].reshape(1, 32)
    b2 = params["b_c2"].reshape(1, 32)
    b3 = params["b_c3"].reshape(1, 32)

    # PyTorch NCHW flatten order is feature k = c*4 + s; kernel uses s*32 + c.
    i = np.arange(128)
    wd1 = params["w_d1"][(i % 32) * 4 + i // 32, :]                  # (128, 64)
    bd1 = params["b_d1"].reshape(1, 64)
    wd2 = params["w_d2"]                                             # (64, 32)
    bd2 = params["b_d2"].reshape(1, 32)
    wd3 = jnp.pad(params["w_d3"], ((0, 0), (0, 128 - nc)))           # (32, 128)
    bd3 = jnp.pad(params["b_d3"].reshape(1, nc), ((0, 0), (0, 128 - nc)))

    out = pl.pallas_call(
        fused_cnn_kernel,
        out_shape=jax.ShapeDtypeStruct((B, 1, 128), jnp.float32),
        grid_spec=pltpu.PrefetchScalarGridSpec(
            num_scalar_prefetch=0,
            grid=(B,),
            in_specs=[
                pl.BlockSpec((1, 800, 9), lambda b: (b, 0, 0)),      # stage-1 patches
                pl.BlockSpec((9, 32), lambda b: (0, 0)),             # w1
                pl.BlockSpec((1, 32), lambda b: (0, 0)),             # b1
                pl.BlockSpec((9, 32, 32), lambda b: (0, 0, 0)),      # w2 (per-tap)
                pl.BlockSpec((1, 32), lambda b: (0, 0)),             # b2
                pl.BlockSpec((9, 32, 32), lambda b: (0, 0, 0)),      # w3 (per-tap)
                pl.BlockSpec((1, 32), lambda b: (0, 0)),             # b3
                pl.BlockSpec((4, 36, 168), lambda b: (0, 0, 0)),     # pool-sel stage 2
                pl.BlockSpec((4, 4, 24), lambda b: (0, 0, 0)),       # pool-sel stage 3
                pl.BlockSpec((128, 64), lambda b: (0, 0)),           # wd1 (row-permuted)
                pl.BlockSpec((1, 64), lambda b: (0, 0)),             # bd1
                pl.BlockSpec((64, 32), lambda b: (0, 0)),            # wd2
                pl.BlockSpec((1, 32), lambda b: (0, 0)),             # bd2
                pl.BlockSpec((32, 128), lambda b: (0, 0)),           # wd3 (lane-padded)
                pl.BlockSpec((1, 128), lambda b: (0, 0)),            # bd3 (lane-padded)
            ],
            out_specs=pl.BlockSpec((1, 1, 128), lambda b: (b, 0, 0)),
        ),
        compiler_params=pltpu.CompilerParams(
            dimension_semantics=("parallel",)),
    )(patches, w1, b1, w2, b2, w3, b3, sel2, sel3,
      wd1, bd1, wd2, bd2, wd3, bd3)

    return out[:, 0, :nc]


# --------------------------- reference (plain JAX) -----------------------------

def reference_forward(x_nchw, params):
    x = jnp.transpose(x_nchw, (0, 2, 3, 1))

    def conv_block(x, w, b, pad):
        y = jax.lax.conv_general_dilated(
            x, w, window_strides=(1, 1), padding=[(pad, pad), (pad, pad)],
            dimension_numbers=("NHWC", "HWIO", "NHWC"))
        y = jnp.maximum(y + b, 0.0)
        B, H, W, C = y.shape
        return y.reshape(B, H // 2, 2, W // 2, 2, C).max(axis=(2, 4))

    x = conv_block(x, params["w_c1"], params["b_c1"], 1)
    x = conv_block(x, params["w_c2"], params["b_c2"], 0)
    x = conv_block(x, params["w_c3"], params["b_c3"], 0)
    feat = jnp.transpose(x, (0, 3, 1, 2)).reshape(x.shape[0], -1)
    h = jnp.maximum(feat @ params["w_d1"] + params["b_d1"], 0.0)
    h = jnp.maximum(h @ params["w_d2"] + params["b_d2"], 0.0)
    return h @ params["w_d3"] + params["b_d3"]


# ----------------------------------- main ---------------------------------------

def init_params(key, num_classes):
    ks = jax.random.split(key, 12)
    return {
        "w_c1": jax.random.normal(ks[0], (3, 3, 1, 32), jnp.float32) * 0.1,
        "b_c1": jax.random.normal(ks[1], (32,), jnp.float32) * 0.1,
        "w_c2": jax.random.normal(ks[2], (3, 3, 32, 32), jnp.float32) * 0.1,
        "b_c2": jax.random.normal(ks[3], (32,), jnp.float32) * 0.1,
        "w_c3": jax.random.normal(ks[4], (3, 3, 32, 32), jnp.float32) * 0.1,
        "b_c3": jax.random.normal(ks[5], (32,), jnp.float32) * 0.1,
        "w_d1": jax.random.normal(ks[6], (128, 64), jnp.float32) * 0.1,
        "b_d1": jax.random.normal(ks[7], (64,), jnp.float32) * 0.1,
        "w_d2": jax.random.normal(ks[8], (64, 32), jnp.float32) * 0.1,
        "b_d2": jax.random.normal(ks[9], (32,), jnp.float32) * 0.1,
        "w_d3": jax.random.normal(ks[10], (32, num_classes), jnp.float32) * 0.1,
        "b_d3": jax.random.normal(ks[11], (num_classes,), jnp.float32) * 0.1,
    }


if __name__ == "__main__":
    num_classes = 10
    key = jax.random.PRNGKey(0)
    kx, kp = jax.random.split(key)
    # Input spatial size is pinned to 28x28x1 by the Linear(128, ...) layer
    # (32 channels * 2 * 2 after the three conv+pool stages).
    x = jax.random.normal(kx, (2, 1, 28, 28), jnp.float32)
    params = init_params(kp, num_classes)

    fwd = jax.jit(cnn_forward)
    logits = jax.block_until_ready(fwd(x, params))
    ref = jax.block_until_ready(reference_forward(x, params))

    assert logits.shape == (2, num_classes), logits.shape
    assert jnp.allclose(logits, ref, rtol=1e-2, atol=1e-2), float(
        jnp.max(jnp.abs(logits - ref)))
    print("KERNEL_OK")
</pallas_src>

<mosaic_0001>
module attributes {stable_mosaic.version = 11 : i64} {
  func.func @fused_cnn_kernel(%arg0: i32, %arg1: memref<1x800x9xf32, #tpu.memory_space<vmem>>, %arg2: memref<9x32xf32, #tpu.memory_space<vmem>>, %arg3: memref<1x32xf32, #tpu.memory_space<vmem>>, %arg4: memref<9x32x32xf32, #tpu.memory_space<vmem>>, %arg5: memref<1x32xf32, #tpu.memory_space<vmem>>, %arg6: memref<9x32x32xf32, #tpu.memory_space<vmem>>, %arg7: memref<1x32xf32, #tpu.memory_space<vmem>>, %arg8: memref<4x36x168xf32, #tpu.memory_space<vmem>>, %arg9: memref<4x4x24xf32, #tpu.memory_space<vmem>>, %arg10: memref<128x64xf32, #tpu.memory_space<vmem>>, %arg11: memref<1x64xf32, #tpu.memory_space<vmem>>, %arg12: memref<64x32xf32, #tpu.memory_space<vmem>>, %arg13: memref<1x32xf32, #tpu.memory_space<vmem>>, %arg14: memref<32x128xf32, #tpu.memory_space<vmem>>, %arg15: memref<1x128xf32, #tpu.memory_space<vmem>>, %arg16: memref<1x1x128xf32, #tpu.memory_space<vmem>>) attributes {dimension_semantics = [#tpu.dimension_semantics<parallel>], iteration_bounds = array<i64: 2>, scalar_prefetch = 0 : i64, scratch_operands = 0 : i64, tpu.core_type = #tpu.core_type<tc>, window_params = [{transform_indices = @transform_0, window_bounds = array<i64: 1, 800, 9>}, {pipeline_mode = #tpu.pipeline_mode<synchronous>, transform_indices = @transform_1, window_bounds = array<i64: 9, 32>}, {pipeline_mode = #tpu.pipeline_mode<synchronous>, transform_indices = @transform_2, window_bounds = array<i64: 1, 32>}, {pipeline_mode = #tpu.pipeline_mode<synchronous>, transform_indices = @transform_3, window_bounds = array<i64: 9, 32, 32>}, {pipeline_mode = #tpu.pipeline_mode<synchronous>, transform_indices = @transform_4, window_bounds = array<i64: 1, 32>}, {pipeline_mode = #tpu.pipeline_mode<synchronous>, transform_indices = @transform_5, window_bounds = array<i64: 9, 32, 32>}, {pipeline_mode = #tpu.pipeline_mode<synchronous>, transform_indices = @transform_6, window_bounds = array<i64: 1, 32>}, {pipeline_mode = #tpu.pipeline_mode<synchronous>, transform_indices = @transform_7, window_bounds = array<i64: 4, 36, 168>}, {pipeline_mode = #tpu.pipeline_mode<synchronous>, transform_indices = @transform_8, window_bounds = array<i64: 4, 4, 24>}, {pipeline_mode = #tpu.pipeline_mode<synchronous>, transform_indices = @transform_9, window_bounds = array<i64: 128, 64>}, {pipeline_mode = #tpu.pipeline_mode<synchronous>, transform_indices = @transform_10, window_bounds = array<i64: 1, 64>}, {pipeline_mode = #tpu.pipeline_mode<synchronous>, transform_indices = @transform_11, window_bounds = array<i64: 64, 32>}, {pipeline_mode = #tpu.pipeline_mode<synchronous>, transform_indices = @transform_12, window_bounds = array<i64: 1, 32>}, {pipeline_mode = #tpu.pipeline_mode<synchronous>, transform_indices = @transform_13, window_bounds = array<i64: 32, 128>}, {pipeline_mode = #tpu.pipeline_mode<synchronous>, transform_indices = @transform_14, window_bounds = array<i64: 1, 128>}, {transform_indices = @transform_15, window_bounds = array<i64: 1, 1, 128>}]} {
    %c0 = arith.constant 0 : index
    %c0_0 = arith.constant 0 : index
    %c0_1 = arith.constant 0 : index
    %0 = vector.load %arg1[%c0, %c0_0, %c0_1] : memref<1x800x9xf32, #tpu.memory_space<vmem>>, vector<1x800x9xf32>
    %1 = vector.shape_cast %0 : vector<1x800x9xf32> to vector<800x9xf32>
    %c0_2 = arith.constant 0 : index
    %c0_3 = arith.constant 0 : index
    %2 = vector.load %arg2[%c0_2, %c0_3] : memref<9x32xf32, #tpu.memory_space<vmem>>, vector<9x32xf32>
    %cst = arith.constant dense<0.000000e+00> : vector<800x32xf32>
    %3 = tpu.matmul %1, %2, %cst {dimension_numbers = #tpu.dot_dimension_numbers<[1], [0], [0], [1], [0, 0, 1, 1], [], []>} : vector<800x9xf32>, vector<9x32xf32>, vector<800x32xf32> -> vector<800x32xf32>
    %c0_4 = arith.constant 0 : index
    %c0_5 = arith.constant 0 : index
    %4 = vector.load %arg3[%c0_4, %c0_5] : memref<1x32xf32, #tpu.memory_space<vmem>>, vector<1x32xf32>
    %5 = vector.broadcast %4 : vector<1x32xf32> to vector<800x32xf32>
    %6 = arith.addf %3, %5 : vector<800x32xf32>
    %cst_6 = arith.constant 0.000000e+00 : f32
    %7 = vector.broadcast %cst_6 : f32 to vector<800x32xf32>
    %8 = arith.maximumf %6, %7 : vector<800x32xf32>
    %9 = vector.extract_strided_slice %8 {offsets = [0, 0], sizes = [196, 32], strides = [1, 1]} : vector<800x32xf32> to vector<196x32xf32>
    %10 = vector.extract_strided_slice %8 {offsets = [200, 0], sizes = [196, 32], strides = [1, 1]} : vector<800x32xf32> to vector<196x32xf32>
    %11 = arith.maximumf %9, %10 : vector<196x32xf32>
    %12 = vector.extract_strided_slice %8 {offsets = [400, 0], sizes = [196, 32], strides = [1, 1]} : vector<800x32xf32> to vector<196x32xf32>
    %13 = vector.extract_strided_slice %8 {offsets = [600, 0], sizes = [196, 32], strides = [1, 1]} : vector<800x32xf32> to vector<196x32xf32>
    %14 = arith.maximumf %12, %13 : vector<196x32xf32>
    %15 = arith.maximumf %11, %14 : vector<196x32xf32>
    %cst_7 = arith.constant 0.000000e+00 : f32
    %16 = vector.broadcast %cst_7 : f32 to vector<4x32xf32>
    %17 = tpu.concatenate %15, %16 in 0 : vector<196x32xf32>, vector<4x32xf32> -> vector<200x32xf32>
    %18 = vector.extract_strided_slice %17 {offsets = [0, 0], sizes = [168, 32], strides = [1, 1]} : vector<200x32xf32> to vector<168x32xf32>
    %c0_8 = arith.constant 0 : index
    %c0_9 = arith.constant 0 : index
    %c0_10 = arith.constant 0 : index
    %19 = vector.load %arg4[%c0_8, %c0_9, %c0_10] : memref<9x32x32xf32, #tpu.memory_space<vmem>>, vector<1x32x32xf32>
    %20 = vector.shape_cast %19 : vector<1x32x32xf32> to vector<32x32xf32>
    %cst_11 = arith.constant dense<0.000000e+00> : vector<168x32xf32>
    %21 = tpu.matmul %18, %20, %cst_11 {dimension_numbers = #tpu.dot_dimension_numbers<[1], [0], [0], [1], [0, 0, 1, 1], [], []>} : vector<168x32xf32>, vector<32x32xf32>, vector<168x32xf32> -> vector<168x32xf32>
    %22 = vector.extract_strided_slice %17 {offsets = [1, 0], sizes = [168, 32], strides = [1, 1]} : vector<200x32xf32> to vector<168x32xf32>
    %c1 = arith.constant 1 : index
    %c0_12 = arith.constant 0 : index
    %c0_13 = arith.constant 0 : index
    %23 = vector.load %arg4[%c1, %c0_12, %c0_13] : memref<9x32x32xf32, #tpu.memory_space<vmem>>, vector<1x32x32xf32>
    %24 = vector.shape_cast %23 : vector<1x32x32xf32> to vector<32x32xf32>
    %cst_14 = arith.constant dense<0.000000e+00> : vector<168x32xf32>
    %25 = tpu.matmul %22, %24, %cst_14 {dimension_numbers = #tpu.dot_dimension_numbers<[1], [0], [0], [1], [0, 0, 1, 1], [], []>} : vector<168x32xf32>, vector<32x32xf32>, vector<168x32xf32> -> vector<168x32xf32>
    %26 = arith.addf %21, %25 : vector<168x32xf32>
    %27 = vector.extract_strided_slice %17 {offsets = [2, 0], sizes = [168, 32], strides = [1, 1]} : vector<200x32xf32> to vector<168x32xf32>
    %c2 = arith.constant 2 : index
    %c0_15 = arith.constant 0 : index
    %c0_16 = arith.constant 0 : index
    %28 = vector.load %arg4[%c2, %c0_15, %c0_16] : memref<9x32x32xf32, #tpu.memory_space<vmem>>, vector<1x32x32xf32>
    %29 = vector.shape_cast %28 : vector<1x32x32xf32> to vector<32x32xf32>
    %cst_17 = arith.constant dense<0.000000e+00> : vector<168x32xf32>
    %30 = tpu.matmul %27, %29, %cst_17 {dimension_numbers = #tpu.dot_dimension_numbers<[1], [0], [0], [1], [0, 0, 1, 1], [], []>} : vector<168x32xf32>, vector<32x32xf32>, vector<168x32xf32> -> vector<168x32xf32>
    %31 = arith.addf %26, %30 : vector<168x32xf32>
    %32 = vector.extract_strided_slice %17 {offsets = [14, 0], sizes = [168, 32], strides = [1, 1]} : vector<200x32xf32> to vector<168x32xf32>
    %c3 = arith.constant 3 : index
    %c0_18 = arith.constant 0 : index
    %c0_19 = arith.constant 0 : index
    %33 = vector.load %arg4[%c3, %c0_18, %c0_19] : memref<9x32x32xf32, #tpu.memory_space<vmem>>, vector<1x32x32xf32>
    %34 = vector.shape_cast %33 : vector<1x32x32xf32> to vector<32x32xf32>
    %cst_20 = arith.constant dense<0.000000e+00> : vector<168x32xf32>
    %35 = tpu.matmul %32, %34, %cst_20 {dimension_numbers = #tpu.dot_dimension_numbers<[1], [0], [0], [1], [0, 0, 1, 1], [], []>} : vector<168x32xf32>, vector<32x32xf32>, vector<168x32xf32> -> vector<168x32xf32>
    %36 = arith.addf %31, %35 : vector<168x32xf32>
    %37 = vector.extract_strided_slice %17 {offsets = [15, 0], sizes = [168, 32], strides = [1, 1]} : vector<200x32xf32> to vector<168x32xf32>
    %c4 = arith.constant 4 : index
    %c0_21 = arith.constant 0 : index
    %c0_22 = arith.constant 0 : index
    %38 = vector.load %arg4[%c4, %c0_21, %c0_22] : memref<9x32x32xf32, #tpu.memory_space<vmem>>, vector<1x32x32xf32>
    %39 = vector.shape_cast %38 : vector<1x32x32xf32> to vector<32x32xf32>
    %cst_23 = arith.constant dense<0.000000e+00> : vector<168x32xf32>
    %40 = tpu.matmul %37, %39, %cst_23 {dimension_numbers = #tpu.dot_dimension_numbers<[1], [0], [0], [1], [0, 0, 1, 1], [], []>} : vector<168x32xf32>, vector<32x32xf32>, vector<168x32xf32> -> vector<168x32xf32>
    %41 = arith.addf %36, %40 : vector<168x32xf32>
    %42 = vector.extract_strided_slice %17 {offsets = [16, 0], sizes = [168, 32], strides = [1, 1]} : vector<200x32xf32> to vector<168x32xf32>
    %c5 = arith.constant 5 : index
    %c0_24 = arith.constant 0 : index
    %c0_25 = arith.constant 0 : index
    %43 = vector.load %arg4[%c5, %c0_24, %c0_25] : memref<9x32x32xf32, #tpu.memory_space<vmem>>, vector<1x32x32xf32>
    %44 = vector.shape_cast %43 : vector<1x32x32xf32> to vector<32x32xf32>
    %cst_26 = arith.constant dense<0.000000e+00> : vector<168x32xf32>
    %45 = tpu.matmul %42, %44, %cst_26 {dimension_numbers = #tpu.dot_dimension_numbers<[1], [0], [0], [1], [0, 0, 1, 1], [], []>} : vector<168x32xf32>, vector<32x32xf32>, vector<168x32xf32> -> vector<168x32xf32>
    %46 = arith.addf %41, %45 : vector<168x32xf32>
    %47 = vector.extract_strided_slice %17 {offsets = [28, 0], sizes = [168, 32], strides = [1, 1]} : vector<200x32xf32> to vector<168x32xf32>
    %c6 = arith.constant 6 : index
    %c0_27 = arith.constant 0 : index
    %c0_28 = arith.constant 0 : index
    %48 = vector.load %arg4[%c6, %c0_27, %c0_28] : memref<9x32x32xf32, #tpu.memory_space<vmem>>, vector<1x32x32xf32>
    %49 = vector.shape_cast %48 : vector<1x32x32xf32> to vector<32x32xf32>
    %cst_29 = arith.constant dense<0.000000e+00> : vector<168x32xf32>
    %50 = tpu.matmul %47, %49, %cst_29 {dimension_numbers = #tpu.dot_dimension_numbers<[1], [0], [0], [1], [0, 0, 1, 1], [], []>} : vector<168x32xf32>, vector<32x32xf32>, vector<168x32xf32> -> vector<168x32xf32>
    %51 = arith.addf %46, %50 : vector<168x32xf32>
    %52 = vector.extract_strided_slice %17 {offsets = [29, 0], sizes = [168, 32], strides = [1, 1]} : vector<200x32xf32> to vector<168x32xf32>
    %c7 = arith.constant 7 : index
    %c0_30 = arith.constant 0 : index
    %c0_31 = arith.constant 0 : index
    %53 = vector.load %arg4[%c7, %c0_30, %c0_31] : memref<9x32x32xf32, #tpu.memory_space<vmem>>, vector<1x32x32xf32>
    %54 = vector.shape_cast %53 : vector<1x32x32xf32> to vector<32x32xf32>
    %cst_32 = arith.constant dense<0.000000e+00> : vector<168x32xf32>
    %55 = tpu.matmul %52, %54, %cst_32 {dimension_numbers = #tpu.dot_dimension_numbers<[1], [0], [0], [1], [0, 0, 1, 1], [], []>} : vector<168x32xf32>, vector<32x32xf32>, vector<168x32xf32> -> vector<168x32xf32>
    %56 = arith.addf %51, %55 : vector<168x32xf32>
    %57 = vector.extract_strided_slice %17 {offsets = [30, 0], sizes = [168, 32], strides = [1, 1]} : vector<200x32xf32> to vector<168x32xf32>
    %c8 = arith.constant 8 : index
    %c0_33 = arith.constant 0 : index
    %c0_34 = arith.constant 0 : index
    %58 = vector.load %arg4[%c8, %c0_33, %c0_34] : memref<9x32x32xf32, #tpu.memory_space<vmem>>, vector<1x32x32xf32>
    %59 = vector.shape_cast %58 : vector<1x32x32xf32> to vector<32x32xf32>
    %cst_35 = arith.constant dense<0.000000e+00> : vector<168x32xf32>
    %60 = tpu.matmul %57, %59, %cst_35 {dimension_numbers = #tpu.dot_dimension_numbers<[1], [0], [0], [1], [0, 0, 1, 1], [], []>} : vector<168x32xf32>, vector<32x32xf32>, vector<168x32xf32> -> vector<168x32xf32>
    %61 = arith.addf %56, %60 : vector<168x32xf32>
    %c0_36 = arith.constant 0 : index
    %c0_37 = arith.constant 0 : index
    %62 = vector.load %arg5[%c0_36, %c0_37] : memref<1x32xf32, #tpu.memory_space<vmem>>, vector<1x32xf32>
    %63 = vector.broadcast %62 : vector<1x32xf32> to vector<168x32xf32>
    %64 = arith.addf %61, %63 : vector<168x32xf32>
    %cst_38 = arith.constant 0.000000e+00 : f32
    %65 = vector.broadcast %cst_38 : f32 to vector<168x32xf32>
    %66 = arith.maximumf %64, %65 : vector<168x32xf32>
    %c0_39 = arith.constant 0 : index
    %c0_40 = arith.constant 0 : index
    %c0_41 = arith.constant 0 : index
    %67 = vector.load %arg8[%c0_39, %c0_40, %c0_41] : memref<4x36x168xf32, #tpu.memory_space<vmem>>, vector<1x36x168xf32>
    %68 = vector.shape_cast %67 : vector<1x36x168xf32> to vector<36x168xf32>
    %cst_42 = arith.constant dense<0.000000e+00> : vector<36x32xf32>
    %69 = tpu.matmul %68, %66, %cst_42 {dimension_numbers = #tpu.dot_dimension_numbers<[1], [0], [0], [1], [0, 0, 1, 1], [], []>} : vector<36x168xf32>, vector<168x32xf32>, vector<36x32xf32> -> vector<36x32xf32>
    %c1_43 = arith.constant 1 : index
    %c0_44 = arith.constant 0 : index
    %c0_45 = arith.constant 0 : index
    %70 = vector.load %arg8[%c1_43, %c0_44, %c0_45] : memref<4x36x168xf32, #tpu.memory_space<vmem>>, vector<1x36x168xf32>
    %71 = vector.shape_cast %70 : vector<1x36x168xf32> to vector<36x168xf32>
    %cst_46 = arith.constant dense<0.000000e+00> : vector<36x32xf32>
    %72 = tpu.matmul %71, %66, %cst_46 {dimension_numbers = #tpu.dot_dimension_numbers<[1], [0], [0], [1], [0, 0, 1, 1], [], []>} : vector<36x168xf32>, vector<168x32xf32>, vector<36x32xf32> -> vector<36x32xf32>
    %73 = arith.maximumf %69, %72 : vector<36x32xf32>
    %c2_47 = arith.constant 2 : index
    %c0_48 = arith.constant 0 : index
    %c0_49 = arith.constant 0 : index
    %74 = vector.load %arg8[%c2_47, %c0_48, %c0_49] : memref<4x36x168xf32, #tpu.memory_space<vmem>>, vector<1x36x168xf32>
    %75 = vector.shape_cast %74 : vector<1x36x168xf32> to vector<36x168xf32>
    %cst_50 = arith.constant dense<0.000000e+00> : vector<36x32xf32>
    %76 = tpu.matmul %75, %66, %cst_50 {dimension_numbers = #tpu.dot_dimension_numbers<[1], [0], [0], [1], [0, 0, 1, 1], [], []>} : vector<36x168xf32>, vector<168x32xf32>, vector<36x32xf32> -> vector<36x32xf32>
    %77 = arith.maximumf %73, %76 : vector<36x32xf32>
    %c3_51 = arith.constant 3 : index
    %c0_52 = arith.constant 0 : index
    %c0_53 = arith.constant 0 : index
    %78 = vector.load %arg8[%c3_51, %c0_52, %c0_53] : memref<4x36x168xf32, #tpu.memory_space<vmem>>, vector<1x36x168xf32>
    %79 = vector.shape_cast %78 : vector<1x36x168xf32> to vector<36x168xf32>
    %cst_54 = arith.constant dense<0.000000e+00> : vector<36x32xf32>
    %80 = tpu.matmul %79, %66, %cst_54 {dimension_numbers = #tpu.dot_dimension_numbers<[1], [0], [0], [1], [0, 0, 1, 1], [], []>} : vector<36x168xf32>, vector<168x32xf32>, vector<36x32xf32> -> vector<36x32xf32>
    %81 = arith.maximumf %77, %80 : vector<36x32xf32>
    %cst_55 = arith.constant 0.000000e+00 : f32
    %82 = vector.broadcast %cst_55 : f32 to vector<4x32xf32>
    %83 = tpu.concatenate %81, %82 in 0 : vector<36x32xf32>, vector<4x32xf32> -> vector<40x32xf32>
    %84 = vector.extract_strided_slice %83 {offsets = [0, 0], sizes = [24, 32], strides = [1, 1]} : vector<40x32xf32> to vector<24x32xf32>
    %c0_56 = arith.constant 0 : index
    %c0_57 = arith.constant 0 : index
    %c0_58 = arith.constant 0 : index
    %85 = vector.load %arg6[%c0_56, %c0_57, %c0_58] : memref<9x32x32xf32, #tpu.memory_space<vmem>>, vector<1x32x32xf32>
    %86 = vector.shape_cast %85 : vector<1x32x32xf32> to vector<32x32xf32>
    %cst_59 = arith.constant dense<0.000000e+00> : vector<24x32xf32>
    %87 = tpu.matmul %84, %86, %cst_59 {dimension_numbers = #tpu.dot_dimension_numbers<[1], [0], [0], [1], [0, 0, 1, 1], [], []>} : vector<24x32xf32>, vector<32x32xf32>, vector<24x32xf32> -> vector<24x32xf32>
    %88 = vector.extract_strided_slice %83 {offsets = [1, 0], sizes = [24, 32], strides = [1, 1]} : vector<40x32xf32> to vector<24x32xf32>
    %c1_60 = arith.constant 1 : index
    %c0_61 = arith.constant 0 : index
    %c0_62 = arith.constant 0 : index
    %89 = vector.load %arg6[%c1_60, %c0_61, %c0_62] : memref<9x32x32xf32, #tpu.memory_space<vmem>>, vector<1x32x32xf32>
    %90 = vector.shape_cast %89 : vector<1x32x32xf32> to vector<32x32xf32>
    %cst_63 = arith.constant dense<0.000000e+00> : vector<24x32xf32>
    %91 = tpu.matmul %88, %90, %cst_63 {dimension_numbers = #tpu.dot_dimension_numbers<[1], [0], [0], [1], [0, 0, 1, 1], [], []>} : vector<24x32xf32>, vector<32x32xf32>, vector<24x32xf32> -> vector<24x32xf32>
    %92 = arith.addf %87, %91 : vector<24x32xf32>
    %93 = vector.extract_strided_slice %83 {offsets = [2, 0], sizes = [24, 32], strides = [1, 1]} : vector<40x32xf32> to vector<24x32xf32>
    %c2_64 = arith.constant 2 : index
    %c0_65 = arith.constant 0 : index
    %c0_66 = arith.constant 0 : index
    %94 = vector.load %arg6[%c2_64, %c0_65, %c0_66] : memref<9x32x32xf32, #tpu.memory_space<vmem>>, vector<1x32x32xf32>
    %95 = vector.shape_cast %94 : vector<1x32x32xf32> to vector<32x32xf32>
    %cst_67 = arith.constant dense<0.000000e+00> : vector<24x32xf32>
    %96 = tpu.matmul %93, %95, %cst_67 {dimension_numbers = #tpu.dot_dimension_numbers<[1], [0], [0], [1], [0, 0, 1, 1], [], []>} : vector<24x32xf32>, vector<32x32xf32>, vector<24x32xf32> -> vector<24x32xf32>
    %97 = arith.addf %92, %96 : vector<24x32xf32>
    %98 = vector.extract_strided_slice %83 {offsets = [6, 0], sizes = [24, 32], strides = [1, 1]} : vector<40x32xf32> to vector<24x32xf32>
    %c3_68 = arith.constant 3 : index
    %c0_69 = arith.constant 0 : index
    %c0_70 = arith.constant 0 : index
    %99 = vector.load %arg6[%c3_68, %c0_69, %c0_70] : memref<9x32x32xf32, #tpu.memory_space<vmem>>, vector<1x32x32xf32>
    %100 = vector.shape_cast %99 : vector<1x32x32xf32> to vector<32x32xf32>
    %cst_71 = arith.constant dense<0.000000e+00> : vector<24x32xf32>
    %101 = tpu.matmul %98, %100, %cst_71 {dimension_numbers = #tpu.dot_dimension_numbers<[1], [0], [0], [1], [0, 0, 1, 1], [], []>} : vector<24x32xf32>, vector<32x32xf32>, vector<24x32xf32> -> vector<24x32xf32>
    %102 = arith.addf %97, %101 : vector<24x32xf32>
    %103 = vector.extract_strided_slice %83 {offsets = [7, 0], sizes = [24, 32], strides = [1, 1]} : vector<40x32xf32> to vector<24x32xf32>
    %c4_72 = arith.constant 4 : index
    %c0_73 = arith.constant 0 : index
    %c0_74 = arith.constant 0 : index
    %104 = vector.load %arg6[%c4_72, %c0_73, %c0_74] : memref<9x32x32xf32, #tpu.memory_space<vmem>>, vector<1x32x32xf32>
    %105 = vector.shape_cast %104 : vector<1x32x32xf32> to vector<32x32xf32>
    %cst_75 = arith.constant dense<0.000000e+00> : vector<24x32xf32>
    %106 = tpu.matmul %103, %105, %cst_75 {dimension_numbers = #tpu.dot_dimension_numbers<[1], [0], [0], [1], [0, 0, 1, 1], [], []>} : vector<24x32xf32>, vector<32x32xf32>, vector<24x32xf32> -> vector<24x32xf32>
    %107 = arith.addf %102, %106 : vector<24x32xf32>
    %108 = vector.extract_strided_slice %83 {offsets = [8, 0], sizes = [24, 32], strides = [1, 1]} : vector<40x32xf32> to vector<24x32xf32>
    %c5_76 = arith.constant 5 : index
    %c0_77 = arith.constant 0 : index
    %c0_78 = arith.constant 0 : index
    %109 = vector.load %arg6[%c5_76, %c0_77, %c0_78] : memref<9x32x32xf32, #tpu.memory_space<vmem>>, vector<1x32x32xf32>
    %110 = vector.shape_cast %109 : vector<1x32x32xf32> to vector<32x32xf32>
    %cst_79 = arith.constant dense<0.000000e+00> : vector<24x32xf32>
    %111 = tpu.matmul %108, %110, %cst_79 {dimension_numbers = #tpu.dot_dimension_numbers<[1], [0], [0], [1], [0, 0, 1, 1], [], []>} : vector<24x32xf32>, vector<32x32xf32>, vector<24x32xf32> -> vector<24x32xf32>
    %112 = arith.addf %107, %111 : vector<24x32xf32>
    %113 = vector.extract_strided_slice %83 {offsets = [12, 0], sizes = [24, 32], strides = [1, 1]} : vector<40x32xf32> to vector<24x32xf32>
    %c6_80 = arith.constant 6 : index
    %c0_81 = arith.constant 0 : index
    %c0_82 = arith.constant 0 : index
    %114 = vector.load %arg6[%c6_80, %c0_81, %c0_82] : memref<9x32x32xf32, #tpu.memory_space<vmem>>, vector<1x32x32xf32>
    %115 = vector.shape_cast %114 : vector<1x32x32xf32> to vector<32x32xf32>
    %cst_83 = arith.constant dense<0.000000e+00> : vector<24x32xf32>
    %116 = tpu.matmul %113, %115, %cst_83 {dimension_numbers = #tpu.dot_dimension_numbers<[1], [0], [0], [1], [0, 0, 1, 1], [], []>} : vector<24x32xf32>, vector<32x32xf32>, vector<24x32xf32> -> vector<24x32xf32>
    %117 = arith.addf %112, %116 : vector<24x32xf32>
    %118 = vector.extract_strided_slice %83 {offsets = [13, 0], sizes = [24, 32], strides = [1, 1]} : vector<40x32xf32> to vector<24x32xf32>
    %c7_84 = arith.constant 7 : index
    %c0_85 = arith.constant 0 : index
    %c0_86 = arith.constant 0 : index
    %119 = vector.load %arg6[%c7_84, %c0_85, %c0_86] : memref<9x32x32xf32, #tpu.memory_space<vmem>>, vector<1x32x32xf32>
    %120 = vector.shape_cast %119 : vector<1x32x32xf32> to vector<32x32xf32>
    %cst_87 = arith.constant dense<0.000000e+00> : vector<24x32xf32>
    %121 = tpu.matmul %118, %120, %cst_87 {dimension_numbers = #tpu.dot_dimension_numbers<[1], [0], [0], [1], [0, 0, 1, 1], [], []>} : vector<24x32xf32>, vector<32x32xf32>, vector<24x32xf32> -> vector<24x32xf32>
    %122 = arith.addf %117, %121 : vector<24x32xf32>
    %123 = vector.extract_strided_slice %83 {offsets = [14, 0], sizes = [24, 32], strides = [1, 1]} : vector<40x32xf32> to vector<24x32xf32>
    %c8_88 = arith.constant 8 : index
    %c0_89 = arith.constant 0 : index
    %c0_90 = arith.constant 0 : index
    %124 = vector.load %arg6[%c8_88, %c0_89, %c0_90] : memref<9x32x32xf32, #tpu.memory_space<vmem>>, vector<1x32x32xf32>
    %125 = vector.shape_cast %124 : vector<1x32x32xf32> to vector<32x32xf32>
    %cst_91 = arith.constant dense<0.000000e+00> : vector<24x32xf32>
    %126 = tpu.matmul %123, %125, %cst_91 {dimension_numbers = #tpu.dot_dimension_numbers<[1], [0], [0], [1], [0, 0, 1, 1], [], []>} : vector<24x32xf32>, vector<32x32xf32>, vector<24x32xf32> -> vector<24x32xf32>
    %127 = arith.addf %122, %126 : vector<24x32xf32>
    %c0_92 = arith.constant 0 : index
    %c0_93 = arith.constant 0 : index
    %128 = vector.load %arg7[%c0_92, %c0_93] : memref<1x32xf32, #tpu.memory_space<vmem>>, vector<1x32xf32>
    %129 = vector.broadcast %128 : vector<1x32xf32> to vector<24x32xf32>
    %130 = arith.addf %127, %129 : vector<24x32xf32>
    %cst_94 = arith.constant 0.000000e+00 : f32
    %131 = vector.broadcast %cst_94 : f32 to vector<24x32xf32>
    %132 = arith.maximumf %130, %131 : vector<24x32xf32>
    %c0_95 = arith.constant 0 : index
    %c0_96 = arith.constant 0 : index
    %c0_97 = arith.constant 0 : index
    %133 = vector.load %arg9[%c0_95, %c0_96, %c0_97] : memref<4x4x24xf32, #tpu.memory_space<vmem>>, vector<1x4x24xf32>
    %134 = vector.shape_cast %133 : vector<1x4x24xf32> to vector<4x24xf32>
    %cst_98 = arith.constant dense<0.000000e+00> : vector<4x32xf32>
    %135 = tpu.matmul %134, %132, %cst_98 {dimension_numbers = #tpu.dot_dimension_numbers<[1], [0], [0], [1], [0, 0, 1, 1], [], []>} : vector<4x24xf32>, vector<24x32xf32>, vector<4x32xf32> -> vector<4x32xf32>
    %c1_99 = arith.constant 1 : index
    %c0_100 = arith.constant 0 : index
    %c0_101 = arith.constant 0 : index
    %136 = vector.load %arg9[%c1_99, %c0_100, %c0_101] : memref<4x4x24xf32, #tpu.memory_space<vmem>>, vector<1x4x24xf32>
    %137 = vector.shape_cast %136 : vector<1x4x24xf32> to vector<4x24xf32>
    %cst_102 = arith.constant dense<0.000000e+00> : vector<4x32xf32>
    %138 = tpu.matmul %137, %132, %cst_102 {dimension_numbers = #tpu.dot_dimension_numbers<[1], [0], [0], [1], [0, 0, 1, 1], [], []>} : vector<4x24xf32>, vector<24x32xf32>, vector<4x32xf32> -> vector<4x32xf32>
    %139 = arith.maximumf %135, %138 : vector<4x32xf32>
    %c2_103 = arith.constant 2 : index
    %c0_104 = arith.constant 0 : index
    %c0_105 = arith.constant 0 : index
    %140 = vector.load %arg9[%c2_103, %c0_104, %c0_105] : memref<4x4x24xf32, #tpu.memory_space<vmem>>, vector<1x4x24xf32>
    %141 = vector.shape_cast %140 : vector<1x4x24xf32> to vector<4x24xf32>
    %cst_106 = arith.constant dense<0.000000e+00> : vector<4x32xf32>
    %142 = tpu.matmul %141, %132, %cst_106 {dimension_numbers = #tpu.dot_dimension_numbers<[1], [0], [0], [1], [0, 0, 1, 1], [], []>} : vector<4x24xf32>, vector<24x32xf32>, vector<4x32xf32> -> vector<4x32xf32>
    %143 = arith.maximumf %139, %142 : vector<4x32xf32>
    %c3_107 = arith.constant 3 : index
    %c0_108 = arith.constant 0 : index
    %c0_109 = arith.constant 0 : index
    %144 = vector.load %arg9[%c3_107, %c0_108, %c0_109] : memref<4x4x24xf32, #tpu.memory_space<vmem>>, vector<1x4x24xf32>
    %145 = vector.shape_cast %144 : vector<1x4x24xf32> to vector<4x24xf32>
    %cst_110 = arith.constant dense<0.000000e+00> : vector<4x32xf32>
    %146 = tpu.matmul %145, %132, %cst_110 {dimension_numbers = #tpu.dot_dimension_numbers<[1], [0], [0], [1], [0, 0, 1, 1], [], []>} : vector<4x24xf32>, vector<24x32xf32>, vector<4x32xf32> -> vector<4x32xf32>
    %147 = arith.maximumf %143, %146 : vector<4x32xf32>
    %148 = vector.extract_strided_slice %147 {offsets = [0, 0], sizes = [1, 32], strides = [1, 1]} : vector<4x32xf32> to vector<1x32xf32>
    %c0_111 = arith.constant 0 : index
    %c0_112 = arith.constant 0 : index
    %149 = vector.load %arg10[%c0_111, %c0_112] : memref<128x64xf32, #tpu.memory_space<vmem>>, vector<32x64xf32>
    %cst_113 = arith.constant dense<0.000000e+00> : vector<1x64xf32>
    %150 = tpu.matmul %148, %149, %cst_113 {dimension_numbers = #tpu.dot_dimension_numbers<[1], [0], [0], [1], [0, 0, 1, 1], [], []>} : vector<1x32xf32>, vector<32x64xf32>, vector<1x64xf32> -> vector<1x64xf32>
    %151 = vector.extract_strided_slice %147 {offsets = [1, 0], sizes = [1, 32], strides = [1, 1]} : vector<4x32xf32> to vector<1x32xf32>
    %c32 = arith.constant 32 : index
    %c0_114 = arith.constant 0 : index
    %152 = vector.load %arg10[%c32, %c0_114] : memref<128x64xf32, #tpu.memory_space<vmem>>, vector<32x64xf32>
    %cst_115 = arith.constant dense<0.000000e+00> : vector<1x64xf32>
    %153 = tpu.matmul %151, %152, %cst_115 {dimension_numbers = #tpu.dot_dimension_numbers<[1], [0], [0], [1], [0, 0, 1, 1], [], []>} : vector<1x32xf32>, vector<32x64xf32>, vector<1x64xf32> -> vector<1x64xf32>
    %154 = arith.addf %150, %153 : vector<1x64xf32>
    %155 = vector.extract_strided_slice %147 {offsets = [2, 0], sizes = [1, 32], strides = [1, 1]} : vector<4x32xf32> to vector<1x32xf32>
    %c64 = arith.constant 64 : index
    %c0_116 = arith.constant 0 : index
    %156 = vector.load %arg10[%c64, %c0_116] : memref<128x64xf32, #tpu.memory_space<vmem>>, vector<32x64xf32>
    %cst_117 = arith.constant dense<0.000000e+00> : vector<1x64xf32>
    %157 = tpu.matmul %155, %156, %cst_117 {dimension_numbers = #tpu.dot_dimension_numbers<[1], [0], [0], [1], [0, 0, 1, 1], [], []>} : vector<1x32xf32>, vector<32x64xf32>, vector<1x64xf32> -> vector<1x64xf32>
    %158 = arith.addf %154, %157 : vector<1x64xf32>
    %159 = vector.extract_strided_slice %147 {offsets = [3, 0], sizes = [1, 32], strides = [1, 1]} : vector<4x32xf32> to vector<1x32xf32>
    %c96 = arith.constant 96 : index
    %c0_118 = arith.constant 0 : index
    %160 = vector.load %arg10[%c96, %c0_118] : memref<128x64xf32, #tpu.memory_space<vmem>>, vector<32x64xf32>
    %cst_119 = arith.constant dense<0.000000e+00> : vector<1x64xf32>
    %161 = tpu.matmul %159, %160, %cst_119 {dimension_numbers = #tpu.dot_dimension_numbers<[1], [0], [0], [1], [0, 0, 1, 1], [], []>} : vector<1x32xf32>, vector<32x64xf32>, vector<1x64xf32> -> vector<1x64xf32>
    %162 = arith.addf %158, %161 : vector<1x64xf32>
    %c0_120 = arith.constant 0 : index
    %c0_121 = arith.constant 0 : index
    %163 = vector.load %arg11[%c0_120, %c0_121] : memref<1x64xf32, #tpu.memory_space<vmem>>, vector<1x64xf32>
    %164 = arith.addf %162, %163 : vector<1x64xf32>
    %cst_122 = arith.constant 0.000000e+00 : f32
    %165 = vector.broadcast %cst_122 : f32 to vector<1x64xf32>
    %166 = arith.maximumf %164, %165 : vector<1x64xf32>
    %c0_123 = arith.constant 0 : index
    %c0_124 = arith.constant 0 : index
    %167 = vector.load %arg12[%c0_123, %c0_124] : memref<64x32xf32, #tpu.memory_space<vmem>>, vector<64x32xf32>
    %cst_125 = arith.constant dense<0.000000e+00> : vector<1x32xf32>
    %168 = tpu.matmul %166, %167, %cst_125 {dimension_numbers = #tpu.dot_dimension_numbers<[1], [0], [0], [1], [0, 0, 1, 1], [], []>} : vector<1x64xf32>, vector<64x32xf32>, vector<1x32xf32> -> vector<1x32xf32>
    %c0_126 = arith.constant 0 : index
    %c0_127 = arith.constant 0 : index
    %169 = vector.load %arg13[%c0_126, %c0_127] : memref<1x32xf32, #tpu.memory_space<vmem>>, vector<1x32xf32>
    %170 = arith.addf %168, %169 : vector<1x32xf32>
    %cst_128 = arith.constant 0.000000e+00 : f32
    %171 = vector.broadcast %cst_128 : f32 to vector<1x32xf32>
    %172 = arith.maximumf %170, %171 : vector<1x32xf32>
    %c0_129 = arith.constant 0 : index
    %c0_130 = arith.constant 0 : index
    %173 = vector.load %arg14[%c0_129, %c0_130] : memref<32x128xf32, #tpu.memory_space<vmem>>, vector<32x128xf32>
    %cst_131 = arith.constant dense<0.000000e+00> : vector<1x128xf32>
    %174 = tpu.matmul %172, %173, %cst_131 {dimension_numbers = #tpu.dot_dimension_numbers<[1], [0], [0], [1], [0, 0, 1, 1], [], []>} : vector<1x32xf32>, vector<32x128xf32>, vector<1x128xf32> -> vector<1x128xf32>
    %c0_132 = arith.constant 0 : index
    %c0_133 = arith.constant 0 : index
    %175 = vector.load %arg15[%c0_132, %c0_133] : memref<1x128xf32, #tpu.memory_space<vmem>>, vector<1x128xf32>
    %176 = arith.addf %174, %175 : vector<1x128xf32>
    %c0_134 = arith.constant 0 : index
    %c0_135 = arith.constant 0 : index
    %c0_136 = arith.constant 0 : index
    %177 = vector.load %arg16[%c0_134, %c0_135, %c0_136] : memref<1x1x128xf32, #tpu.memory_space<vmem>>, vector<1x1x128xf32>
    %178 = vector.shape_cast %177 : vector<1x1x128xf32> to vector<1x128xf32>
    %179 = vector.shape_cast %176 : vector<1x128xf32> to vector<1x1x128xf32>
    tpu.vector_store %arg16[%c0_134, %c0_135, %c0_136], %179 {strides = array<i32>} : memref<1x1x128xf32, #tpu.memory_space<vmem>>, vector<1x1x128xf32>,
    return
  }
  func.func @transform_0(%arg0: i32) -> (i32, i32, i32) {
    %c0_i32 = arith.constant 0 : i32
    %c0_i32_0 = arith.constant 0 : i32
    %c0_i32_1 = arith.constant 0 : i32
    return %arg0, %c0_i32, %c0_i32_0 : i32, i32, i32
  }
  func.func @transform_1(%arg0: i32) -> (i32, i32) {
    %c0_i32 = arith.constant 0 : i32
    %c0_i32_0 = arith.constant 0 : i32
    %c0_i32_1 = arith.constant 0 : i32
    return %c0_i32, %c0_i32_0 : i32, i32
  }
  func.func @transform_2(%arg0: i32) -> (i32, i32) {
    %c0_i32 = arith.constant 0 : i32
    %c0_i32_0 = arith.constant 0 : i32
    %c0_i32_1 = arith.constant 0 : i32
    return %c0_i32, %c0_i32_0 : i32, i32
  }
  func.func @transform_3(%arg0: i32) -> (i32, i32, i32) {
    %c0_i32 = arith.constant 0 : i32
    %c0_i32_0 = arith.constant 0 : i32
    %c0_i32_1 = arith.constant 0 : i32
    %c0_i32_2 = arith.constant 0 : i32
    return %c0_i32, %c0_i32_0, %c0_i32_1 : i32, i32, i32
  }
  func.func @transform_4(%arg0: i32) -> (i32, i32) {
    %c0_i32 = arith.constant 0 : i32
    %c0_i32_0 = arith.constant 0 : i32
    %c0_i32_1 = arith.constant 0 : i32
    return %c0_i32, %c0_i32_0 : i32, i32
  }
  func.func @transform_5(%arg0: i32) -> (i32, i32, i32) {
    %c0_i32 = arith.constant 0 : i32
    %c0_i32_0 = arith.constant 0 : i32
    %c0_i32_1 = arith.constant 0 : i32
    %c0_i32_2 = arith.constant 0 : i32
    return %c0_i32, %c0_i32_0, %c0_i32_1 : i32, i32, i32
  }
  func.func @transform_6(%arg0: i32) -> (i32, i32) {
    %c0_i32 = arith.constant 0 : i32
    %c0_i32_0 = arith.constant 0 : i32
    %c0_i32_1 = arith.constant 0 : i32
    return %c0_i32, %c0_i32_0 : i32, i32
  }
  func.func @transform_7(%arg0: i32) -> (i32, i32, i32) {
    %c0_i32 = arith.constant 0 : i32
    %c0_i32_0 = arith.constant 0 : i32
    %c0_i32_1 = arith.constant 0 : i32
    %c0_i32_2 = arith.constant 0 : i32
    return %c0_i32, %c0_i32_0, %c0_i32_1 : i32, i32, i32
  }
  func.func @transform_8(%arg0: i32) -> (i32, i32, i32) {
    %c0_i32 = arith.constant 0 : i32
    %c0_i32_0 = arith.constant 0 : i32
    %c0_i32_1 = arith.constant 0 : i32
    %c0_i32_2 = arith.constant 0 : i32
    return %c0_i32, %c0_i32_0, %c0_i32_1 : i32, i32, i32
  }
  func.func @transform_9(%arg0: i32) -> (i32, i32) {
    %c0_i32 = arith.constant 0 : i32
    %c0_i32_0 = arith.constant 0 : i32
    %c0_i32_1 = arith.constant 0 : i32
    return %c0_i32, %c0_i32_0 : i32, i32
  }
  func.func @transform_10(%arg0: i32) -> (i32, i32) {
    %c0_i32 = arith.constant 0 : i32
    %c0_i32_0 = arith.constant 0 : i32
    %c0_i32_1 = arith.constant 0 : i32
    return %c0_i32, %c0_i32_0 : i32, i32
  }
  func.func @transform_11(%arg0: i32) -> (i32, i32) {
    %c0_i32 = arith.constant 0 : i32
    %c0_i32_0 = arith.constant 0 : i32
    %c0_i32_1 = arith.constant 0 : i32
    return %c0_i32, %c0_i32_0 : i32, i32
  }
  func.func @transform_12(%arg0: i32) -> (i32, i32) {
    %c0_i32 = arith.constant 0 : i32
    %c0_i32_0 = arith.constant 0 : i32
    %c0_i32_1 = arith.constant 0 : i32
    return %c0_i32, %c0_i32_0 : i32, i32
  }
  func.func @transform_13(%arg0: i32) -> (i32, i32) {
    %c0_i32 = arith.constant 0 : i32
    %c0_i32_0 = arith.constant 0 : i32
    %c0_i32_1 = arith.constant 0 : i32
    return %c0_i32, %c0_i32_0 : i32, i32
  }
  func.func @transform_14(%arg0: i32) -> (i32, i32) {
    %c0_i32 = arith.constant 0 : i32
    %c0_i32_0 = arith.constant 0 : i32
    %c0_i32_1 = arith.constant 0 : i32
    return %c0_i32, %c0_i32_0 : i32, i32
  }
  func.func @transform_15(%arg0: i32) -> (i32, i32, i32) {
    %c0_i32 = arith.constant 0 : i32
    %c0_i32_0 = arith.constant 0 : i32
    %c0_i32_1 = arith.constant 0 : i32
    return %arg0, %c0_i32, %c0_i32_0 : i32, i32, i32
  }
}

</mosaic_0001>

<bundles_post_ra>
// kernel: cnn_forward.1
= control target key start
LH: loop header
LB: loop body
LE: loop exit
PB: predicated region body
PF: predicated region fallthrough
CT: control target
= control target key end

     0   :  { %s6958_s0 = inlined_call_operand.vmem [shape: f32[2,800,9], index: 0, kind: input, shape index: {}]   ;;  %s6959_s1 = inlined_call_operand.vmem [shape: f32[9,32], index: 1, kind: input, shape index: {}]   ;;  %s6960_s2 = inlined_call_operand.vmem [shape: f32[1,32], index: 2, kind: input, shape index: {}]   ;;  %s6961_s3 = inlined_call_operand.vmem [shape: f32[9,32,32], index: 3, kind: input, shape index: {}]   ;;  %s6962_s4 = inlined_call_operand.vmem [shape: f32[1,32], index: 4, kind: input, shape index: {}]   ;;  %s6963_s5 = inlined_call_operand.vmem [shape: f32[9,32,32], index: 5, kind: input, shape index: {}]   ;;  %s6964_s6 = inlined_call_operand.vmem [shape: f32[1,32], index: 6, kind: input, shape index: {}]   ;;  %s6965_s7 = inlined_call_operand.vmem [shape: f32[4,36,168], index: 7, kind: input, shape index: {}]   ;;  %s6966_s8 = inlined_call_operand.vmem [shape: f32[4,4,24], index: 8, kind: input, shape index: {}]   ;;  %s6967_s9 = inlined_call_operand.vmem [shape: f32[128,64], index: 9, kind: input, shape index: {}]   ;;  %s6968_s10 = inlined_call_operand.vmem [shape: f32[1,64], index: 10, kind: input, shape index: {}]   ;;  %s6969_s11 = inlined_call_operand.vmem [shape: f32[64,32], index: 11, kind: input, shape index: {}]   ;;  %s6970_s12 = inlined_call_operand.vmem [shape: f32[1,32], index: 12, kind: input, shape index: {}]   ;;  %s6971_s13 = inlined_call_operand.vmem [shape: f32[32,128], index: 13, kind: input, shape index: {}]   ;;  %s6972_s14 = inlined_call_operand.vmem [shape: f32[1,128], index: 14, kind: input, shape index: {}]   ;;  %s6973_s15 = inlined_call_operand.hbm [shape: f32[2,1,128], index: 15, kind: output, shape index: {}]  }
   0x1   :  { %6983 = sst [smem:[#allocation38_spill]] %s6958_s0 }
   0x2   :  { %6984 = sst [smem:[#allocation39_spill]] %s6959_s1 }
   0x3   :  { %6985 = sst [smem:[#allocation40_spill]] %s6960_s2 }
   0x4   :  { %6986 = sst [smem:[#allocation41_spill]] %s6961_s3 }
   0x5   :  { %6987 = sst [smem:[#allocation42_spill]] %s6962_s4 }
   0x6   :  { %20 = vsyncpa [#allocation3], 0 }
   0x7   :  { %22 = vsyncpa [#allocation3 + $0x1], 0  ;;  %s4719_s18 = smov 0   ;;  %s4721_s19 = smov 0  }
   0x8   :  { %s4723_s20 = smov 0   ;;  %s4725_s21 = smov 0  }
   0x9 LB: > { %s4740_s22 = sadd.s32 4294967295, %s4637_s21   ;;  %s4075_s23 = sadd.s32 4294967294, %s4637_s21   ;;  %s4637_s21 = sphi %s4725_s21, %s7123_s21   ;;  %s4633_s20 = sphi %s4723_s20, %s7122_s20   ;;  %s4629_s19 = sphi %s4721_s19, %s7121_s19   ;;  %s4625_s18 = sphi %s4719_s18, %s7120_s18  }
   0xa   : > { %s4744_s24 = sadd.s32 1, %s4637_s21   ;;  %s355_s25 = sadd.s32 1, %s4633_s20 }
   0xb   : > { %s352_s26 = ssub.s32 %s4637_s21, %s4744_s24  ;;  %p365_p0 = scmp.ne.s32.totalorder %s4633_s20, %s4629_s19 }
   0xc   : > { %p353_p1 = scmp.eq.s32.totalorder %s352_s26, 0  ;;  %p366_p2 = scmp.eq.s32.totalorder %s4740_s22, 1 }
   0xd   : > { %p371_p3 = scmp.ne.s32.totalorder %s4629_s19, %s4625_s18  ;;  %p372_p4 = scmp.eq.s32.totalorder %s4075_s23, 1 }
   0xe   : > { %s4755_s27 = scalar_select %p353_p1, %s4633_s20, %s355_s25  }
   0xf   : > { %p4757_p5 = por %p366_p2, %p365_p0  ;;  %p4761_p6 = por %p372_p4, %p371_p3 }
  0x10   : > { %6988 = sst [smem:[#allocation5_spill]] %s4755_s27  ;;  %p4078_p7 = scmp.ge.s32.totalorder %s4637_s21, 1 }
  0x11   : > { %p440_p8 = scmp.lt.s32.totalorder %s4637_s21, 3 }
  0x13   : > { %p441_p9 = pnand %p4078_p7, %p440_p8 }
  0x15   : > { %444 = sbr.rel (%p441_p9) target bundleno = 2450 (0x992), region = 80 }
  0x1a   : > { %s6991_s1 = sld [smem:[#allocation39_spill]]  ;;  %vm899_vm0 = vcmask 1040384   ;;  %p487_p10 = scmp.lt.s32.totalorder %s4740_s22, 1  ;;  %vm598_vm1 = vcmask 72704   ;;  %vm1915_vm2 = vcmask 1041408   ;;  %vm1395_vm3 = vcmask 1043456  }
  0x1b   : > { %s6992_s0 = sld [smem:[#allocation38_spill]]  ;;  %vm2601_vm4 = vcmask 1042432   ;;  %vm1472_vm5 = vcmask 261120   ;;  %vm1428_vm6 = vcmask 1046528   ;;  %vm1722_vm7 = vcmask 1045504   ;;  %s4016_s16 = scalar_lea.hbm %s6973_s15, %s4740_s22 }
  0x1c   : > { %s488_s25 = scalar_select %p487_p10, %s4740_s22, 1  ;;  %vm2958_vm8 = vcmask 326656   ;;  %vm3729_vm9 = vcmask 195584   ;;  %vm3953_vm10 = vcmask 523264  }
  0x1d   : > { %s7020_s3 = sld [smem:[#allocation41_spill]]  ;;  %s4595_s30 = scalar_lea.hbm %s6973_s15, 2 }
  0x1e   : > { %s4532_s26 = smul.u32 800, %s488_s25  ;;  %s7021_s2 = sld [smem:[#allocation40_spill]] }
  0x1f   : > { %s7094_s4 = sld [smem:[#allocation42_spill]] }
  0x20   : > { %v593_v0 = vld [vmem:[%s6991_s1 + $0x8] sm:$0x1]  ;;  %v592_v1 = vld [vmem:[%s6991_s1] sm:$0xff] }
  0x21   : > { %4080 = vmatpush.msk.msra.mxu0 %vm899_vm0, %v593_v0  ;;  %4526 = vmatpush.msk.msra.mxu1 %vm899_vm0, %v593_v0  ;;  %s4782_s17 = scalar_lea.vmem %s6992_s0, %s4532_s26 }
  0x22   : > { %4527 = vmatpush.msk.msra.mxu2 %vm899_vm0, %v593_v0  ;;  %4528 = vmatpush.msk.msra.mxu3 %vm899_vm0, %v593_v0  ;;  %v492_v2 = vld [vmem:[%s4782_s17] sm:$0xff]  ;;  %v493_v3 = vld [vmem:[%s4782_s17 + $0x8] sm:$0xff]  ;;  %v494_v4 = vld [vmem:[%s4782_s17 + $0x10] sm:$0xff] }
  0x23   : > { %918 = vmatpush.msra.mxu0 %v592_v1  ;;  %4529 = vmatpush.msra.mxu1 %v592_v1  ;;  %v495_v5 = vld [vmem:[%s4782_s17 + $0x18] sm:$0xff]  ;;  %v496_v6 = vld [vmem:[%s4782_s17 + $0x20] sm:$0xff]  ;;  %v497_v7 = vld [vmem:[%s4782_s17 + $0x28] sm:$0xff] }
  0x24   : > { %4530 = vmatpush.msra.mxu2 %v592_v1  ;;  %4531 = vmatpush.msra.mxu3 %v592_v1  ;;  %v498_v8 = vld [vmem:[%s4782_s17 + $0x30] sm:$0xff]  ;;  %v499_v9 = vld [vmem:[%s4782_s17 + $0x38] sm:$0xff]  ;;  %v500_v10 = vld [vmem:[%s4782_s17 + $0x40] sm:$0xff] }
  0x25   : > { %4081 = vmatmul.msk.f32.vlgmr.msra.gmra.mxu0 %vm598_vm1, %v492_v2  ;;  %v501_v11 = vld [vmem:[%s4782_s17 + $0x48] sm:$0xff]  ;;  %v502_v12 = vld [vmem:[%s4782_s17 + $0x50] sm:$0xff]  ;;  %v503_v13 = vld [vmem:[%s4782_s17 + $0x58] sm:$0xff] }
  0x26   : > { %v504_v14 = vld [vmem:[%s4782_s17 + $0x60] sm:$0xff]  ;;  %v505_v15 = vld [vmem:[%s4782_s17 + $0x68] sm:$0xff]  ;;  %v506_v16 = vld [vmem:[%s4782_s17 + $0x70] sm:$0xff] }
  0x27   : > { %v507_v17 = vld [vmem:[%s4782_s17 + $0x78] sm:$0xff]  ;;  %v508_v19 = vld [vmem:[%s4782_s17 + $0x80] sm:$0xff]  ;;  %v509_v21 = vld [vmem:[%s4782_s17 + $0x88] sm:$0xff] }
  0x28   : > { %v510_v23 = vld [vmem:[%s4782_s17 + $0x90] sm:$0xff]  ;;  %v511_v25 = vld [vmem:[%s4782_s17 + $0x98] sm:$0xff]  ;;  %v512_v27 = vld [vmem:[%s4782_s17 + $0xa0] sm:$0xff] }
  0x29   : > { %v513_v29 = vld [vmem:[%s4782_s17 + $0xa8] sm:$0xff]  ;;  %v514_v31 = vld [vmem:[%s4782_s17 + $0xb0] sm:$0xff]  ;;  %v515_v33 = vld [vmem:[%s4782_s17 + $0xb8] sm:$0xff] }
  0x2a   : > { %v516_v35 = vld [vmem:[%s4782_s17 + $0xc0] sm:$0xff]  ;;  %v517_v37 = vld [vmem:[%s4782_s17 + $0xc8] sm:$0xff]  ;;  %v518_v39 = vld [vmem:[%s4782_s17 + $0xd0] sm:$0xff] }
  0x2b   : > { %v519_v41 = vld [vmem:[%s4782_s17 + $0xd8] sm:$0xff]  ;;  %v520_v43 = vld [vmem:[%s4782_s17 + $0xe0] sm:$0xff]  ;;  %v521_v45 = vld [vmem:[%s4782_s17 + $0xe8] sm:$0xff] }
  0x2c   : > { %v522_v47 = vld [vmem:[%s4782_s17 + $0xf0] sm:$0xff]  ;;  %v523_v49 = vld [vmem:[%s4782_s17 + $0xf8] sm:$0xff]  ;;  %v524_v51 = vld [vmem:[%s4782_s17 + $0x100] sm:$0xff] }
  0x2d   : > { %4082 = vmatmul.msk.f32.gmra.mxu0 %vm598_vm1, %v493_v3  ;;  %v525_v53 = vld [vmem:[%s4782_s17 + $0x108] sm:$0xff]  ;;  %v526_v55 = vld [vmem:[%s4782_s17 + $0x110] sm:$0xff]  ;;  %v527_v57 = vld [vmem:[%s4782_s17 + $0x118] sm:$0xff] }
  0x2e   : > { %v528_v59 = vld [vmem:[%s4782_s17 + $0x120] sm:$0xff]  ;;  %v529_v61 = vld [vmem:[%s4782_s17 + $0x128] sm:$0xff]  ;;  %v530_v63 = vld [vmem:[%s4782_s17 + $0x130] sm:$0xff] }
  0x2f   : > { %v531_v1 = vld [vmem:[%s4782_s17 + $0x138] sm:$0xff]  ;;  %v532_v3 = vld [vmem:[%s4782_s17 + $0x140] sm:$0xff] }
  0x35   : > { %4083 = vmatmul.msk.f32.gmra.mxu0 %vm598_vm1, %v494_v4 }
  0x3d   : > { %4084 = vmatmul.msk.f32.gmra.mxu0 %vm598_vm1, %v495_v5  ;;  %v533_v5 = vld [vmem:[%s4782_s17 + $0x148] sm:$0xff] }
  0x45   : > { %4085 = vmatmul.msk.f32.gmra.mxu0 %vm598_vm1, %v496_v6 }
  0x4d   : > { %4086 = vmatmul.msk.f32.gmra.mxu0 %vm598_vm1, %v497_v7  ;;  %v534_v7 = vld [vmem:[%s4782_s17 + $0x150] sm:$0xff] }
  0x55   : > { %4087 = vmatmul.msk.f32.gmra.mxu0 %vm598_vm1, %v498_v8 }
  0x5d   : > { %4088 = vmatmul.msk.f32.gmra.mxu0 %vm598_vm1, %v499_v9  ;;  %v535_v9 = vld [vmem:[%s4782_s17 + $0x158] sm:$0xff] }
  0x65   : > { %4089 = vmatmul.msk.f32.gmra.mxu0 %vm598_vm1, %v500_v10 }
  0x6d   : > { %4090 = vmatmul.msk.f32.gmra.mxu0 %vm598_vm1, %v501_v11  ;;  %v536_v11 = vld [vmem:[%s4782_s17 + $0x160] sm:$0xff] }
  0x75   : > { %4091 = vmatmul.msk.f32.gmra.mxu0 %vm598_vm1, %v502_v12 }
  0x7d   : > { %4092 = vmatmul.msk.f32.gmra.mxu0 %vm598_vm1, %v503_v13  ;;  %v537_v13 = vld [vmem:[%s4782_s17 + $0x168] sm:$0xff] }
  0x85   : > { %4093 = vmatmul.msk.f32.gmra.mxu0 %vm598_vm1, %v504_v14 }
  0x8d   : > { %4094 = vmatmul.msk.f32.gmra.mxu0 %vm598_vm1, %v505_v15  ;;  %v538_v15 = vld [vmem:[%s4782_s17 + $0x170] sm:$0xff] }
  0x95   : > { %4095 = vmatmul.msk.f32.gmra.mxu0 %vm598_vm1, %v506_v16 }
  0x9d   : > { %4096 = vmatmul.msk.f32.gmra.mxu0 %vm598_vm1, %v507_v17  ;;  %v539_v17 = vld [vmem:[%s4782_s17 + $0x178] sm:$0xff] }
  0xa2   : > { %v4816_v18 = vpop.f32.mrf.mxu0 }
  0xa5   : > { %4097 = vmatmul.msk.f32.gmra.mxu0 %vm598_vm1, %v508_v19 }
  0xaa   : > { %v4820_v20 = vpop.f32.mrf.mxu0 }
  0xad   : > { %4098 = vmatmul.msk.f32.gmra.mxu0 %vm598_vm1, %v509_v21  ;;  %v540_v21 = vld [vmem:[%s4782_s17 + $0x180] sm:$0xff] }
  0xb2   : > { %v4824_v22 = vpop.f32.mrf.mxu0 }
  0xb5   : > { %4099 = vmatmul.msk.f32.gmra.mxu0 %vm598_vm1, %v510_v23 }
  0xba   : > { %v4828_v24 = vpop.f32.mrf.mxu0 }
  0xbd   : > { %4100 = vmatmul.msk.f32.gmra.mxu0 %vm598_vm1, %v511_v25  ;;  %v541_v25 = vld [vmem:[%s4782_s17 + $0x188] sm:$0xff] }
  0xc2   : > { %v4832_v26 = vpop.f32.mrf.mxu0 }
  0xc5   : > { %4101 = vmatmul.msk.f32.gmra.mxu0 %vm598_vm1, %v512_v27 }
  0xca   : > { %v4836_v28 = vpop.f32.mrf.mxu0 }
  0xcd   : > { %4102 = vmatmul.msk.f32.gmra.mxu0 %vm598_vm1, %v513_v29  ;;  %v542_v29 = vld [vmem:[%s4782_s17 + $0x190] sm:$0xff] }
  0xd2   : > { %v4840_v30 = vpop.f32.mrf.mxu0 }
  0xd5   : > { %4103 = vmatmul.msk.f32.gmra.mxu0 %vm598_vm1, %v514_v31 }
  0xda   : > { %v4844_v32 = vpop.f32.mrf.mxu0 }
  0xdd   : > { %4104 = vmatmul.msk.f32.gmra.mxu0 %vm598_vm1, %v515_v33  ;;  %v543_v33 = vld [vmem:[%s4782_s17 + $0x198] sm:$0xff] }
  0xe2   : > { %v4848_v34 = vpop.f32.mrf.mxu0 }
  0xe5   : > { %4105 = vmatmul.msk.f32.gmra.mxu0 %vm598_vm1, %v516_v35 }
  0xea   : > { %v4852_v36 = vpop.f32.mrf.mxu0 }
  0xed   : > { %4106 = vmatmul.msk.f32.gmra.mxu0 %vm598_vm1, %v517_v37  ;;  %v544_v37 = vld [vmem:[%s4782_s17 + $0x1a0] sm:$0xff] }
  0xf2   : > { %v4856_v38 = vpop.f32.mrf.mxu0 }
  0xf5   : > { %4107 = vmatmul.msk.f32.gmra.mxu0 %vm598_vm1, %v518_v39 }
  0xfa   : > { %v4860_v40 = vpop.f32.mrf.mxu0 }
  0xfd   : > { %4108 = vmatmul.msk.f32.gmra.mxu0 %vm598_vm1, %v519_v41  ;;  %v545_v41 = vld [vmem:[%s4782_s17 + $0x1a8] sm:$0xff] }
 0x102   : > { %v4864_v42 = vpop.f32.mrf.mxu0 }
 0x105   : > { %4109 = vmatmul.msk.f32.gmra.mxu0 %vm598_vm1, %v520_v43 }
 0x10a   : > { %v4868_v44 = vpop.f32.mrf.mxu0 }
 0x10b   : > { %6993 = vst [vmem:[#allocation6_spill] sm:$0xff] %v4868_v44 }
 0x10d   : > { %4110 = vmatmul.msk.f32.gmra.mxu0 %vm598_vm1, %v521_v45  ;;  %v546_v45 = vld [vmem:[%s4782_s17 + $0x1b0] sm:$0xff] }
 0x112   : > { %v4872_v46 = vpop.f32.mrf.mxu0 }
 0x113   : > { %6994 = vst [vmem:[#allocation7_spill] sm:$0xff] %v4872_v46 }
 0x115   : > { %4111 = vmatmul.msk.f32.gmra.mxu0 %vm598_vm1, %v522_v47 }
 0x11a   : > { %v4876_v48 = vpop.f32.mrf.mxu0 }
 0x11b   : > { %6995 = vst [vmem:[#allocation8_spill] sm:$0xff] %v4876_v48 }
 0x11d   : > { %4112 = vmatmul.msk.f32.gmra.mxu0 %vm598_vm1, %v523_v49  ;;  %v547_v49 = vld [vmem:[%s4782_s17 + $0x1b8] sm:$0xff] }
 0x122   : > { %v4880_v50 = vpop.f32.mrf.mxu0 }
 0x123   : > { %6996 = vst [vmem:[#allocation9_spill] sm:$0xff] %v4880_v50  ;;  %v577_v50 = vld [vmem:[%s4782_s17 + $0x2a8] sm:$0xff] }
 0x125   : > { %4113 = vmatmul.msk.f32.gmra.mxu0 %vm598_vm1, %v524_v51 }
 0x12a   : > { %v4884_v52 = vpop.f32.mrf.mxu0 }
 0x12b   : > { %6997 = vst [vmem:[#allocation10_spill] sm:$0xff] %v4884_v52 }
 0x12d   : > { %4114 = vmatmul.msk.f32.gmra.mxu0 %vm598_vm1, %v525_v53  ;;  %v548_v53 = vld [vmem:[%s4782_s17 + $0x1c0] sm:$0xff] }
 0x132   : > { %v4888_v54 = vpop.f32.mrf.mxu0 }
 0x133   : > { %6998 = vst [vmem:[#allocation11_spill] sm:$0xff] %v4888_v54 }
 0x135   : > { %4115 = vmatmul.msk.f32.gmra.mxu0 %vm598_vm1, %v526_v55 }
 0x13a   : > { %v4892_v56 = vpop.f32.mrf.mxu0 }
 0x13b   : > { %6999 = vst [vmem:[#allocation12_spill] sm:$0xff] %v4892_v56 }
 0x13d   : > { %4116 = vmatmul.msk.f32.gmra.mxu0 %vm598_vm1, %v527_v57  ;;  %v549_v57 = vld [vmem:[%s4782_s17 + $0x1c8] sm:$0xff] }
 0x142   : > { %v4896_v58 = vpop.f32.mrf.mxu0 }
 0x143   : > { %7000 = vst [vmem:[#allocation13_spill] sm:$0xff] %v4896_v58 }
 0x145   : > { %4117 = vmatmul.msk.f32.gmra.mxu0 %vm598_vm1, %v528_v59 }
 0x14a   : > { %v4900_v60 = vpop.f32.mrf.mxu0 }
 0x14b   : > { %7001 = vst [vmem:[#allocation14_spill] sm:$0xff] %v4900_v60 }
 0x14d   : > { %4118 = vmatmul.msk.f32.gmra.mxu0 %vm598_vm1, %v529_v61  ;;  %v550_v61 = vld [vmem:[%s4782_s17 + $0x1d0] sm:$0xff] }
 0x152   : > { %v4904_v62 = vpop.f32.mrf.mxu0 }
 0x155   : > { %4119 = vmatmul.msk.f32.gmra.mxu0 %vm598_vm1, %v530_v63 }
 0x15a   : > { %v4908_v0 = vpop.f32.mrf.mxu0 }
 0x15d   : > { %4120 = vmatmul.msk.f32.gmra.mxu0 %vm598_vm1, %v531_v1  ;;  %v551_v1 = vld [vmem:[%s4782_s17 + $0x1d8] sm:$0xff] }
 0x162   : > { %v4912_v2 = vpop.f32.mrf.mxu0 }
 0x165   : > { %4121 = vmatmul.msk.f32.gmra.mxu0 %vm598_vm1, %v532_v3 }
 0x16a   : > { %v4916_v4 = vpop.f32.mrf.mxu0 }
 0x16d   : > { %4122 = vmatmul.msk.f32.gmra.mxu0 %vm598_vm1, %v533_v5  ;;  %v552_v5 = vld [vmem:[%s4782_s17 + $0x1e0] sm:$0xff] }
 0x172   : > { %v4920_v6 = vpop.f32.mrf.mxu0 }
 0x175   : > { %4123 = vmatmul.msk.f32.gmra.mxu0 %vm598_vm1, %v534_v7 }
 0x17a   : > { %v4924_v8 = vpop.f32.mrf.mxu0 }
 0x17d   : > { %4124 = vmatmul.msk.f32.gmra.mxu0 %vm598_vm1, %v535_v9  ;;  %v553_v9 = vld [vmem:[%s4782_s17 + $0x1e8] sm:$0xff] }
 0x182   : > { %v4928_v10 = vpop.f32.mrf.mxu0 }
 0x185   : > { %4125 = vmatmul.msk.f32.gmra.mxu0 %vm598_vm1, %v536_v11 }
 0x18a   : > { %v4932_v12 = vpop.f32.mrf.mxu0 }
 0x18d   : > { %4126 = vmatmul.msk.f32.gmra.mxu0 %vm598_vm1, %v537_v13  ;;  %v554_v13 = vld [vmem:[%s4782_s17 + $0x1f0] sm:$0xff] }
 0x192   : > { %v4936_v14 = vpop.f32.mrf.mxu0 }
 0x195   : > { %4127 = vmatmul.msk.f32.gmra.mxu0 %vm598_vm1, %v538_v15 }
 0x19a   : > { %v4940_v16 = vpop.f32.mrf.mxu0 }
 0x19d   : > { %4128 = vmatmul.msk.f32.gmra.mxu0 %vm598_vm1, %v539_v17  ;;  %v555_v17 = vld [vmem:[%s4782_s17 + $0x1f8] sm:$0xff] }
 0x1a2   : > { %v4944_v19 = vpop.f32.mrf.mxu0 }
 0x1a5   : > { %4129 = vmatmul.msk.f32.gmra.mxu0 %vm598_vm1, %v540_v21  ;;  %v584_v21 = vld [vmem:[%s4782_s17 + $0x2e0] sm:$0xff] }
 0x1a6   : > { %4173 = vmatmul.msk.f32.vlgmr.msra.gmra.mxu1 %vm598_vm1, %v584_v21  ;;  %v590_v21 = vld [vmem:[%s4782_s17 + $0x310] sm:$0xff] }
 0x1aa   : > { %v4948_v23 = vpop.f32.mrf.mxu0 }
 0x1ad   : > { %4130 = vmatmul.msk.f32.gmra.mxu0 %vm598_vm1, %v541_v25  ;;  %v585_v25 = vld [vmem:[%s4782_s17 + $0x2e8] sm:$0xff] }
 0x1ae   : > { %4174 = vmatmul.msk.f32.vlgmr.msra.gmra.mxu2 %vm598_vm1, %v585_v25 }
 0x1b2   : > { %v4952_v27 = vpop.f32.mrf.mxu0 }
 0x1b5   : > { %4131 = vmatmul.msk.f32.gmra.mxu0 %vm598_vm1, %v542_v29 }
 0x1ba   : > { %v4956_v31 = vpop.f32.mrf.mxu0 }
 0x1bd   : > { %4132 = vmatmul.msk.f32.gmra.mxu0 %vm598_vm1, %v543_v33  ;;  %v556_v33 = vld [vmem:[%s4782_s17 + $0x200] sm:$0xff] }
 0x1c2   : > { %v4960_v35 = vpop.f32.mrf.mxu0 }
 0x1c5   : > { %4133 = vmatmul.msk.f32.gmra.mxu0 %vm598_vm1, %v544_v37  ;;  %v586_v37 = vld [vmem:[%s4782_s17 + $0x2f0] sm:$0xff] }
 0x1c6   : > { %4175 = vmatmul.msk.f32.gmra.mxu2 %vm598_vm1, %v586_v37  ;;  %v591_v37 = vld [vmem:[%s4782_s17 + $0x318] sm:$0xff] }
 0x1ca   : > { %v4964_v39 = vpop.f32.mrf.mxu0 }
 0x1cd   : > { %4134 = vmatmul.msk.f32.gmra.mxu0 %vm598_vm1, %v545_v41 }
 0x1d2   : > { %v4968_v43 = vpop.f32.mrf.mxu0 }
 0x1d5   : > { %4135 = vmatmul.msk.f32.gmra.mxu0 %vm598_vm1, %v546_v45  ;;  %v557_v45 = vld [vmem:[%s4782_s17 + $0x208] sm:$0xff] }
 0x1da   : > { %v4972_v47 = vpop.f32.mrf.mxu0 }
 0x1db   : > { %7002 = vst [vmem:[#allocation15_spill] sm:$0xff] %v4972_v47 }
 0x1dd   : > { %4136 = vmatmul.msk.f32.gmra.mxu0 %vm598_vm1, %v547_v49  ;;  %v587_v49 = vld [vmem:[%s4782_s17 + $0x2f8] sm:$0xff] }
 0x1de   : > { %4176 = vmatmul.msk.f32.gmra.mxu2 %vm598_vm1, %v587_v49  ;;  %v562_v49 = vld [vmem:[%s4782_s17 + $0x230] sm:$0xff] }
 0x1e2   : > { %v4976_v51 = vpop.f32.mrf.mxu0 }
 0x1e3   : > { %7003 = vst [vmem:[#allocation16_spill] sm:$0xff] %v4976_v51 }
 0x1e5   : > { %4137 = vmatmul.msk.f32.gmra.mxu0 %vm598_vm1, %v548_v53 }
 0x1ea   : > { %v4980_v55 = vpop.f32.mrf.mxu0 }
 0x1eb   : > { %7004 = vst [vmem:[#allocation17_spill] sm:$0xff] %v4980_v55 }
 0x1ed   : > { %4138 = vmatmul.msk.f32.gmra.mxu0 %vm598_vm1, %v549_v57  ;;  %v558_v57 = vld [vmem:[%s4782_s17 + $0x210] sm:$0xff] }
 0x1f2   : > { %v4984_v59 = vpop.f32.mrf.mxu0 }
 0x1f3   : > { %7005 = vst [vmem:[#allocation18_spill] sm:$0xff] %v4984_v59 }
 0x1f5   : > { %4139 = vmatmul.msk.f32.gmra.mxu0 %vm598_vm1, %v550_v61  ;;  %v588_v61 = vld [vmem:[%s4782_s17 + $0x300] sm:$0xff] }
 0x1f6   : > { %4177 = vmatmul.msk.f32.vlgmr.msra.gmra.mxu3 %vm598_vm1, %v588_v61  ;;  %v563_v61 = vld [vmem:[%s4782_s17 + $0x238] sm:$0xff] }
 0x1fa   : > { %v4988_v63 = vpop.f32.mrf.mxu0 }
 0x1fb   : > { %7006 = vst [vmem:[#allocation19_spill] sm:$0xff] %v4988_v63 }
 0x1fd   : > { %4140 = vmatmul.msk.f32.gmra.mxu0 %vm598_vm1, %v551_v1 }
 0x202   : > { %v4992_v3 = vpop.f32.mrf.mxu0 }
 0x203   : > { %7007 = vst [vmem:[#allocation20_spill] sm:$0xff] %v4992_v3 }
 0x205   : > { %4141 = vmatmul.msk.f32.gmra.mxu0 %vm598_vm1, %v552_v5  ;;  %v559_v5 = vld [vmem:[%s4782_s17 + $0x218] sm:$0xff] }
 0x20a   : > { %v4996_v7 = vpop.f32.mrf.mxu0 }
 0x20b   : > { %7008 = vst [vmem:[#allocation21_spill] sm:$0xff] %v4996_v7 }
 0x20d   : > { %4142 = vmatmul.msk.f32.gmra.mxu0 %vm598_vm1, %v553_v9  ;;  %v589_v9 = vld [vmem:[%s4782_s17 + $0x308] sm:$0xff] }
 0x20e   : > { %4178 = vmatmul.msk.f32.gmra.mxu3 %vm598_vm1, %v589_v9  ;;  %v564_v9 = vld [vmem:[%s4782_s17 + $0x240] sm:$0xff] }
 0x212   : > { %v5000_v11 = vpop.f32.mrf.mxu0 }
 0x213   : > { %7009 = vst [vmem:[#allocation22_spill] sm:$0xff] %v5000_v11 }
 0x215   : > { %4143 = vmatmul.msk.f32.gmra.mxu0 %vm598_vm1, %v554_v13 }
 0x216   : > { %4179 = vmatmul.msk.f32.gmra.mxu3 %vm598_vm1, %v590_v21  ;;  %v565_v21 = vld [vmem:[%s4782_s17 + $0x248] sm:$0xff] }
 0x21a   : > { %v5004_v15 = vpop.f32.mrf.mxu0 }
 0x21d   : > { %4144 = vmatmul.msk.f32.gmra.mxu0 %vm598_vm1, %v555_v17  ;;  %v560_v17 = vld [vmem:[%s4782_s17 + $0x220] sm:$0xff] }
 0x21e   : > { %4180 = vmatmul.msk.f32.gmra.mxu3 %vm598_vm1, %v591_v37  ;;  %v566_v37 = vld [vmem:[%s4782_s17 + $0x250] sm:$0xff] }
 0x222   : > { %v5012_v29 = vpop.f32.mrf.mxu0 }
 0x225   : > { %4145 = vmatmul.msk.f32.gmra.mxu0 %vm598_vm1, %v556_v33  ;;  %v561_v33 = vld [vmem:[%s4782_s17 + $0x228] sm:$0xff] }
 0x22a   : > { %v5018_v41 = vpop.f32.mrf.mxu0 }
 0x22d   : > { %4146 = vmatmul.msk.f32.gmra.mxu0 %vm598_vm1, %v557_v45 }
 0x232   : > { %v5024_v53 = vpop.f32.mrf.mxu0 }
 0x235   : > { %4147 = vmatmul.msk.f32.gmra.mxu0 %vm598_vm1, %v558_v57 }
 0x23a   : > { %v5030_v1 = vpop.f32.mrf.mxu0 }
 0x23d   : > { %4148 = vmatmul.msk.f32.gmra.mxu0 %vm598_vm1, %v559_v5 }
 0x242   : > { %v5036_v13 = vpop.f32.mrf.mxu0 }
 0x245   : > { %4149 = vmatmul.msk.f32.gmra.mxu0 %vm598_vm1, %v560_v17 }
 0x24a   : > { %v5042_v25 = vpop.f32.mrf.mxu0 }
 0x24d   : > { %4150 = vmatmul.msk.f32.gmra.mxu0 %vm598_vm1, %v561_v33 }
 0x252   : > { %v5048_v45 = vpop.f32.mrf.mxu0 }
 0x255   : > { %4151 = vmatmul.msk.f32.gmra.mxu0 %vm598_vm1, %v562_v49 }
 0x25a   : > { %v5052_v57 = vpop.f32.mrf.mxu0 }
 0x25d   : > { %4152 = vmatmul.msk.f32.gmra.mxu0 %vm598_vm1, %v563_v61  ;;  %v567_v61 = vld [vmem:[%s4782_s17 + $0x258] sm:$0xff] }
 0x262   : > { %v5056_v5 = vpop.f32.mrf.mxu0 }
 0x265   : > { %4153 = vmatmul.msk.f32.gmra.mxu0 %vm598_vm1, %v564_v9  ;;  %v568_v9 = vld [vmem:[%s4782_s17 + $0x260] sm:$0xff] }
 0x26a   : > { %v5060_v17 = vpop.f32.mrf.mxu0 }
 0x26d   : > { %4154 = vmatmul.msk.f32.gmra.mxu0 %vm598_vm1, %v565_v21  ;;  %v569_v21 = vld [vmem:[%s4782_s17 + $0x268] sm:$0xff] }
 0x272   : > { %v5064_v33 = vpop.f32.mrf.mxu0 }
 0x275   : > { %4155 = vmatmul.msk.f32.gmra.mxu0 %vm598_vm1, %v566_v37  ;;  %v570_v37 = vld [vmem:[%s4782_s17 + $0x270] sm:$0xff] }
 0x27a   : > { %v5068_v49 = vpop.f32.mrf.mxu0 }
 0x27d   : > { %4156 = vmatmul.msk.f32.gmra.mxu0 %vm598_vm1, %v567_v61  ;;  %v571_v61 = vld [vmem:[%s4782_s17 + $0x278] sm:$0xff] }
 0x282   : > { %v5072_v60 = vpop.f32.mrf.mxu0 }
 0x285   : > { %4157 = vmatmul.msk.f32.gmra.mxu0 %vm598_vm1, %v568_v9  ;;  %v572_v9 = vld [vmem:[%s4782_s17 + $0x280] sm:$0xff] }
 0x28a   : > { %v5076_v11 = vpop.f32.mrf.mxu0 }
 0x28d   : > { %4158 = vmatmul.msk.f32.gmra.mxu0 %vm598_vm1, %v569_v21  ;;  %v573_v21 = vld [vmem:[%s4782_s17 + $0x288] sm:$0xff] }
 0x292   : > { %v5080_v58 = vpop.f32.mrf.mxu0 }
 0x295   : > { %4159 = vmatmul.msk.f32.gmra.mxu0 %vm598_vm1, %v570_v37  ;;  %v574_v37 = vld [vmem:[%s4782_s17 + $0x290] sm:$0xff] }
 0x29a   : > { %v5084_v7 = vpop.f32.mrf.mxu0 }
 0x29b   : > { %7010 = vst [vmem:[#allocation23_spill] sm:$0xff] %v5084_v7 }
 0x29d   : > { %4160 = vmatmul.msk.f32.gmra.mxu0 %vm598_vm1, %v571_v61  ;;  %v575_v61 = vld [vmem:[%s4782_s17 + $0x298] sm:$0xff] }
 0x2a2   : > { %v5088_v56 = vpop.f32.mrf.mxu0 }
 0x2a3   : > { %7011 = vst [vmem:[#allocation24_spill] sm:$0xff] %v5088_v56 }
 0x2a5   : > { %4161 = vmatmul.msk.f32.gmra.mxu0 %vm598_vm1, %v572_v9  ;;  %v576_v9 = vld [vmem:[%s4782_s17 + $0x2a0] sm:$0xff] }
 0x2aa   : > { %v5092_v3 = vpop.f32.mrf.mxu0 }
 0x2ab   : > { %7012 = vst [vmem:[#allocation25_spill] sm:$0xff] %v5092_v3  ;;  %v4184_v3 = vld [vmem:[%s7020_s3 + $0x38] sm:$0xff] }
 0x2ac   : > { %1527 = vmatpush.msrb.mxu1 %v4184_v3  ;;  %v4228_v3 = vld [vmem:[%s7020_s3 + $0x48] sm:$0xff] }
 0x2ad   : > { %4162 = vmatmul.msk.f32.gmra.mxu0 %vm598_vm1, %v573_v21  ;;  %v5112_v21 = vpop.f32.mrf.mxu3 }
 0x2ae   : > { %7017 = vst [vmem:[#allocation30_spill] sm:$0xff] %v5112_v21  ;;  %v580_v21 = vld [vmem:[%s4782_s17 + $0x2c0] sm:$0xff] }
 0x2b2   : > { %v5096_v54 = vpop.f32.mrf.mxu0 }
 0x2b3   : > { %7013 = vst [vmem:[#allocation26_spill] sm:$0xff] %v5096_v54 }
 0x2b5   : > { %4163 = vmatmul.msk.f32.gmra.mxu0 %vm598_vm1, %v574_v37  ;;  %v578_v37 = vld [vmem:[%s4782_s17 + $0x2b0] sm:$0xff] }
 0x2ba   : > { %v5100_v63 = vpop.f32.mrf.mxu0 }
 0x2bb   : > { %7014 = vst [vmem:[#allocation27_spill] sm:$0xff] %v5100_v63  ;;  %v1211_v63 = vpop.f32.mrf.mxu3 }
 0x2bd   : > { %4164 = vmatmul.msk.f32.gmra.mxu0 %vm598_vm1, %v575_v61 }
 0x2c2   : > { %v5104_v52 = vpop.f32.mrf.mxu0 }
 0x2c3   : > { %7015 = vst [vmem:[#allocation28_spill] sm:$0xff] %v5104_v52  ;;  %v579_v52 = vld [vmem:[%s4782_s17 + $0x2b8] sm:$0xff] }
 0x2c5   : > { %4165 = vmatmul.msk.f32.gmra.mxu0 %vm598_vm1, %v576_v9  ;;  %v1400_v9 = vld [vmem:[%s7020_s3 + $0x18] sm:$0xff] }
 0x2c6   : > { %1649 = vmatpush.msrb.mxu2 %v1400_v9  ;;  %v1397_v9 = vld [vmem:[%s7020_s3] sm:$0xff] }
 0x2ca   : > { %v5108_v59 = vpop.f32.mrf.mxu0 }
 0x2cb   : > { %7016 = vst [vmem:[#allocation29_spill] sm:$0xff] %v5108_v59 }
 0x2cd   : > { %4166 = vmatmul.msk.f32.gmra.mxu0 %vm598_vm1, %v577_v50  ;;  %v1399_v50 = vld [vmem:[%s7020_s3 + $0x10] sm:$0xff] }
 0x2ce   : > { %1650 = vmatpush.msrb.mxu2 %v1399_v50 }
 0x2d2   : > { %v5114_v54 = vpop.f32.mrf.mxu0 }
 0x2d3   : > { %7018 = vst [vmem:[#allocation31_spill] sm:$0xff] %v5114_v54  ;;  %v1214_v54 = vpop.f32.mrf.mxu3 }
 0x2d5   : > { %4167 = vmatmul.msk.f32.gmra.mxu0 %vm598_vm1, %v578_v37  ;;  %v1398_v37 = vld [vmem:[%s7020_s3 + $0x8] sm:$0xff] }
 0x2d6   : > { %1651 = vmatpush.msrb.mxu2 %v1398_v37 }
 0x2d8   : > { %1652 = vmatpush.msrb.mxu2 %v1397_v9  ;;  %v4230_v9 = vld [vmem:[%s7020_s3 + $0x58] sm:$0xff] }
 0x2d9   : > { %1820 = vmatpush.msrb.mxu3 %v4230_v9 }
 0x2da   : > { %v5118_v61 = vpop.f32.mrf.mxu0 }
 0x2db   : > { %7019 = vst [vmem:[#allocation32_spill] sm:$0xff] %v5118_v61  ;;  %v5134_v61 = vld [vmem:[%s7021_s2] ss:$0 sm:$0xff]  ;;  %s485_s2 = sand.u32 1, %s4629_s19  }
 0x2dc   : > { %v1212_v59 = vadd.f32 %v5134_v61, %v1211_v63  ;;  %v1062_v37 = vadd.f32 %v5134_v61, %v5004_v15  ;;  %v987_v55 = vadd.f32 %v5134_v61, %v4904_v62  ;;  %v1065_v63 = vadd.f32 %v5134_v61, %v5012_v29  ;;  %v4183_v62 = vld [vmem:[%s7020_s3 + $0x30] sm:$0xff]  ;;  %s4008_s1 = scalar_lea.sflag [#allocation3], %s485_s2 }
 0x2dd   : > { %4168 = vmatmul.msk.f32.gmra.mxu0 %vm598_vm1, %v579_v52  ;;  %v1215_v15 = vadd.f32 %v5134_v61, %v1214_v54  ;;  %v990_v51 = vadd.f32 %v5134_v61, %v4908_v0  ;;  %1528 = vmatpush.msrb.mxu1 %v4183_v62  ;;  %v4182_v54 = vld [vmem:[%s7020_s3 + $0x28] sm:$0xff]  ;;  %v1217_v0 = vpop.f32.mrf.mxu3 }
 0x2de   : > { %v1317_v48 = vmax.f32 %v1212_v59, 0.0  ;;  %v1267_v56 = vmax.f32 %v1062_v37, 0.0  ;;  %v1242_v29 = vmax.f32 %v987_v55, 0.0  ;;  %v1268_v9 = vmax.f32 %v1065_v63, 0.0  ;;  %v4181_v55 = vld [vmem:[%s7020_s3 + $0x20] sm:$0xff] }
 0x2df   : > { %v1318_v7 = vmax.f32 %v1215_v15, 0.0  ;;  %1529 = vmatpush.msrb.mxu1 %v4182_v54  ;;  %v4227_v37 = vld [vmem:[%s7020_s3 + $0x40] sm:$0xff]  ;;  %v1243_v62 = vmax.f32 %v990_v51, 0.0  ;;  %v993_v54 = vadd.f32 %v5134_v61, %v4912_v2  ;;  %v582_v51 = vld [vmem:[%s4782_s17 + $0x2d0] sm:$0xff] }
 0x2e1   : > { %1530 = vmatpush.msrb.mxu1 %v4181_v55  ;;  %v1343_v63 = vmax.f32 %v1243_v62, %v1268_v9  ;;  %v996_v9 = vadd.f32 %v5134_v61, %v4916_v4  ;;  %v1071_v62 = vadd.f32 %v5134_v61, %v5024_v53 }
 0x2e2   : > { %v1136_v52 = vpop.f32.mrf.mxu0 }
 0x2e3   : > { %v1137_v50 = vadd.f32 %v5134_v61, %v1136_v52 }
 0x2e5   : > { %4169 = vmatmul.msk.f32.gmra.mxu0 %vm598_vm1, %v580_v21  ;;  %v1292_v52 = vmax.f32 %v1137_v50, 0.0  ;;  %v4229_v21 = vld [vmem:[%s7020_s3 + $0x50] sm:$0xff]  ;;  %v581_v50 = vld [vmem:[%s4782_s17 + $0x2c8] sm:$0xff] }
 0x2e6   : > { %1821 = vmatpush.msrb.mxu3 %v4229_v21  ;;  %v1342_v21 = vmax.f32 %v1242_v29, %v1267_v56 }
 0x2e7   : > { %v1367_v46 = vmax.f32 %v1292_v52, %v1317_v48  ;;  %v1068_v48 = vadd.f32 %v5134_v61, %v5018_v41 }
 0x2e8   : > { %1822 = vmatpush.msrb.mxu3 %v4228_v3 }
 0x2e9   : > { %v5181_v52 = vmax.f32 %v1342_v21, %v1367_v46  ;;  %v1269_v56 = vmax.f32 %v1068_v48, 0.0 }
 0x2ea   : > { %v1139_v59 = vpop.f32.mrf.mxu0  ;;  %1823 = vmatpush.msrb.mxu3 %v4227_v37  ;;  %v921_v37 = vadd.f32 %v5134_v61, %v4816_v18 }
 0x2eb   : > { %v1140_v47 = vadd.f32 %v5134_v61, %v1139_v59  ;;  %v1218_v59 = vadd.f32 %v5134_v61, %v1217_v0  ;;  %v6976_v41 = vrot.slane %v5181_v52, 6 }
 0x2ec   : > { %v1220_v18 = vmax.f32 %v921_v37, 0.0 }
 0x2ed   : > { %v1293_v44 = vmax.f32 %v1140_v47, 0.0  ;;  %4170 = vmatmul.msk.f32.gmra.mxu0 %vm598_vm1, %v581_v50  ;;  %v1319_v50 = vmax.f32 %v1218_v59, 0.0 }
 0x2ef   : > { %v1368_v15 = vmax.f32 %v1293_v44, %v1318_v7  ;;  %v1244_v44 = vmax.f32 %v993_v54, 0.0 }
 0x2f1   : > { %v5186_v3 = vmax.f32 %v1343_v63, %v1368_v15  ;;  %v1344_v0 = vmax.f32 %v1244_v44, %v1269_v56  ;;  %v583_v63 = vld [vmem:[%s4782_s17 + $0x2d8] sm:$0xff]  ;;  %v1245_v15 = vmax.f32 %v996_v9, 0.0  ;;  %s486_s17 = scalar_lea.vmem [#allocation2], %s485_s2 }
 0x2f2   : > { %v1142_v47 = vpop.f32.mrf.mxu0  ;;  %s4018_s0 = sshll.u32 %s486_s17, 4  ;;  %s4019_s0 = int_to_ptr.vmem [resolvable:$true] %s4018_s0 }
 0x2f3   : > { %7022 = vst [vmem:[#allocation33_spill] sm:$0xff] %v5186_v3  ;;  %v1143_v29 = vadd.f32 %v5134_v61, %v1142_v47  ;;  %v2793_v46 = vrot.slane %v5186_v3, 6  ;;  %v6975_v47 = vrot.slane %v5186_v3, 5  ;;  %v6974_v56 = vrot.slane %v5186_v3, 4 }
 0x2f5   : > { %v1294_v7 = vmax.f32 %v1143_v29, 0.0  ;;  %4171 = vmatmul.msk.f32.gmra.mxu0 %vm598_vm1, %v582_v51  ;;  %v5196_v2 = vsel %vm1915_vm2, %v6976_v41, %v2793_v46 }
 0x2f6   : > { %7023 = vst [vmem:[#allocation34_spill] sm:$0xff] %v5196_v2 }
 0x2f7   : > { %v1369_v55 = vmax.f32 %v1294_v7, %v1319_v50  ;;  %v1270_v50 = vmax.f32 %v1071_v62, 0.0  ;;  %v924_v62 = vadd.f32 %v5134_v61, %v4820_v20  ;;  %v927_v20 = vadd.f32 %v5134_v61, %v4824_v22 }
 0x2f9   : > { %v1394_v21 = vmax.f32 %v1344_v0, %v1369_v55  ;;  %v1320_v0 = vmax.f32 %v1220_v18, %v1245_v15  ;;  %v999_v55 = vadd.f32 %v5134_v61, %v4920_v6  ;;  %v1002_v6 = vadd.f32 %v5134_v61, %v4924_v8 }
 0x2fa   : > { %v1145_v48 = vpop.f32.mrf.mxu0 }
 0x2fb   : > { %v1396_v59 = vsel %vm1395_vm3, %v1394_v21, 0.0  ;;  %v1146_v54 = vadd.f32 %v5134_v61, %v1145_v48  ;;  %v1074_v21 = vadd.f32 %v5134_v61, %v5030_v1  ;;  %v1077_v1 = vadd.f32 %v5134_v61, %v5036_v13 }
 0x2fc   : > { %v2643_v4 = vrot.slane %v1396_v59, 5  ;;  %v2451_v51 = vrot.slane %v1396_v59, 4  ;;  %v2795_v29 = vrot.slane %v1396_v59, 6  ;;  %v1246_v59 = vmax.f32 %v999_v55, 0.0 }
 0x2fd   : > { %v1295_v44 = vmax.f32 %v1146_v54, 0.0  ;;  %4172 = vmatmul.msk.f32.gmra.mxu0 %vm598_vm1, %v583_v63  ;;  %v1271_v15 = vmax.f32 %v1074_v21, 0.0  ;;  %v1222_v21 = vmax.f32 %v927_v20, 0.0  ;;  %v1272_v22 = vmax.f32 %v1077_v1, 0.0 }
 0x2fe   : > { %v5213_v53 = vsel %vm2601_vm4, %v6975_v47, %v2643_v4  ;;  %v5218_v7 = vsel %vm1395_vm3, %v6974_v56, %v2451_v51  ;;  %v5221_v9 = vsel %vm1915_vm2, %v2793_v46, %v2795_v29  ;;  %v1221_v46 = vmax.f32 %v924_v62, 0.0 }
 0x2ff   : > { %7024 = vst [vmem:[#allocation35_spill] sm:$0xff] %v5213_v53  ;;  %v1345_v37 = vmax.f32 %v1270_v50, %v1295_v44  ;;  %v1247_v50 = vmax.f32 %v1002_v6, 0.0 }
 0x300   : > { %7025 = vst [vmem:[#allocation36_spill] sm:$0xff] %v5218_v7  ;;  %v1321_v51 = vmax.f32 %v1221_v46, %v1246_v59  ;;  %v1005_v46 = vadd.f32 %v5134_v61, %v4928_v10 }
 0x301   : > { %7026 = vst [vmem:[#allocation37_spill] sm:$0xff] %v5221_v9  ;;  %v1370_v48 = vmax.f32 %v1320_v0, %v1345_v37 }
 0x302   : > { %v1148_v63 = vpop.f32.mrf.mxu0 }
 0x303   : > { %v1149_v54 = vadd.f32 %v5134_v61, %v1148_v63  ;;  %4206 = vmatmul.msk.f32.vlgmr.msrb.gmra.mxu2 %vm1472_vm5, %v1370_v48  ;;  %v1429_v0 = vrot.slane %v1370_v48, 1  ;;  %v1723_v37 = vrot.slane %v1370_v48, 2 }
 0x305   : > { %v1296_v4 = vmax.f32 %v1149_v54, 0.0  ;;  %v1322_v54 = vmax.f32 %v1222_v21, %v1247_v50 }
 0x307   : > { %v1346_v29 = vmax.f32 %v1271_v15, %v1296_v4  ;;  %v930_v15 = vadd.f32 %v5134_v61, %v4828_v24  ;;  %v1080_v4 = vadd.f32 %v5134_v61, %v5042_v25 }
 0x309   : > { %v5237_v18 = vmax.f32 %v1321_v51, %v1346_v29  ;;  %v1248_v29 = vmax.f32 %v1005_v46, 0.0  ;;  %v1223_v50 = vmax.f32 %v930_v15, 0.0 }
 0x30a   : > { %v1151_v44 = vpop.f32.mrf.mxu0 }
 0x30b   : > { %v1152_v55 = vadd.f32 %v5134_v61, %v1151_v44  ;;  %4207 = vmatmul.msk.f32.gmra.mxu2 %vm1472_vm5, %v5237_v18  ;;  %v1430_v8 = vrot.slane %v5237_v18, 1  ;;  %v1724_v62 = vrot.slane %v5237_v18, 2  ;;  %v1273_v44 = vmax.f32 %v1080_v4, 0.0 }
 0x30d   : > { %v1297_v13 = vmax.f32 %v1152_v55, 0.0  ;;  %v1431_v63 = vsel %vm1428_vm6, %v1429_v0, %v1430_v8  ;;  %v1725_v59 = vsel %vm1722_vm7, %v1723_v37, %v1724_v62  ;;  %v1323_v55 = vmax.f32 %v1223_v50, %v1248_v29 }
 0x30e   : > { %4185 = vmatmul.msk.f32.vlgmr.msrb.gmra.mxu1 %vm1472_vm5, %v1431_v63  ;;  %4231 = vmatmul.msk.f32.vlgmr.msrb.gmra.mxu3 %vm1472_vm5, %v1725_v59  ;;  %v1008_v37 = vadd.f32 %v5134_v61, %v4932_v12  ;;  %v1086_v50 = vadd.f32 %v5134_v61, %v5052_v57 }
 0x30f   : > { %v1347_v48 = vmax.f32 %v1272_v22, %v1297_v13  ;;  %v933_v22 = vadd.f32 %v5134_v61, %v4832_v26  ;;  %v1083_v13 = vadd.f32 %v5134_v61, %v5048_v45 }
 0x310   : > { %v1249_v59 = vmax.f32 %v1008_v37, 0.0 }
 0x311   : > { %v5254_v6 = vmax.f32 %v1322_v54, %v1347_v48  ;;  %v1224_v46 = vmax.f32 %v933_v22, 0.0  ;;  %v1274_v48 = vmax.f32 %v1083_v13, 0.0  ;;  %v1014_v22 = vadd.f32 %v5134_v61, %v4940_v16 }
 0x312   : > { %v1154_v51 = vpop.f32.mrf.mxu0 }
 0x313   : > { %v1155_v20 = vadd.f32 %v5134_v61, %v1154_v51  ;;  %4208 = vmatmul.msk.f32.gmra.mxu2 %vm1472_vm5, %v5254_v6  ;;  %v1432_v1 = vrot.slane %v5254_v6, 1  ;;  %v1726_v10 = vrot.slane %v5254_v6, 2  ;;  %v1324_v4 = vmax.f32 %v1224_v46, %v1249_v59 }
 0x314   : > { %v1011_v51 = vadd.f32 %v5134_v61, %v4936_v14  ;;  %v1089_v59 = vadd.f32 %v5134_v61, %v5056_v5  ;;  %v1251_v46 = vmax.f32 %v1014_v22, 0.0  ;;  %v945_v22 = vadd.f32 %v5134_v61, %v4848_v34 }
 0x315   : > { %v1298_v0 = vmax.f32 %v1155_v20, 0.0  ;;  %v1433_v24 = vsel %vm1428_vm6, %v1430_v8, %v1432_v1  ;;  %v1727_v25 = vsel %vm1722_vm7, %v1724_v62, %v1726_v10  ;;  %v936_v20 = vadd.f32 %v5134_v61, %v4836_v28 }
 0x316   : > { %4186 = vmatmul.msk.f32.gmra.mxu1 %vm1472_vm5, %v1433_v24  ;;  %4232 = vmatmul.msk.f32.gmra.mxu3 %vm1472_vm5, %v1727_v25 }
 0x317   : > { %v1348_v21 = vmax.f32 %v1273_v44, %v1298_v0  ;;  %v1250_v0 = vmax.f32 %v1011_v51, 0.0  ;;  %v1225_v25 = vmax.f32 %v936_v20, 0.0  ;;  %v1017_v51 = vadd.f32 %v5134_v61, %v4944_v19 }
 0x318   : > { %v942_v20 = vadd.f32 %v5134_v61, %v4844_v32 }
 0x319   : > { %v5271_v63 = vmax.f32 %v1323_v55, %v1348_v21  ;;  %v1275_v55 = vmax.f32 %v1086_v50, 0.0  ;;  %v1325_v21 = vmax.f32 %v1225_v25, %v1250_v0  ;;  %v1092_v50 = vadd.f32 %v5134_v61, %v5060_v17 }
 0x31a   : > { %v1157_v8 = vpop.f32.mrf.mxu0  ;;  %v1227_v25 = vmax.f32 %v942_v20, 0.0 }
 0x31b   : > { %v1158_v62 = vadd.f32 %v5134_v61, %v1157_v8  ;;  %4209 = vmatmul.msk.f32.gmra.mxu2 %vm1472_vm5, %v5271_v63  ;;  %v1434_v54 = vrot.slane %v5271_v63, 1  ;;  %v1728_v12 = vrot.slane %v5271_v63, 2  ;;  %v939_v8 = vadd.f32 %v5134_v61, %v4840_v30 }
 0x31d   : > { %v1299_v15 = vmax.f32 %v1158_v62, 0.0  ;;  %v1435_v26 = vsel %vm1428_vm6, %v1432_v1, %v1434_v54  ;;  %v1729_v45 = vsel %vm1722_vm7, %v1726_v10, %v1728_v12 }
 0x31e   : > { %4187 = vmatmul.msk.f32.gmra.mxu1 %vm1472_vm5, %v1435_v26  ;;  %4233 = vmatmul.msk.f32.gmra.mxu3 %vm1472_vm5, %v1729_v45  ;;  %v1276_v26 = vmax.f32 %v1089_v59, 0.0 }
 0x31f   : > { %v1349_v29 = vmax.f32 %v1274_v48, %v1299_v15  ;;  %v1226_v15 = vmax.f32 %v939_v8, 0.0 }
 0x321   : > { %v5288_v44 = vmax.f32 %v1324_v4, %v1349_v29  ;;  %v1326_v4 = vmax.f32 %v1226_v15, %v1251_v46 }
 0x322   : > { %v1160_v1 = vpop.f32.mrf.mxu0 }
 0x323   : > { %v1161_v10 = vadd.f32 %v5134_v61, %v1160_v1  ;;  %4210 = vmatmul.msk.f32.gmra.mxu2 %vm1472_vm5, %v5288_v44  ;;  %v1436_v24 = vrot.slane %v5288_v44, 1  ;;  %v1730_v14 = vrot.slane %v5288_v44, 2 }
 0x325   : > { %v1300_v37 = vmax.f32 %v1161_v10, 0.0  ;;  %v1437_v28 = vsel %vm1428_vm6, %v1434_v54, %v1436_v24  ;;  %v1731_v57 = vsel %vm1722_vm7, %v1728_v12, %v1730_v14  ;;  %v1252_v10 = vmax.f32 %v1017_v51, 0.0 }
 0x326   : > { %4188 = vmatmul.msk.f32.gmra.mxu1 %vm1472_vm5, %v1437_v28  ;;  %4234 = vmatmul.msk.f32.gmra.mxu3 %vm1472_vm5, %v1731_v57  ;;  %v1020_v57 = vadd.f32 %v5134_v61, %v4948_v23 }
 0x327   : > { %v1350_v13 = vmax.f32 %v1275_v55, %v1300_v37  ;;  %v1277_v55 = vmax.f32 %v1092_v50, 0.0  ;;  %v1327_v28 = vmax.f32 %v1227_v25, %v1252_v10  ;;  %v1026_v25 = vadd.f32 %v5134_v61, %v4956_v31 }
 0x329   : > { %v5305_v62 = vmax.f32 %v1325_v21, %v1350_v13  ;;  %v1095_v13 = vadd.f32 %v5134_v61, %v5064_v33 }
 0x32a   : > { %v1163_v54 = vpop.f32.mrf.mxu0 }
 0x32b   : > { %v1164_v12 = vadd.f32 %v5134_v61, %v1163_v54  ;;  %4211 = vmatmul.msk.f32.gmra.mxu2 %vm1472_vm5, %v5305_v62  ;;  %v1438_v48 = vrot.slane %v5305_v62, 1  ;;  %v1732_v16 = vrot.slane %v5305_v62, 2  ;;  %v1253_v54 = vmax.f32 %v1020_v57, 0.0 }
 0x32c   : > { %v1255_v57 = vmax.f32 %v1026_v25, 0.0 }
 0x32d   : > { %v1301_v45 = vmax.f32 %v1164_v12, 0.0  ;;  %v1439_v30 = vsel %vm1428_vm6, %v1436_v24, %v1438_v48  ;;  %v1733_v5 = vsel %vm1722_vm7, %v1730_v14, %v1732_v16 }
 0x32e   : > { %4189 = vmatmul.msk.f32.gmra.mxu1 %vm1472_vm5, %v1439_v30  ;;  %4235 = vmatmul.msk.f32.gmra.mxu3 %vm1472_vm5, %v1733_v5  ;;  %v948_v5 = vadd.f32 %v5134_v61, %v4852_v36 }
 0x32f   : > { %v1351_v29 = vmax.f32 %v1276_v26, %v1301_v45  ;;  %v1023_v45 = vadd.f32 %v5134_v61, %v4952_v27 }
 0x330   : > { %v1229_v10 = vmax.f32 %v948_v5, 0.0 }
 0x331   : > { %v5322_v1 = vmax.f32 %v1326_v4, %v1351_v29  ;;  %v1098_v4 = vadd.f32 %v5134_v61, %v5068_v49  ;;  %v1254_v20 = vmax.f32 %v1023_v45, 0.0 }
 0x332   : > { %v1166_v0 = vpop.f32.mrf.mxu0 }
 0x333   : > { %v1167_v24 = vadd.f32 %v5134_v61, %v1166_v0  ;;  %4212 = vmatmul.msk.f32.gmra.mxu2 %vm1472_vm5, %v5322_v1  ;;  %v1440_v14 = vrot.slane %v5322_v1, 1  ;;  %v1734_v19 = vrot.slane %v5322_v1, 2 }
 0x335   : > { %v1302_v37 = vmax.f32 %v1167_v24, 0.0  ;;  %v1441_v32 = vsel %vm1428_vm6, %v1438_v48, %v1440_v14  ;;  %v1735_v17 = vsel %vm1722_vm7, %v1732_v16, %v1734_v19  ;;  %v1228_v48 = vmax.f32 %v945_v22, 0.0 }
 0x336   : > { %4190 = vmatmul.msk.f32.gmra.mxu1 %vm1472_vm5, %v1441_v32  ;;  %4236 = vmatmul.msk.f32.gmra.mxu3 %vm1472_vm5, %v1735_v17  ;;  %v1278_v16 = vmax.f32 %v1095_v13, 0.0  ;;  %v1279_v24 = vmax.f32 %v1098_v4, 0.0  ;;  %v1101_v32 = vadd.f32 %v5134_v61, %v5072_v60 }
 0x337   : > { %v1352_v21 = vmax.f32 %v1277_v55, %v1302_v37  ;;  %v1328_v26 = vmax.f32 %v1228_v48, %v1253_v54  ;;  %v951_v37 = vadd.f32 %v5134_v61, %v4856_v38  ;;  %v954_v48 = vadd.f32 %v5134_v61, %v4860_v40 }
 0x339   : > { %v5339_v8 = vmax.f32 %v1327_v28, %v1352_v21  ;;  %v1230_v13 = vmax.f32 %v951_v37, 0.0 }
 0x33a   : > { %v1169_v59 = vpop.f32.mrf.mxu0 }
 0x33b   : > { %v1170_v46 = vadd.f32 %v5134_v61, %v1169_v59  ;;  %4213 = vmatmul.msk.f32.gmra.mxu2 %vm1472_vm5, %v5339_v8  ;;  %v1442_v12 = vrot.slane %v5339_v8, 1  ;;  %v1736_v23 = vrot.slane %v5339_v8, 2  ;;  %v1280_v59 = vmax.f32 %v1101_v32, 0.0 }
 0x33c   : > { %v1035_v32 = vadd.f32 %v5134_v61, %v4968_v43 }
 0x33d   : > { %v1303_v15 = vmax.f32 %v1170_v46, 0.0  ;;  %v1443_v34 = vsel %vm1428_vm6, %v1440_v14, %v1442_v12  ;;  %v1737_v33 = vsel %vm1722_vm7, %v1734_v19, %v1736_v23  ;;  %v1329_v19 = vmax.f32 %v1229_v10, %v1254_v20 }
 0x33e   : > { %4191 = vmatmul.msk.f32.gmra.mxu1 %vm1472_vm5, %v1443_v34  ;;  %4237 = vmatmul.msk.f32.gmra.mxu3 %vm1472_vm5, %v1737_v33  ;;  %v1330_v46 = vmax.f32 %v1230_v13, %v1255_v57  ;;  %v1032_v20 = vadd.f32 %v5134_v61, %v4964_v39  ;;  %v7027_v57 = vld [vmem:[#allocation6_spill] sm:$0xff] }
 0x33f   : > { %v1353_v30 = vmax.f32 %v1278_v16, %v1303_v15  ;;  %v1104_v16 = vadd.f32 %v5134_v61, %v5076_v11 }
 0x341   : > { %v5356_v51 = vmax.f32 %v1328_v26, %v1353_v30  ;;  %v1231_v30 = vmax.f32 %v954_v48, 0.0  ;;  %v1281_v5 = vmax.f32 %v1104_v16, 0.0 }
 0x342   : > { %v1172_v29 = vpop.f32.mrf.mxu0 }
 0x343   : > { %v1173_v50 = vadd.f32 %v5134_v61, %v1172_v29  ;;  %4214 = vmatmul.msk.f32.gmra.mxu2 %vm1472_vm5, %v5356_v51  ;;  %v1444_v0 = vrot.slane %v5356_v51, 1  ;;  %v1738_v27 = vrot.slane %v5356_v51, 2 }
 0x345   : > { %v1304_v14 = vmax.f32 %v1173_v50, 0.0  ;;  %v1445_v36 = vsel %vm1428_vm6, %v1442_v12, %v1444_v0  ;;  %v1739_v49 = vsel %vm1722_vm7, %v1736_v23, %v1738_v27  ;;  %v1029_v12 = vadd.f32 %v5134_v61, %v4960_v35 }
 0x346   : > { %4192 = vmatmul.msk.f32.gmra.mxu1 %vm1472_vm5, %v1445_v36  ;;  %4238 = vmatmul.msk.f32.gmra.mxu3 %vm1472_vm5, %v1739_v49 }
 0x347   : > { %v1354_v55 = vmax.f32 %v1279_v24, %v1304_v14  ;;  %v1256_v33 = vmax.f32 %v1029_v12, 0.0  ;;  %v1257_v14 = vmax.f32 %v1032_v20, 0.0 }
 0x349   : > { %v5373_v17 = vmax.f32 %v1329_v19, %v1354_v55  ;;  %v1331_v29 = vmax.f32 %v1231_v30, %v1256_v33  ;;  %v7029_v33 = vld [vmem:[#allocation15_spill] sm:$0xff] }
 0x34a   : > { %v1175_v28 = vpop.f32.mrf.mxu0 }
 0x34b   : > { %v1176_v21 = vadd.f32 %v5134_v61, %v1175_v28  ;;  %4215 = vmatmul.msk.f32.gmra.mxu2 %vm1472_vm5, %v5373_v17  ;;  %v1446_v22 = vrot.slane %v5373_v17, 1  ;;  %v1740_v31 = vrot.slane %v5373_v17, 2 }
 0x34d   : > { %v1305_v54 = vmax.f32 %v1176_v21, 0.0  ;;  %v1447_v38 = vsel %vm1428_vm6, %v1444_v0, %v1446_v22  ;;  %v1741_v60 = vsel %vm1722_vm7, %v1738_v27, %v1740_v31  ;;  %v957_v0 = vadd.f32 %v5134_v61, %v4864_v42 }
 0x34e   : > { %4193 = vmatmul.msk.f32.gmra.mxu1 %vm1472_vm5, %v1447_v38  ;;  %4239 = vmatmul.msk.f32.gmra.mxu3 %vm1472_vm5, %v1741_v60  ;;  %v1107_v27 = vadd.f32 %v5134_v61, %v5080_v58  ;;  %v960_v21 = vadd.f32 %v5134_v61, %v7027_v57 }
 0x34f   : > { %v1355_v23 = vmax.f32 %v1280_v59, %v1305_v54  ;;  %v1232_v19 = vmax.f32 %v957_v0, 0.0  ;;  %v1258_v54 = vmax.f32 %v1035_v32, 0.0  ;;  %v7034_v32 = vld [vmem:[#allocation25_spill] sm:$0xff] }
 0x350   : > { %v1282_v25 = vmax.f32 %v1107_v27, 0.0 }
 0x351   : > { %v5390_v15 = vmax.f32 %v1330_v46, %v1355_v23  ;;  %v1332_v37 = vmax.f32 %v1232_v19, %v1257_v14  ;;  %v1233_v46 = vmax.f32 %v960_v21, 0.0 }
 0x352   : > { %v1178_v34 = vpop.f32.mrf.mxu0 }
 0x353   : > { %v1179_v26 = vadd.f32 %v5134_v61, %v1178_v34  ;;  %4216 = vmatmul.msk.f32.gmra.mxu2 %vm1472_vm5, %v5390_v15  ;;  %v1448_v45 = vrot.slane %v5390_v15, 1  ;;  %v1742_v35 = vrot.slane %v5390_v15, 2  ;;  %v1333_v34 = vmax.f32 %v1233_v46, %v1258_v54 }
 0x355   : > { %v1306_v4 = vmax.f32 %v1179_v26, 0.0  ;;  %v1449_v40 = vsel %vm1428_vm6, %v1446_v22, %v1448_v45  ;;  %v1743_v11 = vsel %vm1722_vm7, %v1740_v31, %v1742_v35  ;;  %v7028_v22 = vld [vmem:[#allocation23_spill] sm:$0xff]  ;;  %v1038_v26 = vadd.f32 %v5134_v61, %v7029_v33  ;;  %v1196_v33 = vpop.f32.mrf.mxu1 }
 0x356   : > { %4194 = vmatmul.msk.f32.gmra.mxu1 %vm1472_vm5, %v1449_v40  ;;  %4240 = vmatmul.msk.f32.gmra.mxu3 %vm1472_vm5, %v1743_v11  ;;  %v1110_v31 = vadd.f32 %v5134_v61, %v7028_v22  ;;  %v5443_v11 = vpop.f32.mrf.mxu2 }
 0x357   : > { %v1356_v50 = vmax.f32 %v1281_v5, %v1306_v4  ;;  %v7031_v5 = vld [vmem:[#allocation24_spill] sm:$0xff]  ;;  %v1259_v20 = vmax.f32 %v1038_v26, 0.0 }
 0x358   : > { %v1283_v12 = vmax.f32 %v1110_v31, 0.0  ;;  %v1113_v4 = vadd.f32 %v5134_v61, %v7031_v5 }
 0x359   : > { %v5407_v10 = vmax.f32 %v1331_v29, %v1356_v50 }
 0x35a   : > { %v1181_v24 = vpop.f32.mrf.mxu0  ;;  %v1284_v14 = vmax.f32 %v1113_v4, 0.0 }
 0x35b   : > { %v1182_v36 = vadd.f32 %v5134_v61, %v1181_v24  ;;  %4217 = vmatmul.msk.f32.gmra.mxu2 %vm1472_vm5, %v5407_v10  ;;  %v1450_v49 = vrot.slane %v5407_v10, 1  ;;  %v1744_v39 = vrot.slane %v5407_v10, 2 }
 0x35d   : > { %v1307_v55 = vmax.f32 %v1182_v36, 0.0  ;;  %v1451_v42 = vsel %vm1428_vm6, %v1448_v45, %v1450_v49  ;;  %v1745_v58 = vsel %vm1722_vm7, %v1742_v35, %v1744_v39  ;;  %v7030_v35 = vld [vmem:[#allocation7_spill] sm:$0xff] }
 0x35e   : > { %4195 = vmatmul.msk.f32.gmra.mxu1 %vm1472_vm5, %v1451_v42  ;;  %4241 = vmatmul.msk.f32.gmra.mxu3 %vm1472_vm5, %v1745_v58  ;;  %v963_v30 = vadd.f32 %v5134_v61, %v7030_v35  ;;  %v7033_v58 = vld [vmem:[#allocation8_spill] sm:$0xff] }
 0x35f   : > { %v1357_v28 = vmax.f32 %v1282_v25, %v1307_v55  ;;  %v7032_v25 = vld [vmem:[#allocation16_spill] sm:$0xff] }
 0x360   : > { %v1234_v24 = vmax.f32 %v963_v30, 0.0  ;;  %v1041_v55 = vadd.f32 %v5134_v61, %v7032_v25  ;;  %v7037_v30 = vld [vmem:[#allocation26_spill] sm:$0xff] }
 0x361   : > { %v5424_v13 = vmax.f32 %v1332_v37, %v1357_v28  ;;  %v966_v37 = vadd.f32 %v5134_v61, %v7033_v58  ;;  %v1116_v28 = vadd.f32 %v5134_v61, %v7034_v32  ;;  %v1119_v5 = vadd.f32 %v5134_v61, %v7037_v30 }
 0x362   : > { %v1184_v59 = vpop.f32.mrf.mxu0  ;;  %v1334_v19 = vmax.f32 %v1234_v24, %v1259_v20  ;;  %v1260_v22 = vmax.f32 %v1041_v55, 0.0  ;;  %v1197_v20 = vadd.f32 %v5134_v61, %v1196_v33 }
 0x363   : > { %v1185_v38 = vadd.f32 %v5134_v61, %v1184_v59  ;;  %4218 = vmatmul.msk.f32.gmra.mxu2 %vm1472_vm5, %v5424_v13  ;;  %v1452_v60 = vrot.slane %v5424_v13, 1  ;;  %v1746_v43 = vrot.slane %v5424_v13, 2  ;;  %v1286_v25 = vmax.f32 %v1119_v5, 0.0 }
 0x365   : > { %v1308_v23 = vmax.f32 %v1185_v38, 0.0  ;;  %v1453_v48 = vsel %vm1428_vm6, %v1450_v49, %v1452_v60  ;;  %v1747_v16 = vsel %vm1722_vm7, %v1744_v39, %v1746_v43  ;;  %v1235_v38 = vmax.f32 %v966_v37, 0.0  ;;  %v7040_v37 = vld [vmem:[#allocation10_spill] sm:$0xff] }
 0x366   : > { %4196 = vmatmul.msk.f32.gmra.mxu1 %vm1472_vm5, %v1453_v48  ;;  %4242 = vmatmul.msk.f32.gmra.mxu3 %vm1472_vm5, %v1747_v16  ;;  %v7035_v48 = vld [vmem:[#allocation17_spill] sm:$0xff]  ;;  %v972_v32 = vadd.f32 %v5134_v61, %v7040_v37  ;;  %v7046_v37 = vld [vmem:[#allocation20_spill] sm:$0xff] }
 0x367   : > { %v1358_v45 = vmax.f32 %v1283_v12, %v1308_v23  ;;  %v1044_v16 = vadd.f32 %v5134_v61, %v7035_v48  ;;  %v7042_v48 = vld [vmem:[#allocation19_spill] sm:$0xff] }
 0x369   : > { %v5441_v40 = vmax.f32 %v1333_v34, %v1358_v45  ;;  %v1335_v34 = vmax.f32 %v1235_v38, %v1260_v22  ;;  %v7036_v45 = vld [vmem:[#allocation9_spill] sm:$0xff] }
 0x36a   : > { %v1187_v29 = vpop.f32.mrf.mxu0  ;;  %v969_v35 = vadd.f32 %v5134_v61, %v7036_v45  ;;  %v4280_v45 = vld [vmem:[%s7020_s3 + $0x98] sm:$0xff] }
 0x36b   : > { %v1188_v50 = vadd.f32 %v5134_v61, %v1187_v29  ;;  %4219 = vmatmul.msk.f32.gmra.mxu2 %vm1472_vm5, %v5441_v40  ;;  %v1454_v0 = vrot.slane %v5441_v40, 1  ;;  %v1748_v27 = vrot.slane %v5441_v40, 2  ;;  %v1261_v29 = vmax.f32 %v1044_v16, 0.0 }
 0x36c   : > { %v1050_v16 = vadd.f32 %v5134_v61, %v7042_v48  ;;  %2204 = vmatpush.msra.mxu2 %v4280_v45 }
 0x36d   : > { %v1309_v36 = vmax.f32 %v1188_v50, 0.0  ;;  %v1455_v49 = vsel %vm1428_vm6, %v1452_v60, %v1454_v0  ;;  %v1749_v39 = vsel %vm1722_vm7, %v1746_v43, %v1748_v27  ;;  %v1202_v60 = vpop.f32.mrf.mxu2  ;;  %v1285_v43 = vmax.f32 %v1116_v28, 0.0 }
 0x36e   : > { %4197 = vmatmul.msk.f32.gmra.mxu1 %vm1472_vm5, %v1455_v49  ;;  %4243 = vmatmul.msk.f32.gmra.mxu3 %vm1472_vm5, %v1749_v39  ;;  %v1236_v49 = vmax.f32 %v969_v35, 0.0  ;;  %v7039_v39 = vld [vmem:[#allocation18_spill] sm:$0xff]  ;;  %v7043_v35 = vld [vmem:[#allocation11_spill] sm:$0xff] }
 0x36f   : > { %v1359_v42 = vmax.f32 %v1284_v14, %v1309_v36 }
 0x371   : > { %v5460_v57 = vmax.f32 %v1334_v19, %v1359_v42  ;;  %v1047_v19 = vadd.f32 %v5134_v61, %v7039_v39 }
 0x372   : > { %v1190_v21 = vpop.f32.mrf.mxu0 }
 0x373   : > { %v1191_v31 = vadd.f32 %v5134_v61, %v1190_v21  ;;  %4220 = vmatmul.msk.f32.gmra.mxu2 %vm1472_vm5, %v5460_v57  ;;  %v1456_v59 = vrot.slane %v5460_v57, 1  ;;  %v1750_v54 = vrot.slane %v5460_v57, 2  ;;  %v1336_v21 = vmax.f32 %v1236_v49, %v1261_v29 }
 0x374   : > { %v1263_v49 = vmax.f32 %v1050_v16, 0.0 }
 0x375   : > { %v1310_v46 = vmax.f32 %v1191_v31, 0.0  ;;  %v1457_v12 = vsel %vm1428_vm6, %v1454_v0, %v1456_v59  ;;  %v1751_v23 = vsel %vm1722_vm7, %v1748_v27, %v1750_v54  ;;  %v7038_v0 = vld [vmem:[#allocation27_spill] sm:$0xff]  ;;  %v1205_v28 = vpop.f32.mrf.mxu2  ;;  %v1312_v31 = vmax.f32 %v1197_v20, 0.0 }
 0x376   : > { %4198 = vmatmul.msk.f32.gmra.mxu1 %vm1472_vm5, %v1457_v12  ;;  %4244 = vmatmul.msk.f32.gmra.mxu3 %vm1472_vm5, %v1751_v23  ;;  %v1122_v27 = vadd.f32 %v5134_v61, %v7038_v0  ;;  %v1237_v23 = vmax.f32 %v972_v32, 0.0  ;;  %v4279_v0 = vld [vmem:[%s7020_s3 + $0x90] sm:$0xff]  ;;  %v1053_v32 = vadd.f32 %v5134_v61, %v7046_v37  ;;  %v4252_v37 = vld [vmem:[%s7020_s3 + $0x60] sm:$0xff] }
 0x377   : > { %v1360_v26 = vmax.f32 %v1285_v43, %v1310_v46  ;;  %v1262_v43 = vmax.f32 %v1047_v19, 0.0  ;;  %v7041_v46 = vld [vmem:[#allocation28_spill] sm:$0xff]  ;;  %2205 = vmatpush.msra.mxu2 %v4279_v0 }
 0x378   : > { %v1287_v22 = vmax.f32 %v1122_v27, 0.0  ;;  %v1125_v12 = vadd.f32 %v5134_v61, %v7041_v46  ;;  %v4305_v46 = vld [vmem:[%s7020_s3 + $0xb8] sm:$0xff]  ;;  %v1264_v45 = vmax.f32 %v1053_v32, 0.0  ;;  %v4302_v32 = vld [vmem:[%s7020_s3 + $0xa0] sm:$0xff] }
 0x379   : > { %v5477_v4 = vmax.f32 %v1335_v34, %v1360_v26  ;;  %v1337_v30 = vmax.f32 %v1237_v23, %v1262_v43  ;;  %2314 = vmatpush.msra.mxu3 %v4305_v46 }
 0x37a   : > { %v1193_v50 = vpop.f32.mrf.mxu0  ;;  %v1362_v34 = vmax.f32 %v1287_v22, %v1312_v31  ;;  %v1288_v5 = vmax.f32 %v1125_v12, 0.0  ;;  %v7047_v31 = vld [vmem:[#allocation12_spill] sm:$0xff] }
 0x37b   : > { %v1194_v24 = vadd.f32 %v5134_v61, %v1193_v50  ;;  %4221 = vmatmul.msk.f32.gmra.mxu2 %vm1472_vm5, %v5477_v4  ;;  %v1458_v14 = vrot.slane %v5477_v4, 1  ;;  %v1752_v36 = vrot.slane %v5477_v4, 2 }
 0x37c   : > { %v5522_v39 = vmax.f32 %v1337_v30, %v1362_v34  ;;  %v4255_v34 = vld [vmem:[%s7020_s3 + $0x78] sm:$0xff] }
 0x37d   : > { %v1311_v55 = vmax.f32 %v1194_v24, 0.0  ;;  %v1459_v42 = vsel %vm1428_vm6, %v1456_v59, %v1458_v14  ;;  %v1753_v58 = vsel %vm1722_vm7, %v1750_v54, %v1752_v36  ;;  %v1200_v59 = vadd.f32 %v5134_v61, %v5443_v11  ;;  %v4278_v24 = vld [vmem:[%s7020_s3 + $0x88] sm:$0xff]  ;;  %2013 = vmatpush.msra.mxu1 %v4255_v34 }
 0x37e   : > { %4199 = vmatmul.msk.f32.gmra.mxu1 %vm1472_vm5, %v1459_v42  ;;  %4245 = vmatmul.msk.f32.gmra.mxu3 %vm1472_vm5, %v1753_v58  ;;  %v975_v11 = vadd.f32 %v5134_v61, %v7043_v35  ;;  %7044 = vst [vmem:[#allocation6_spill] sm:$0xff] %v5522_v39  ;;  %v4277_v42 = vld [vmem:[%s7020_s3 + $0x80] sm:$0xff]  ;;  %v1756_v22 = vrot.slane %v5522_v39, 2 }
 0x37f   : > { %v1361_v38 = vmax.f32 %v1286_v25, %v1311_v55  ;;  %v1313_v29 = vmax.f32 %v1200_v59, 0.0  ;;  %v7045_v25 = vld [vmem:[#allocation29_spill] sm:$0xff]  ;;  %2206 = vmatpush.msra.mxu2 %v4278_v24 }
 0x380   : > { %v1128_v55 = vadd.f32 %v5134_v61, %v7045_v25 }
 0x381   : > { %v5499_v54 = vmax.f32 %v1336_v21, %v1361_v38  ;;  %v1363_v19 = vmax.f32 %v1288_v5, %v1313_v29  ;;  %v978_v38 = vadd.f32 %v5134_v61, %v7047_v31  ;;  %2207 = vmatpush.msra.mxu2 %v4277_v42  ;;  %v7048_v29 = vld [vmem:[#allocation31_spill] sm:$0xff] }
 0x382   : > { %v1289_v59 = vmax.f32 %v1128_v55, 0.0  ;;  %v7050_v55 = vld [vmem:[#allocation13_spill] sm:$0xff] }
 0x383   : > { %4222 = vmatmul.msk.f32.gmra.mxu2 %vm1472_vm5, %v5499_v54  ;;  %v1460_v33 = vrot.slane %v5499_v54, 1  ;;  %v1754_v26 = vrot.slane %v5499_v54, 2  ;;  %v1239_v35 = vmax.f32 %v978_v38, 0.0  ;;  %v981_v42 = vadd.f32 %v5134_v61, %v7050_v55 }
 0x385   : > { %v1461_v20 = vsel %vm1428_vm6, %v1458_v14, %v1460_v33  ;;  %v1755_v50 = vsel %vm1722_vm7, %v1752_v36, %v1754_v26  ;;  %v1203_v14 = vadd.f32 %v5134_v61, %v1202_v60  ;;  %v1238_v36 = vmax.f32 %v975_v11, 0.0 }
 0x386   : > { %4200 = vmatmul.msk.f32.gmra.mxu1 %vm1472_vm5, %v1461_v20  ;;  %v1654_v27 = vpop.f32.mrf.mxu2  ;;  %4246 = vmatmul.msk.f32.gmra.mxu3 %vm1472_vm5, %v1755_v50  ;;  %v1462_v60 = vrot.slane %v5522_v39, 1  ;;  %v1757_v48 = vsel %vm1722_vm7, %v1754_v26, %v1756_v22  ;;  %v1206_v11 = vadd.f32 %v5134_v61, %v1205_v28  ;;  %v4304_v26 = vld [vmem:[%s7020_s3 + $0xb0] sm:$0xff]  ;;  %v1131_v20 = vadd.f32 %v5134_v61, %v7048_v29  ;;  %v7053_v29 = vld [vmem:[#allocation22_spill] sm:$0xff] }
 0x387   : > { %v1338_v58 = vmax.f32 %v1238_v36, %v1263_v49  ;;  %v1314_v43 = vmax.f32 %v1203_v14, 0.0  ;;  %2315 = vmatpush.msra.mxu3 %v4304_v26  ;;  %v4303_v49 = vld [vmem:[%s7020_s3 + $0xa8] sm:$0xff]  ;;  %v1339_v14 = vmax.f32 %v1239_v35, %v1264_v45  ;;  %v7049_v36 = vld [vmem:[#allocation21_spill] sm:$0xff] }
 0x388   : > { %v1463_v23 = vsel %vm1428_vm6, %v1460_v33, %v1462_v60  ;;  %v4254_v33 = vld [vmem:[%s7020_s3 + $0x70] sm:$0xff]  ;;  %v1290_v31 = vmax.f32 %v1131_v20, 0.0  ;;  %v1059_v20 = vadd.f32 %v5134_v61, %v7053_v29 }
 0x389   : > { %v5541_v12 = vmax.f32 %v1338_v58, %v1363_v19  ;;  %v1364_v5 = vmax.f32 %v1289_v59, %v1314_v43  ;;  %2014 = vmatpush.msra.mxu1 %v4254_v33  ;;  %v1056_v19 = vadd.f32 %v5134_v61, %v7049_v36  ;;  %v1315_v58 = vmax.f32 %v1206_v11, 0.0  ;;  %2316 = vmatpush.msra.mxu3 %v4303_v49  ;;  %v7052_v11 = vld [vmem:[#allocation32_spill] sm:$0xff] }
 0x38b   : > { %v1532_v21 = vpop.f32.mrf.mxu1  ;;  %4223 = vmatmul.msk.f32.gmra.mxu2 %vm1472_vm5, %v5522_v39  ;;  %v1464_v0 = vrot.slane %v5541_v12, 1  ;;  %v1758_v24 = vrot.slane %v5541_v12, 2  ;;  %v1265_v59 = vmax.f32 %v1056_v19, 0.0  ;;  %2317 = vmatpush.msra.mxu3 %v4302_v32  ;;  %v1365_v35 = vmax.f32 %v1290_v31, %v1315_v58 }
 0x38c   : > { %v1655_v30 = vadd.f32 %v1654_v27, %v1532_v21  ;;  %v4253_v27 = vld [vmem:[%s7020_s3 + $0x68] sm:$0xff]  ;;  %v5581_v21 = vmax.f32 %v1339_v14, %v1364_v5 }
 0x38d   : > { %2015 = vmatpush.msra.mxu1 %v4253_v27  ;;  %v1465_v38 = vsel %vm1428_vm6, %v1462_v60, %v1464_v0  ;;  %v1759_v43 = vsel %vm1722_vm7, %v1756_v22, %v1758_v24 }
 0x38e   : > { %4201 = vmatmul.msk.f32.gmra.mxu1 %vm1472_vm5, %v1463_v23  ;;  %v1657_v16 = vpop.f32.mrf.mxu2  ;;  %4247 = vmatmul.msk.f32.gmra.mxu3 %vm1472_vm5, %v1757_v48  ;;  %v1240_v23 = vmax.f32 %v981_v42, 0.0  ;;  %v7051_v48 = vld [vmem:[#allocation30_spill] sm:$0xff]  ;;  %v1466_v22 = vrot.slane %v5581_v21, 1  ;;  %v1760_v33 = vrot.slane %v5581_v21, 2  ;;  %v1266_v42 = vmax.f32 %v1059_v20, 0.0 }
 0x38f   : > { %2016 = vmatpush.msra.mxu1 %v4252_v37  ;;  %v1209_v34 = vadd.f32 %v5134_v61, %v7051_v48 }
 0x390   : > { %v1340_v5 = vmax.f32 %v1240_v23, %v1265_v59  ;;  %v1467_v19 = vsel %vm1428_vm6, %v1464_v0, %v1466_v22 }
 0x391   : > { %v1825_v50 = vpop.f32.mrf.mxu3  ;;  %v1316_v49 = vmax.f32 %v1209_v34, 0.0  ;;  %v2108_v34 = vrot.slane %v5254_v6, 7 }
 0x392   : > { %v5561_v28 = vadd.f32 %v1825_v50, %v1655_v30  ;;  %v1134_v30 = vadd.f32 %v5134_v61, %v7052_v11  ;;  %v5601_v14 = vmax.f32 %v1340_v5, %v1365_v35  ;;  %v2107_v35 = vrot.slane %v5237_v18, 7 }
 0x393   : > { %v1535_v25 = vpop.f32.mrf.mxu1  ;;  %4224 = vmatmul.msk.f32.gmra.mxu2 %vm1472_vm5, %v5541_v12 }
 0x394   : > { %v1658_v45 = vadd.f32 %v1657_v16, %v1535_v25  ;;  %v7054_v16 = vld [vmem:[#allocation14_spill] sm:$0xff]  ;;  %v1291_v36 = vmax.f32 %v1134_v30, 0.0  ;;  %v1761_v25 = vsel %vm1722_vm7, %v1758_v24, %v1760_v33 }
 0x395   : > { %v984_v27 = vadd.f32 %v5134_v61, %v7054_v16  ;;  %v1468_v61 = vrot.slane %v5601_v14, 1  ;;  %v2110_v16 = vrot.slane %v5271_v63, 7 }
 0x396   : > { %4202 = vmatmul.msk.f32.gmra.mxu1 %vm1472_vm5, %v1465_v38  ;;  %v1660_v46 = vpop.f32.mrf.mxu2  ;;  %4248 = vmatmul.msk.f32.gmra.mxu3 %vm1472_vm5, %v1759_v43  ;;  %v1366_v32 = vmax.f32 %v1291_v36, %v1316_v49  ;;  %v1762_v38 = vrot.slane %v5601_v14, 2  ;;  %v1917_v36 = vrot.slane %v5254_v6, 6 }
 0x397   : > { %v1241_v37 = vmax.f32 %v984_v27, 0.0  ;;  %v1469_v23 = vsel %vm1428_vm6, %v1466_v22, %v1468_v61  ;;  %v2109_v22 = vsel %vm899_vm0, %v2107_v35, %v2108_v34 }
 0x399   : > { %v1828_v60 = vpop.f32.mrf.mxu3  ;;  %v1341_v59 = vmax.f32 %v1241_v37, %v1266_v42  ;;  %v1916_v42 = vrot.slane %v5237_v18, 6 }
 0x39a   : > { %v5593_v26 = vadd.f32 %v1828_v60, %v1658_v45 }
 0x39b   : > { %v1538_v50 = vpop.f32.mrf.mxu1  ;;  %4225 = vmatmul.msk.f32.gmra.mxu2 %vm1472_vm5, %v5581_v21  ;;  %v5613_v24 = vmax.f32 %v1341_v59, %v1366_v32  ;;  %v2112_v32 = vrot.slane %v5288_v44, 7 }
 0x39c   : > { %v1661_v58 = vadd.f32 %v1660_v46, %v1538_v50  ;;  %v1763_v46 = vsel %vm1722_vm7, %v1760_v33, %v1762_v38 }
 0x39d   : > { %v1470_v30 = vrot.slane %v5613_v24, 1  ;;  %v1764_v60 = vrot.slane %v5613_v24, 2 }
 0x39e   : > { %4203 = vmatmul.msk.f32.gmra.mxu1 %vm1472_vm5, %v1467_v19  ;;  %v1663_v55 = vpop.f32.mrf.mxu2  ;;  %4249 = vmatmul.msk.f32.gmra.mxu3 %vm1472_vm5, %v1761_v25  ;;  %v2111_v25 = vsel %vm899_vm0, %v2108_v34, %v2110_v16 }
 0x39f   : > { %v1471_v29 = vsel %vm1428_vm6, %v1468_v61, %v1470_v30  ;;  %v1765_v20 = vsel %vm1722_vm7, %v1762_v38, %v1764_v60  ;;  %v1919_v38 = vrot.slane %v5271_v63, 6 }
 0x3a1   : > { %v1831_v31 = vpop.f32.mrf.mxu3  ;;  %v1920_v18 = vsel %vm1915_vm2, %v1917_v36, %v1919_v38 }
 0x3a2   : > { %v5609_v43 = vadd.f32 %v1831_v31, %v1661_v58  ;;  %v1918_v58 = vsel %vm1915_vm2, %v1916_v42, %v1917_v36 }
 0x3a3   : > { %v1541_v0 = vpop.f32.mrf.mxu1  ;;  %4226 = vmatmul.msk.f32.gmra.mxu2 %vm1472_vm5, %v5601_v14 }
 0x3a4   : > { %v1664_v45 = vadd.f32 %v1663_v55, %v1541_v0  ;;  %v2113_v0 = vsel %vm899_vm0, %v2110_v16, %v2112_v32 }
 0x3a6   : > { %4204 = vmatmul.msk.f32.gmra.mxu1 %vm1472_vm5, %v1469_v23  ;;  %v1666_v48 = vpop.f32.mrf.mxu2  ;;  %4250 = vmatmul.msk.f32.gmra.mxu3 %vm1472_vm5, %v1763_v46 }
 0x3a9   : > { %v1834_v11 = vpop.f32.mrf.mxu3 }
 0x3aa   : > { %v5623_v5 = vadd.f32 %v1834_v11, %v1664_v45  ;;  %v1921_v45 = vrot.slane %v5288_v44, 6 }
 0x3ab   : > { %v1544_v33 = vpop.f32.mrf.mxu1  ;;  %4281 = vmatmul.msk.f32.vlgmr.msra.gmra.mxu2 %vm1472_vm5, %v2109_v22 }
 0x3ac   : > { %v1667_v27 = vadd.f32 %v1666_v48, %v1544_v33  ;;  %v5659_v60 = vsel %vm1915_vm2, %v1919_v38, %v1921_v45  ;;  %v2116_v33 = vrot.slane %v5322_v1, 7 }
 0x3ae   : > { %4205 = vmatmul.msk.f32.gmra.mxu1 %vm1472_vm5, %v1471_v29  ;;  %v1669_v50 = vpop.f32.mrf.mxu2  ;;  %4251 = vmatmul.msk.f32.gmra.mxu3 %vm1472_vm5, %v1765_v20 }
 0x3b1   : > { %v1837_v49 = vpop.f32.mrf.mxu3 }
 0x3b2   : > { %v5633_v19 = vadd.f32 %v1837_v49, %v1667_v27 }
 0x3b3   : > { %v1547_v55 = vpop.f32.mrf.mxu1  ;;  %4282 = vmatmul.msk.f32.gmra.mxu2 %vm1472_vm5, %v2111_v25 }
 0x3b4   : > { %v1670_v31 = vadd.f32 %v1669_v50, %v1547_v55  ;;  %v1923_v50 = vrot.slane %v5305_v62, 6  ;;  %v2118_v55 = vrot.slane %v5339_v8, 7 }
 0x3b6   : > { %v1672_v37 = vpop.f32.mrf.mxu2  ;;  %4256 = vmatmul.msk.f32.vlgmr.msra.gmra.mxu1 %vm1472_vm5, %v1918_v58  ;;  %4306 = vmatmul.msk.f32.vlgmr.msra.gmra.mxu3 %vm1472_vm5, %v5254_v6  ;;  %v2114_v6 = vrot.slane %v5305_v62, 7  ;;  %v5672_v36 = vsel %vm1915_vm2, %v1921_v45, %v1923_v50 }
 0x3b8   : > { %v2115_v11 = vsel %vm899_vm0, %v2112_v32, %v2114_v6  ;;  %v2117_v27 = vsel %vm899_vm0, %v2114_v6, %v2116_v33  ;;  %v1927_v6 = vrot.slane %v5339_v8, 6 }
 0x3b9   : > { %v1840_v61 = vpop.f32.mrf.mxu3 }
 0x3ba   : > { %v5644_v59 = vadd.f32 %v1840_v61, %v1670_v31  ;;  %v2119_v31 = vsel %vm899_vm0, %v2116_v33, %v2118_v55 }
 0x3bb   : > { %v1550_v23 = vpop.f32.mrf.mxu1  ;;  %4283 = vmatmul.msk.f32.gmra.mxu2 %vm1472_vm5, %v2113_v0 }
 0x3bc   : > { %v1673_v48 = vadd.f32 %v1672_v37, %v1550_v23  ;;  %v1925_v37 = vrot.slane %v5322_v1, 6  ;;  %v2120_v23 = vrot.slane %v5356_v51, 7 }
 0x3be   : > { %v1675_v46 = vpop.f32.mrf.mxu2  ;;  %4257 = vmatmul.msk.f32.gmra.mxu1 %vm1472_vm5, %v1920_v18  ;;  %4307 = vmatmul.msk.f32.gmra.mxu3 %vm1472_vm5, %v5271_v63  ;;  %v5685_v38 = vsel %vm1915_vm2, %v1923_v50, %v1925_v37 }
 0x3c1   : > { %v1843_v34 = vpop.f32.mrf.mxu3 }
 0x3c2   : > { %v5654_v35 = vadd.f32 %v1843_v34, %v1673_v48  ;;  %v2121_v34 = vsel %vm899_vm0, %v2118_v55, %v2120_v23 }
 0x3c3   : > { %v1553_v30 = vpop.f32.mrf.mxu1  ;;  %4284 = vmatmul.msk.f32.gmra.mxu2 %vm1472_vm5, %v2115_v11  ;;  %v5698_v11 = vsel %vm1915_vm2, %v1925_v37, %v1927_v6 }
 0x3c4   : > { %v1676_v29 = vadd.f32 %v1675_v46, %v1553_v30 }
 0x3c6   : > { %v1678_v22 = vpop.f32.mrf.mxu2  ;;  %4258 = vmatmul.msk.f32.gmra.mxu1 %vm1472_vm5, %v5659_v60  ;;  %4308 = vmatmul.msk.f32.gmra.mxu3 %vm1472_vm5, %v5288_v44 }
 0x3c9   : > { %v1846_v20 = vpop.f32.mrf.mxu3 }
 0x3ca   : > { %v5667_v16 = vadd.f32 %v1846_v20, %v1676_v29  ;;  %v1929_v20 = vrot.slane %v5356_v51, 6 }
 0x3cb   : > { %v1556_v49 = vpop.f32.mrf.mxu1  ;;  %4285 = vmatmul.msk.f32.gmra.mxu2 %vm1472_vm5, %v2117_v27 }
 0x3cc   : > { %v1679_v42 = vadd.f32 %v1678_v22, %v1556_v49  ;;  %v2122_v22 = vrot.slane %v5373_v17, 7 }
 0x3ce   : > { %v1681_v25 = vpop.f32.mrf.mxu2  ;;  %4259 = vmatmul.msk.f32.gmra.mxu1 %vm1472_vm5, %v5672_v36  ;;  %4309 = vmatmul.msk.f32.gmra.mxu3 %vm1472_vm5, %v5305_v62  ;;  %v2123_v27 = vsel %vm899_vm0, %v2120_v23, %v2122_v22 }
 0x3d1   : > { %v1849_v58 = vpop.f32.mrf.mxu3 }
 0x3d2   : > { %v5680_v32 = vadd.f32 %v1849_v58, %v1679_v42  ;;  %v2124_v42 = vrot.slane %v5390_v15, 7 }
 0x3d3   : > { %v1559_v61 = vpop.f32.mrf.mxu1  ;;  %4286 = vmatmul.msk.f32.gmra.mxu2 %vm1472_vm5, %v2119_v31  ;;  %v1931_v31 = vrot.slane %v5373_v17, 6 }
 0x3d4   : > { %v1682_v18 = vadd.f32 %v1681_v25, %v1559_v61  ;;  %v5711_v25 = vsel %vm1915_vm2, %v1927_v6, %v1929_v20  ;;  %v2126_v6 = vrot.slane %v5407_v10, 7 }
 0x3d6   : > { %v1684_v0 = vpop.f32.mrf.mxu2  ;;  %4260 = vmatmul.msk.f32.gmra.mxu1 %vm1472_vm5, %v5685_v38  ;;  %4310 = vmatmul.msk.f32.gmra.mxu3 %vm1472_vm5, %v5322_v1 }
 0x3d9   : > { %v1852_v46 = vpop.f32.mrf.mxu3 }
 0x3da   : > { %v5693_v48 = vadd.f32 %v1852_v46, %v1682_v18  ;;  %v5724_v18 = vsel %vm1915_vm2, %v1929_v20, %v1931_v31 }
 0x3db   : > { %v1562_v45 = vpop.f32.mrf.mxu1  ;;  %4287 = vmatmul.msk.f32.gmra.mxu2 %vm1472_vm5, %v2121_v34 }
 0x3dc   : > { %v1685_v33 = vadd.f32 %v1684_v0, %v1562_v45  ;;  %v2125_v0 = vsel %vm899_vm0, %v2122_v22, %v2124_v42 }
 0x3de   : > { %v1687_v30 = vpop.f32.mrf.mxu2  ;;  %4261 = vmatmul.msk.f32.gmra.mxu1 %vm1472_vm5, %v5698_v11  ;;  %4311 = vmatmul.msk.f32.gmra.mxu3 %vm1472_vm5, %v5339_v8 }
 0x3e1   : > { %v1855_v29 = vpop.f32.mrf.mxu3 }
 0x3e2   : > { %v5706_v50 = vadd.f32 %v1855_v29, %v1685_v33  ;;  %v2127_v33 = vsel %vm899_vm0, %v2124_v42, %v2126_v6 }
 0x3e3   : > { %v1565_v49 = vpop.f32.mrf.mxu1  ;;  %4288 = vmatmul.msk.f32.gmra.mxu2 %vm1472_vm5, %v2123_v27 }
 0x3e4   : > { %v1688_v58 = vadd.f32 %v1687_v30, %v1565_v49  ;;  %v1933_v30 = vrot.slane %v5390_v15, 6  ;;  %v2128_v49 = vrot.slane %v5424_v13, 7 }
 0x3e6   : > { %v1690_v55 = vpop.f32.mrf.mxu2  ;;  %4262 = vmatmul.msk.f32.gmra.mxu1 %vm1472_vm5, %v5711_v25  ;;  %4312 = vmatmul.msk.f32.gmra.mxu3 %vm1472_vm5, %v5356_v51  ;;  %v5737_v20 = vsel %vm1915_vm2, %v1931_v31, %v1933_v30 }
 0x3e9   : > { %v1858_v37 = vpop.f32.mrf.mxu3 }
 0x3ea   : > { %v5719_v61 = vadd.f32 %v1858_v37, %v1688_v58  ;;  %v1935_v37 = vrot.slane %v5407_v10, 6 }
 0x3eb   : > { %v1568_v23 = vpop.f32.mrf.mxu1  ;;  %4289 = vmatmul.msk.f32.gmra.mxu2 %vm1472_vm5, %v2125_v0  ;;  %v2129_v0 = vsel %vm899_vm0, %v2126_v6, %v2128_v49 }
 0x3ec   : > { %v1691_v34 = vadd.f32 %v1690_v55, %v1568_v23  ;;  %v5750_v31 = vsel %vm1915_vm2, %v1933_v30, %v1935_v37 }
 0x3ee   : > { %v1693_v46 = vpop.f32.mrf.mxu2  ;;  %4263 = vmatmul.msk.f32.gmra.mxu1 %vm1472_vm5, %v5724_v18  ;;  %4313 = vmatmul.msk.f32.gmra.mxu3 %vm1472_vm5, %v5373_v17 }
 0x3f1   : > { %v1861_v45 = vpop.f32.mrf.mxu3 }
 0x3f2   : > { %v5732_v22 = vadd.f32 %v1861_v45, %v1691_v34 }
 0x3f3   : > { %v1571_v29 = vpop.f32.mrf.mxu1  ;;  %4290 = vmatmul.msk.f32.gmra.mxu2 %vm1472_vm5, %v2127_v33 }
 0x3f4   : > { %v1694_v55 = vadd.f32 %v1693_v46, %v1571_v29  ;;  %v2130_v46 = vrot.slane %v5441_v40, 7  ;;  %v1937_v29 = vrot.slane %v5424_v13, 6 }
 0x3f6   : > { %v1696_v27 = vpop.f32.mrf.mxu2  ;;  %4264 = vmatmul.msk.f32.gmra.mxu1 %vm1472_vm5, %v5737_v20  ;;  %4314 = vmatmul.msk.f32.gmra.mxu3 %vm1472_vm5, %v5390_v15  ;;  %v5763_v30 = vsel %vm1915_vm2, %v1935_v37, %v1937_v29 }
 0x3f9   : > { %v1864_v58 = vpop.f32.mrf.mxu3 }
 0x3fa   : > { %v5745_v42 = vadd.f32 %v1864_v58, %v1694_v55  ;;  %v2131_v55 = vsel %vm899_vm0, %v2128_v49, %v2130_v46 }
 0x3fb   : > { %v1574_v23 = vpop.f32.mrf.mxu1  ;;  %4291 = vmatmul.msk.f32.gmra.mxu2 %vm1472_vm5, %v2129_v0 }
 0x3fc   : > { %v1697_v45 = vadd.f32 %v1696_v27, %v1574_v23  ;;  %v2132_v27 = vrot.slane %v5460_v57, 7 }
 0x3fe   : > { %v1699_v34 = vpop.f32.mrf.mxu2  ;;  %4265 = vmatmul.msk.f32.gmra.mxu1 %vm1472_vm5, %v5750_v31  ;;  %4315 = vmatmul.msk.f32.gmra.mxu3 %vm1472_vm5, %v5407_v10 }
 0x401   : > { %v1867_v33 = vpop.f32.mrf.mxu3 }
 0x402   : > { %v5758_v6 = vadd.f32 %v1867_v33, %v1697_v45  ;;  %v1939_v33 = vrot.slane %v5441_v40, 6 }
 0x403   : > { %v1577_v58 = vpop.f32.mrf.mxu1  ;;  %4292 = vmatmul.msk.f32.gmra.mxu2 %vm1472_vm5, %v2131_v55  ;;  %v2133_v55 = vsel %vm899_vm0, %v2130_v46, %v2132_v27 }
 0x404   : > { %v1700_v23 = vadd.f32 %v1699_v34, %v1577_v58  ;;  %v5776_v37 = vsel %vm1915_vm2, %v1937_v29, %v1939_v33  ;;  %v2134_v34 = vrot.slane %v5477_v4, 7 }
 0x406   : > { %v1702_v0 = vpop.f32.mrf.mxu2  ;;  %4266 = vmatmul.msk.f32.gmra.mxu1 %vm1472_vm5, %v5763_v30  ;;  %4316 = vmatmul.msk.f32.gmra.mxu3 %vm1472_vm5, %v5424_v13 }
 0x409   : > { %v1870_v45 = vpop.f32.mrf.mxu3 }
 0x40a   : > { %v5771_v49 = vadd.f32 %v1870_v45, %v1700_v23  ;;  %v1941_v45 = vrot.slane %v5460_v57, 6 }
 0x40b   : > { %v1580_v56 = vpop.f32.mrf.mxu1  ;;  %4293 = vmatmul.msk.f32.gmra.mxu2 %vm1472_vm5, %v2133_v55  ;;  %v2135_v55 = vsel %vm899_vm0, %v2132_v27, %v2134_v34 }
 0x40c   : > { %v1703_v58 = vadd.f32 %v1702_v0, %v1580_v56  ;;  %v5789_v29 = vsel %vm1915_vm2, %v1939_v33, %v1941_v45  ;;  %v2136_v56 = vrot.slane %v5499_v54, 7 }
 0x40e   : > { %v1705_v47 = vpop.f32.mrf.mxu2  ;;  %4267 = vmatmul.msk.f32.gmra.mxu1 %vm1472_vm5, %v5776_v37  ;;  %4317 = vmatmul.msk.f32.gmra.mxu3 %vm1472_vm5, %v5441_v40 }
 0x411   : > { %v1873_v23 = vpop.f32.mrf.mxu3 }
 0x412   : > { %v5784_v46 = vadd.f32 %v1873_v23, %v1703_v58  ;;  %v1943_v23 = vrot.slane %v5477_v4, 6 }
 0x413   : > { %v1583_v41 = vpop.f32.mrf.mxu1  ;;  %4294 = vmatmul.msk.f32.gmra.mxu2 %vm1472_vm5, %v2135_v55  ;;  %v2137_v55 = vsel %vm899_vm0, %v2134_v34, %v2136_v56 }
 0x414   : > { %v1706_v0 = vadd.f32 %v1705_v47, %v1583_v41  ;;  %v5802_v33 = vsel %vm1915_vm2, %v1941_v45, %v1943_v23  ;;  %v2138_v47 = vrot.slane %v5522_v39, 7 }
 0x416   : > { %v1708_v9 = vpop.f32.mrf.mxu2  ;;  %4268 = vmatmul.msk.f32.gmra.mxu1 %vm1472_vm5, %v5789_v29  ;;  %4318 = vmatmul.msk.f32.gmra.mxu3 %vm1472_vm5, %v5460_v57 }
 0x419   : > { %v1876_v58 = vpop.f32.mrf.mxu3 }
 0x41a   : > { %v5797_v27 = vadd.f32 %v1876_v58, %v1706_v0  ;;  %v1945_v58 = vrot.slane %v5499_v54, 6 }
 0x41b   : > { %v1586_v7 = vpop.f32.mrf.mxu1  ;;  %4295 = vmatmul.msk.f32.gmra.mxu2 %vm1472_vm5, %v2137_v55  ;;  %v2139_v55 = vsel %vm899_vm0, %v2136_v56, %v2138_v47 }
 0x41c   : > { %7055 = vst [vmem:[#allocation23_spill] sm:$0xff] %v5797_v27  ;;  %v1709_v41 = vadd.f32 %v1708_v9, %v1586_v7  ;;  %v5815_v45 = vsel %vm1915_vm2, %v1943_v23, %v1945_v58  ;;  %v2140_v7 = vrot.slane %v5541_v12, 7  ;;  %v1947_v23 = vrot.slane %v5522_v39, 6 }
 0x41d   : > { %7057 = vst [vmem:[#allocation7_spill] sm:$0xff] %v5815_v45 }
 0x41e   : > { %v1711_v2 = vpop.f32.mrf.mxu2  ;;  %4269 = vmatmul.msk.f32.gmra.mxu1 %vm1472_vm5, %v5802_v33  ;;  %4319 = vmatmul.msk.f32.gmra.mxu3 %vm1472_vm5, %v5477_v4  ;;  %v2141_v56 = vsel %vm899_vm0, %v2138_v47, %v2140_v7  ;;  %v4354_v47 = vld [vmem:[%s7020_s3 + $0xf0] sm:$0xff] }
 0x421   : > { %v1879_v0 = vpop.f32.mrf.mxu3 }
 0x422   : > { %v5810_v34 = vadd.f32 %v1879_v0, %v1709_v41 }
 0x423   : > { %v1589_v53 = vpop.f32.mrf.mxu1  ;;  %4296 = vmatmul.msk.f32.gmra.mxu2 %vm1472_vm5, %v2139_v55  ;;  %v4355_v55 = vld [vmem:[%s7020_s3 + $0xf8] sm:$0xff] }
 0x424   : > { %7056 = vst [vmem:[#allocation15_spill] sm:$0xff] %v5810_v34  ;;  %v1712_v9 = vadd.f32 %v1711_v2, %v1589_v53  ;;  %2699 = vmatpush.msrb.mxu2 %v4355_v55  ;;  %v2142_v53 = vrot.slane %v5581_v21, 7 }
 0x426   : > { %v1714_v3 = vpop.f32.mrf.mxu2  ;;  %4270 = vmatmul.msk.f32.gmra.mxu1 %vm1472_vm5, %v5815_v45  ;;  %4320 = vmatmul.msk.f32.gmra.mxu3 %vm1472_vm5, %v5499_v54  ;;  %v5831_v45 = vsel %vm1915_vm2, %v1945_v58, %v1947_v23 }
 0x427   : > { %7059 = vst [vmem:[#allocation16_spill] sm:$0xff] %v5831_v45  ;;  %2700 = vmatpush.msrb.mxu2 %v4354_v47 }
 0x429   : > { %v1882_v41 = vpop.f32.mrf.mxu3 }
 0x42a   : > { %v5822_v0 = vadd.f32 %v1882_v41, %v1712_v9  ;;  %v4353_v9 = vld [vmem:[%s7020_s3 + $0xe8] sm:$0xff] }
 0x42b   : > { %v1592_v34 = vpop.f32.mrf.mxu1  ;;  %4297 = vmatmul.msk.f32.gmra.mxu2 %vm1472_vm5, %v2141_v56  ;;  %v1949_v56 = vrot.slane %v5541_v12, 6 }
 0x42c   : > { %7058 = vst [vmem:[#allocation24_spill] sm:$0xff] %v5822_v0  ;;  %v1715_v58 = vadd.f32 %v1714_v3, %v1592_v34  ;;  %2701 = vmatpush.msrb.mxu2 %v4353_v9  ;;  %v2143_v0 = vsel %vm899_vm0, %v2140_v7, %v2142_v53  ;;  %v4380_v3 = vld [vmem:[%s7020_s3 + $0x118] sm:$0xff] }
 0x42d   : > { %v5857_v34 = vsel %vm1915_vm2, %v1947_v23, %v1949_v56  ;;  %2813 = vmatpush.msrb.mxu3 %v4380_v3  ;;  %v4328_v3 = vld [vmem:[%s7020_s3 + $0xc8] sm:$0xff] }
 0x42e   : > { %4271 = vmatmul.msk.f32.gmra.mxu1 %vm1472_vm5, %v5831_v45  ;;  %v2209_v2 = vpop.f32.mrf.mxu2  ;;  %4321 = vmatmul.msk.f32.gmra.mxu3 %vm1472_vm5, %v5522_v39  ;;  %v4352_v45 = vld [vmem:[%s7020_s3 + $0xe0] sm:$0xff] }
 0x42f   : > { %2702 = vmatpush.msrb.mxu2 %v4352_v45  ;;  %v1951_v45 = vrot.slane %v5581_v21, 6 }
 0x431   : > { %v1885_v41 = vpop.f32.mrf.mxu3 }
 0x432   : > { %v5845_v55 = vadd.f32 %v1885_v41, %v1715_v58  ;;  %v4329_v58 = vld [vmem:[%s7020_s3 + $0xd0] sm:$0xff] }
 0x433   : > { %v2018_v27 = vpop.f32.mrf.mxu1  ;;  %4298 = vmatmul.msk.f32.gmra.mxu2 %vm1472_vm5, %v2143_v0  ;;  %v2144_v0 = vrot.slane %v5601_v14, 7 }
 0x434   : > { %7060 = vst [vmem:[#allocation8_spill] sm:$0xff] %v5845_v55  ;;  %v2081_v39 = vadd.f32 %v2018_v27, %v5561_v28  ;;  %v4330_v28 = vld [vmem:[%s7020_s3 + $0xd8] sm:$0xff] }
 0x435   : > { %2507 = vmatpush.msrb.mxu1 %v4330_v28  ;;  %v2145_v9 = vsel %vm899_vm0, %v2142_v53, %v2144_v0  ;;  %v4378_v53 = vld [vmem:[%s7020_s3 + $0x108] sm:$0xff]  ;;  %v5889_v28 = vsel %vm1915_vm2, %v1949_v56, %v1951_v45  ;;  %v1953_v56 = vrot.slane %v5601_v14, 6 }
 0x436   : > { %4272 = vmatmul.msk.f32.gmra.mxu1 %vm1472_vm5, %v5857_v34  ;;  %v2212_v7 = vpop.f32.mrf.mxu2  ;;  %4322 = vmatmul.msk.f32.gmra.mxu3 %vm1472_vm5, %v5541_v12  ;;  %v2272_v47 = vadd.f32 %v2209_v2, %v2081_v39  ;;  %v4379_v39 = vld [vmem:[%s7020_s3 + $0x110] sm:$0xff] }
 0x437   : > { %2508 = vmatpush.msrb.mxu1 %v4329_v58  ;;  %2814 = vmatpush.msrb.mxu3 %v4379_v39  ;;  %v4377_v58 = vld [vmem:[%s7020_s3 + $0x100] sm:$0xff] }
 0x439   : > { %v2319_v27 = vpop.f32.mrf.mxu3  ;;  %2509 = vmatpush.msrb.mxu1 %v4328_v3  ;;  %2815 = vmatpush.msrb.mxu3 %v4378_v53 }
 0x43a   : > { %v5868_v23 = vadd.f32 %v2319_v27, %v2272_v47  ;;  %v4327_v47 = vld [vmem:[%s7020_s3 + $0xc0] sm:$0xff]  ;;  %s4020_s3 = sshll.u32 %s4016_s16, 4  ;;  %s4021_s3 = int_to_ptr.hbm [resolvable:$true] %s4020_s3 }
 0x43b   : > { %v2021_v2 = vpop.f32.mrf.mxu1  ;;  %4299 = vmatmul.msk.f32.gmra.mxu2 %vm1472_vm5, %v2145_v9  ;;  %v2146_v9 = vrot.slane %v5613_v24, 7  ;;  %2510 = vmatpush.msrb.mxu1 %v4327_v47  ;;  %s4589_s27 = sshra.s32 %s4021_s3, 4  ;;  %s4590_s27 = int_to_ptr.hbm [resolvable:$true] %s4589_s27 }
 0x43c   : > { %7061 = vst [vmem:[#allocation25_spill] sm:$0xff] %v5868_v23  ;;  %v2082_v41 = vadd.f32 %v2021_v2, %v5593_v26  ;;  %2816 = vmatpush.msrb.mxu3 %v4377_v58  ;;  %p4596_p0 = scmp.lt.s32.totalorder %s4590_s27, %s6973_s15 }
 0x43d   : > { %v2147_v3 = vsel %vm899_vm0, %v2144_v0, %v2146_v9  ;;  %v1955_v0 = vrot.slane %v5613_v24, 6 }
 0x43e   : > { %4273 = vmatmul.msk.f32.gmra.mxu1 %vm1472_vm5, %v5889_v28  ;;  %v2215_v26 = vpop.f32.mrf.mxu2  ;;  %4323 = vmatmul.msk.f32.gmra.mxu3 %vm1472_vm5, %v5581_v21  ;;  %v2273_v27 = vadd.f32 %v2212_v7, %v2082_v41  ;;  %v5906_v41 = vsel %vm1915_vm2, %v1951_v45, %v1953_v56 }
 0x441   : > { %v2322_v39 = vpop.f32.mrf.mxu3 }
 0x442   : > { %v5900_v2 = vadd.f32 %v2322_v39, %v2273_v27  ;;  %v2148_v27 = vrot.slane %v5181_v52, 7 }
 0x443   : > { %v2024_v55 = vpop.f32.mrf.mxu1  ;;  %4300 = vmatmul.msk.f32.gmra.mxu2 %vm1472_vm5, %v2147_v3  ;;  %v5920_v3 = vsel %vm1915_vm2, %v1953_v56, %v1955_v0 }
 0x444   : > { %7062 = vst [vmem:[#allocation17_spill] sm:$0xff] %v5900_v2  ;;  %v2083_v7 = vadd.f32 %v2024_v55, %v5609_v43  ;;  %v2149_v43 = vsel %vm899_vm0, %v2146_v9, %v2148_v27  ;;  %v2602_v9 = vrot.slane %v5271_v63, 5 }
 0x446   : > { %4274 = vmatmul.msk.f32.gmra.mxu1 %vm1472_vm5, %v5906_v41  ;;  %v2218_v53 = vpop.f32.mrf.mxu2  ;;  %4324 = vmatmul.msk.f32.gmra.mxu3 %vm1472_vm5, %v5601_v14  ;;  %v2274_v47 = vadd.f32 %v2215_v26, %v2083_v7 }
 0x449   : > { %v2325_v58 = vpop.f32.mrf.mxu3 }
 0x44a   : > { %v5914_v39 = vadd.f32 %v2325_v58, %v2274_v47  ;;  %v2603_v47 = vrot.slane %v5288_v44, 5 }
 0x44b   : > { %v2027_v55 = vpop.f32.mrf.mxu1  ;;  %4301 = vmatmul.msk.f32.gmra.mxu2 %vm1472_vm5, %v2149_v43 }
 0x44c   : > { %7063 = vst [vmem:[#allocation9_spill] sm:$0xff] %v5914_v39  ;;  %v2084_v45 = vadd.f32 %v2027_v55, %v5623_v5  ;;  %v2604_v5 = vsel %vm2601_vm4, %v2602_v9, %v2603_v47  ;;  %v7064_v55 = vrot.slane %v5181_v52, 6 }
 0x44e   : > { %4275 = vmatmul.msk.f32.gmra.mxu1 %vm1472_vm5, %v5920_v3  ;;  %v2221_v26 = vpop.f32.mrf.mxu2  ;;  %4325 = vmatmul.msk.f32.gmra.mxu3 %vm1472_vm5, %v5613_v24  ;;  %v2275_v7 = vadd.f32 %v2218_v53, %v2084_v45  ;;  %v5936_v23 = vsel %vm1915_vm2, %v1955_v0, %v7064_v55  ;;  %v2410_v0 = vrot.slane %v5271_v63, 4 }
 0x451   : > { %v2328_v27 = vpop.f32.mrf.mxu3 }
 0x452   : > { %v5928_v58 = vadd.f32 %v2328_v27, %v2275_v7  ;;  %v2605_v7 = vrot.slane %v5305_v62, 5  ;;  %v2411_v27 = vrot.slane %v5288_v44, 4 }
 0x453   : > { %v2030_v43 = vpop.f32.mrf.mxu1  ;;  %4356 = vmatmul.msk.f32.vlgmr.msrb.gmra.mxu2 %vm1472_vm5, %v2604_v5 }
 0x454   : > { %v2085_v56 = vadd.f32 %v2030_v43, %v5633_v19  ;;  %v2606_v19 = vsel %vm2601_vm4, %v2603_v47, %v2605_v7  ;;  %v2412_v2 = vsel %vm1395_vm3, %v2410_v0, %v2411_v27  ;;  %v2413_v47 = vrot.slane %v5305_v62, 4 }
 0x455   : > { %v2609_v62 = vrot.slane %v5339_v8, 5 }
 0x456   : > { %4276 = vmatmul.msk.f32.gmra.mxu1 %vm1472_vm5, %v5936_v23  ;;  %v2224_v53 = vpop.f32.mrf.mxu2  ;;  %4326 = vmatmul.msk.f32.gmra.mxu3 %vm1472_vm5, %v5181_v52  ;;  %v2276_v45 = vadd.f32 %v2221_v26, %v2085_v56  ;;  %v2607_v26 = vrot.slane %v5322_v1, 5 }
 0x458   : > { %v2608_v63 = vsel %vm2601_vm4, %v2605_v7, %v2607_v26  ;;  %v2610_v0 = vsel %vm2601_vm4, %v2607_v26, %v2609_v62 }
 0x459   : > { %v2331_v9 = vpop.f32.mrf.mxu3 }
 0x45a   : > { %v5944_v5 = vadd.f32 %v2331_v9, %v2276_v45 }
 0x45b   : > { %v2033_v43 = vpop.f32.mrf.mxu1  ;;  %4357 = vmatmul.msk.f32.gmra.mxu2 %vm1472_vm5, %v2606_v19 }
 0x45c   : > { %v2086_v55 = vadd.f32 %v2033_v43, %v5644_v59  ;;  %v2415_v43 = vrot.slane %v5322_v1, 4  ;;  %v2611_v1 = vrot.slane %v5356_v51, 5 }
 0x45e   : > { %v2227_v39 = vpop.f32.mrf.mxu2  ;;  %4331 = vmatmul.msk.f32.vlgmr.msrb.gmra.mxu1 %vm1472_vm5, %v2412_v2  ;;  %4381 = vmatmul.msk.f32.vlgmr.msrb.gmra.mxu3 %vm1472_vm5, %v5659_v60  ;;  %v2277_v44 = vadd.f32 %v2224_v53, %v2086_v55  ;;  %v2414_v2 = vsel %vm1395_vm3, %v2411_v27, %v2413_v47  ;;  %v2416_v27 = vsel %vm1395_vm3, %v2413_v47, %v2415_v43 }
 0x461   : > { %v2334_v56 = vpop.f32.mrf.mxu3 }
 0x462   : > { %v5956_v45 = vadd.f32 %v2334_v56, %v2277_v44  ;;  %v2417_v56 = vrot.slane %v5339_v8, 4  ;;  %v2613_v8 = vrot.slane %v5373_v17, 5 }
 0x463   : > { %v2036_v9 = vpop.f32.mrf.mxu1  ;;  %4358 = vmatmul.msk.f32.gmra.mxu2 %vm1472_vm5, %v2608_v63  ;;  %v2612_v63 = vsel %vm2601_vm4, %v2609_v62, %v2611_v1 }
 0x464   : > { %v2087_v59 = vadd.f32 %v2036_v9, %v5654_v35  ;;  %v2418_v47 = vsel %vm1395_vm3, %v2415_v43, %v2417_v56  ;;  %v2614_v62 = vsel %vm2601_vm4, %v2611_v1, %v2613_v8 }
 0x466   : > { %v2230_v19 = vpop.f32.mrf.mxu2  ;;  %4332 = vmatmul.msk.f32.gmra.mxu1 %vm1472_vm5, %v2414_v2  ;;  %4382 = vmatmul.msk.f32.gmra.mxu3 %vm1472_vm5, %v5672_v36  ;;  %v2278_v60 = vadd.f32 %v2227_v39, %v2087_v59 }
 0x469   : > { %v2337_v53 = vpop.f32.mrf.mxu3 }
 0x46a   : > { %v5967_v7 = vadd.f32 %v2337_v53, %v2278_v60 }
 0x46b   : > { %v2039_v55 = vpop.f32.mrf.mxu1  ;;  %4359 = vmatmul.msk.f32.gmra.mxu2 %vm1472_vm5, %v2610_v0 }
 0x46c   : > { %v2088_v35 = vadd.f32 %v2039_v55, %v5667_v16 }
 0x46e   : > { %v2233_v44 = vpop.f32.mrf.mxu2  ;;  %4333 = vmatmul.msk.f32.gmra.mxu1 %vm1472_vm5, %v2416_v27  ;;  %4383 = vmatmul.msk.f32.gmra.mxu3 %vm1472_vm5, %v5685_v38  ;;  %v2279_v36 = vadd.f32 %v2230_v19, %v2088_v35  ;;  %v2419_v19 = vrot.slane %v5356_v51, 4  ;;  %v2615_v51 = vrot.slane %v5390_v15, 5  ;;  %v2421_v35 = vrot.slane %v5373_v17, 4 }
 0x46f   : > { %v2617_v17 = vrot.slane %v5407_v10, 5 }
 0x470   : > { %v2420_v43 = vsel %vm1395_vm3, %v2417_v56, %v2419_v19  ;;  %v2422_v1 = vsel %vm1395_vm3, %v2419_v19, %v2421_v35 }
 0x471   : > { %v2340_v39 = vpop.f32.mrf.mxu3 }
 0x472   : > { %v5978_v26 = vadd.f32 %v2340_v39, %v2279_v36 }
 0x473   : > { %v2042_v9 = vpop.f32.mrf.mxu1  ;;  %4360 = vmatmul.msk.f32.gmra.mxu2 %vm1472_vm5, %v2612_v63  ;;  %v2423_v63 = vrot.slane %v5390_v15, 4  ;;  %v2619_v15 = vrot.slane %v5424_v13, 5 }
 0x474   : > { %v2089_v16 = vadd.f32 %v2042_v9, %v5680_v32 }
 0x476   : > { %v2236_v59 = vpop.f32.mrf.mxu2  ;;  %4334 = vmatmul.msk.f32.gmra.mxu1 %vm1472_vm5, %v2418_v47  ;;  %4384 = vmatmul.msk.f32.gmra.mxu3 %vm1472_vm5, %v5698_v11  ;;  %v2280_v38 = vadd.f32 %v2233_v44, %v2089_v16  ;;  %v2616_v44 = vsel %vm2601_vm4, %v2613_v8, %v2615_v51  ;;  %v2618_v16 = vsel %vm2601_vm4, %v2615_v51, %v2617_v17 }
 0x479   : > { %v2343_v2 = vpop.f32.mrf.mxu3 }
 0x47a   : > { %v5989_v60 = vadd.f32 %v2343_v2, %v2280_v38  ;;  %v2425_v2 = vrot.slane %v5407_v10, 4  ;;  %v2621_v10 = vrot.slane %v5441_v40, 5 }
 0x47b   : > { %v2045_v53 = vpop.f32.mrf.mxu1  ;;  %4361 = vmatmul.msk.f32.gmra.mxu2 %vm1472_vm5, %v2614_v62  ;;  %v2620_v62 = vsel %vm2601_vm4, %v2617_v17, %v2619_v15 }
 0x47c   : > { %v2090_v32 = vadd.f32 %v2045_v53, %v5693_v48 }
 0x47e   : > { %v2239_v0 = vpop.f32.mrf.mxu2  ;;  %4335 = vmatmul.msk.f32.gmra.mxu1 %vm1472_vm5, %v2420_v43  ;;  %4385 = vmatmul.msk.f32.gmra.mxu3 %vm1472_vm5, %v5711_v25  ;;  %v2281_v11 = vadd.f32 %v2236_v59, %v2090_v32  ;;  %v2424_v59 = vsel %vm1395_vm3, %v2421_v35, %v2423_v63  ;;  %v2426_v32 = vsel %vm1395_vm3, %v2423_v63, %v2425_v2 }
 0x481   : > { %v2346_v55 = vpop.f32.mrf.mxu3 }
 0x482   : > { %v6000_v27 = vadd.f32 %v2346_v55, %v2281_v11  ;;  %v2427_v11 = vrot.slane %v5424_v13, 4  ;;  %v2622_v55 = vsel %vm2601_vm4, %v2619_v15, %v2621_v10  ;;  %v2623_v13 = vrot.slane %v5460_v57, 5 }
 0x483   : > { %v2048_v36 = vpop.f32.mrf.mxu1  ;;  %4362 = vmatmul.msk.f32.gmra.mxu2 %vm1472_vm5, %v2616_v44 }
 0x484   : > { %v2091_v48 = vadd.f32 %v2048_v36, %v5706_v50  ;;  %v2428_v44 = vsel %vm1395_vm3, %v2425_v2, %v2427_v11  ;;  %v2433_v2 = vrot.slane %v5477_v4, 4 }
 0x486   : > { %v2242_v39 = vpop.f32.mrf.mxu2  ;;  %4336 = vmatmul.msk.f32.gmra.mxu1 %vm1472_vm5, %v2422_v1  ;;  %4386 = vmatmul.msk.f32.gmra.mxu3 %vm1472_vm5, %v5724_v18  ;;  %v2282_v25 = vadd.f32 %v2239_v0, %v2091_v48  ;;  %v2429_v1 = vrot.slane %v5441_v40, 4  ;;  %v2625_v40 = vrot.slane %v5477_v4, 5 }
 0x489   : > { %v2349_v56 = vpop.f32.mrf.mxu3 }
 0x48a   : > { %v6011_v9 = vadd.f32 %v2349_v56, %v2282_v25  ;;  %v2624_v25 = vsel %vm2601_vm4, %v2621_v10, %v2623_v13  ;;  %v2430_v56 = vsel %vm1395_vm3, %v2427_v11, %v2429_v1 }
 0x48b   : > { %v2051_v47 = vpop.f32.mrf.mxu1  ;;  %4363 = vmatmul.msk.f32.gmra.mxu2 %vm1472_vm5, %v2618_v16 }
 0x48c   : > { %v2092_v50 = vadd.f32 %v2051_v47, %v5719_v61  ;;  %v2431_v47 = vrot.slane %v5460_v57, 4  ;;  %v2627_v57 = vrot.slane %v5499_v54, 5 }
 0x48e   : > { %v2245_v38 = vpop.f32.mrf.mxu2  ;;  %4337 = vmatmul.msk.f32.gmra.mxu1 %vm1472_vm5, %v2424_v59  ;;  %4387 = vmatmul.msk.f32.gmra.mxu3 %vm1472_vm5, %v5737_v20  ;;  %v2283_v18 = vadd.f32 %v2242_v39, %v2092_v50  ;;  %v2626_v59 = vsel %vm2601_vm4, %v2623_v13, %v2625_v40 }
 0x491   : > { %v2352_v8 = vpop.f32.mrf.mxu3 }
 0x492   : > { %v6022_v19 = vadd.f32 %v2352_v8, %v2283_v18  ;;  %v2432_v18 = vsel %vm1395_vm3, %v2429_v1, %v2431_v47 }
 0x493   : > { %v2054_v53 = vpop.f32.mrf.mxu1  ;;  %4364 = vmatmul.msk.f32.gmra.mxu2 %vm1472_vm5, %v2620_v62 }
 0x494   : > { %v2093_v61 = vadd.f32 %v2054_v53, %v5732_v22  ;;  %v2628_v53 = vsel %vm2601_vm4, %v2625_v40, %v2627_v57 }
 0x496   : > { %v2248_v43 = vpop.f32.mrf.mxu2  ;;  %4338 = vmatmul.msk.f32.gmra.mxu1 %vm1472_vm5, %v2426_v32  ;;  %4388 = vmatmul.msk.f32.gmra.mxu3 %vm1472_vm5, %v5750_v31  ;;  %v2284_v20 = vadd.f32 %v2245_v38, %v2093_v61  ;;  %v2434_v32 = vsel %vm1395_vm3, %v2431_v47, %v2433_v2 }
 0x499   : > { %v2355_v0 = vpop.f32.mrf.mxu3 }
 0x49a   : > { %v6033_v51 = vadd.f32 %v2355_v0, %v2284_v20  ;;  %v7065_v20 = vld [vmem:[#allocation6_spill] sm:$0xff]  ;;  %v2435_v0 = vrot.slane %v5499_v54, 4  ;;  %v2631_v54 = vrot.slane %v5541_v12, 5 }
 0x49b   : > { %v2057_v35 = vpop.f32.mrf.mxu1  ;;  %4365 = vmatmul.msk.f32.gmra.mxu2 %vm1472_vm5, %v2622_v55  ;;  %v2629_v4 = vrot.slane %v7065_v20, 5 }
 0x49c   : > { %v2094_v22 = vadd.f32 %v2057_v35, %v5745_v42 }
 0x49d   : > { %v2630_v55 = vsel %vm2601_vm4, %v2627_v57, %v2629_v4  ;;  %v2632_v1 = vsel %vm2601_vm4, %v2629_v4, %v2631_v54 }
 0x49e   : > { %v2251_v36 = vpop.f32.mrf.mxu2  ;;  %4339 = vmatmul.msk.f32.gmra.mxu1 %vm1472_vm5, %v2428_v44  ;;  %4389 = vmatmul.msk.f32.gmra.mxu3 %vm1472_vm5, %v5763_v30  ;;  %v2285_v31 = vadd.f32 %v2248_v43, %v2094_v22  ;;  %v2436_v44 = vsel %vm1395_vm3, %v2433_v2, %v2435_v0 }
 0x4a1   : > { %v2358_v48 = vpop.f32.mrf.mxu3 }
 0x4a2   : > { %v6044_v39 = vadd.f32 %v2358_v48, %v2285_v31 }
 0x4a3   : > { %v2060_v17 = vpop.f32.mrf.mxu1  ;;  %4366 = vmatmul.msk.f32.gmra.mxu2 %vm1472_vm5, %v2624_v25 }
 0x4a4   : > { %v2095_v42 = vadd.f32 %v2060_v17, %v5758_v6  ;;  %v2437_v17 = vrot.slane %v7065_v20, 4 }
 0x4a6   : > { %v2254_v63 = vpop.f32.mrf.mxu2  ;;  %4340 = vmatmul.msk.f32.gmra.mxu1 %vm1472_vm5, %v2430_v56  ;;  %4390 = vmatmul.msk.f32.gmra.mxu3 %vm1472_vm5, %v5776_v37  ;;  %v2286_v30 = vadd.f32 %v2251_v36, %v2095_v42  ;;  %v2438_v42 = vsel %vm1395_vm3, %v2435_v0, %v2437_v17 }
 0x4a9   : > { %v2361_v16 = vpop.f32.mrf.mxu3 }
 0x4aa   : > { %v6055_v50 = vadd.f32 %v2361_v16, %v2286_v30  ;;  %v2633_v30 = vrot.slane %v5581_v21, 5  ;;  %v2439_v16 = vrot.slane %v5541_v12, 4  ;;  %v2441_v12 = vrot.slane %v5581_v21, 4 }
 0x4ab   : > { %v2063_v38 = vpop.f32.mrf.mxu1  ;;  %4367 = vmatmul.msk.f32.gmra.mxu2 %vm1472_vm5, %v2626_v59  ;;  %v2443_v21 = vrot.slane %v5601_v14, 4 }
 0x4ac   : > { %v2096_v6 = vadd.f32 %v2063_v38, %v5771_v49  ;;  %v2634_v47 = vsel %vm2601_vm4, %v2631_v54, %v2633_v30  ;;  %v2440_v38 = vsel %vm1395_vm3, %v2437_v17, %v2439_v16  ;;  %v7090_v17 = vld [vmem:[#allocation34_spill] sm:$0xff] }
 0x4ae   : > { %v2257_v15 = vpop.f32.mrf.mxu2  ;;  %4341 = vmatmul.msk.f32.gmra.mxu1 %vm1472_vm5, %v2432_v18  ;;  %4391 = vmatmul.msk.f32.gmra.mxu3 %vm1472_vm5, %v5789_v29  ;;  %v2287_v37 = vadd.f32 %v2254_v63, %v2096_v6  ;;  %v7073_v63 = vld [vmem:[#allocation16_spill] sm:$0xff]  ;;  %v2635_v18 = vrot.slane %v5601_v14, 5  ;;  %v2445_v14 = vrot.slane %v5613_v24, 4 }
 0x4b1   : > { %v2364_v8 = vpop.f32.mrf.mxu3 }
 0x4b2   : > { %v6066_v62 = vadd.f32 %v2364_v8, %v2287_v37  ;;  %v2636_v37 = vsel %vm2601_vm4, %v2633_v30, %v2635_v18  ;;  %v2442_v8 = vsel %vm1395_vm3, %v2439_v16, %v2441_v12  ;;  %v7093_v16 = vld [vmem:[#allocation37_spill] sm:$0xff] }
 0x4b3   : > { %v2066_v61 = vpop.f32.mrf.mxu1  ;;  %4368 = vmatmul.msk.f32.gmra.mxu2 %vm1472_vm5, %v2628_v53 }
 0x4b4   : > { %v2097_v49 = vadd.f32 %v2066_v61, %v5784_v46  ;;  %v7067_v46 = vld [vmem:[#allocation23_spill] sm:$0xff] }
 0x4b6   : > { %v2260_v43 = vpop.f32.mrf.mxu2  ;;  %4342 = vmatmul.msk.f32.gmra.mxu1 %vm1472_vm5, %v2434_v32  ;;  %4392 = vmatmul.msk.f32.gmra.mxu3 %vm1472_vm5, %v5802_v33  ;;  %v2288_v29 = vadd.f32 %v2257_v15, %v2097_v49  ;;  %v7069_v33 = vld [vmem:[#allocation7_spill] sm:$0xff]  ;;  %v2444_v32 = vsel %vm1395_vm3, %v2441_v12, %v2443_v21 }
 0x4b9   : > { %v2367_v10 = vpop.f32.mrf.mxu3 }
 0x4ba   : > { %v6077_v11 = vadd.f32 %v2367_v10, %v2288_v29  ;;  %v2446_v10 = vsel %vm1395_vm3, %v2443_v21, %v2445_v14 }
 0x4bb   : > { %v2069_v35 = vpop.f32.mrf.mxu1  ;;  %4369 = vmatmul.msk.f32.gmra.mxu2 %vm1472_vm5, %v2630_v55  ;;  %v2447_v55 = vrot.slane %v5181_v52, 4 }
 0x4bc   : > { %7066 = vst [vmem:[#allocation26_spill] sm:$0xff] %v6077_v11  ;;  %v2098_v22 = vadd.f32 %v2069_v35, %v7067_v46 }
 0x4be   : > { %v6083_v36 = vpop.f32.mrf.mxu2  ;;  %4343 = vmatmul.msk.f32.gmra.mxu1 %vm1472_vm5, %v2436_v44  ;;  %4393 = vmatmul.msk.f32.gmra.mxu3 %vm1472_vm5, %v7069_v33  ;;  %v2289_v31 = vadd.f32 %v2260_v43, %v2098_v22  ;;  %v2448_v44 = vsel %vm1395_vm3, %v2445_v14, %v2447_v55 }
 0x4bf   : > { %7068 = vst [vmem:[#allocation27_spill] sm:$0xff] %v6083_v36 }
 0x4c1   : > { %v2370_v13 = vpop.f32.mrf.mxu3 }
 0x4c2   : > { %v6089_v48 = vadd.f32 %v2370_v13, %v2289_v31  ;;  %v7088_v31 = vld [vmem:[#allocation35_spill] sm:$0xff] }
 0x4c3   : > { %v6092_v25 = vpop.f32.mrf.mxu1  ;;  %4370 = vmatmul.msk.f32.gmra.mxu2 %vm1472_vm5, %v2632_v1 }
 0x4c4   : > { %7070 = vst [vmem:[#allocation18_spill] sm:$0xff] %v6089_v48 }
 0x4c5   : > { %7071 = vst [vmem:[#allocation10_spill] sm:$0xff] %v6092_v25 }
 0x4c6   : > { %v6097_v56 = vpop.f32.mrf.mxu2  ;;  %4344 = vmatmul.msk.f32.gmra.mxu1 %vm1472_vm5, %v2438_v42  ;;  %4394 = vmatmul.msk.f32.gmra.mxu3 %vm1472_vm5, %v7073_v63  ;;  %v7092_v63 = vld [vmem:[#allocation36_spill] sm:$0xff] }
 0x4c7   : > { %7072 = vst [vmem:[#allocation28_spill] sm:$0xff] %v6097_v56 }
 0x4c9   : > { %v6103_v40 = vpop.f32.mrf.mxu3 }
 0x4ca   : > { %7074 = vst [vmem:[#allocation19_spill] sm:$0xff] %v6103_v40 }
 0x4cb   : > { %v6107_v59 = vpop.f32.mrf.mxu1  ;;  %4371 = vmatmul.msk.f32.gmra.mxu2 %vm1472_vm5, %v2634_v47 }
 0x4cc   : > { %7075 = vst [vmem:[#allocation11_spill] sm:$0xff] %v6107_v59 }
 0x4ce   : > { %v6111_v6 = vpop.f32.mrf.mxu2  ;;  %4345 = vmatmul.msk.f32.gmra.mxu1 %vm1472_vm5, %v2440_v38  ;;  %4395 = vmatmul.msk.f32.gmra.mxu3 %vm1472_vm5, %v5857_v34  ;;  %v2637_v34 = vrot.slane %v5613_v24, 5  ;;  %v7085_v24 = vld [vmem:[#allocation33_spill] sm:$0xff] }
 0x4cf   : > { %7076 = vst [vmem:[#allocation29_spill] sm:$0xff] %v6111_v6  ;;  %v7086_v35 = vrot.slane %v7085_v24, 5  ;;  %v7089_v54 = vrot.slane %v7085_v24, 4 }
 0x4d0   : > { %v2638_v61 = vsel %vm2601_vm4, %v2635_v18, %v2637_v34 }
 0x4d1   : > { %v6117_v15 = vpop.f32.mrf.mxu3  ;;  %v2450_v13 = vsel %vm1395_vm3, %v2447_v55, %v7089_v54 }
 0x4d2   : > { %7077 = vst [vmem:[#allocation20_spill] sm:$0xff] %v6117_v15 }
 0x4d3   : > { %v6121_v57 = vpop.f32.mrf.mxu1  ;;  %4372 = vmatmul.msk.f32.gmra.mxu2 %vm1472_vm5, %v2636_v37 }
 0x4d4   : > { %7078 = vst [vmem:[#allocation12_spill] sm:$0xff] %v6121_v57 }
 0x4d6   : > { %4346 = vmatmul.msk.f32.gmra.mxu1 %vm1472_vm5, %v2442_v8  ;;  %v6126_v2 = vpop.f32.mrf.mxu2  ;;  %4396 = vmatmul.msk.f32.gmra.mxu3 %vm1472_vm5, %v5889_v28  ;;  %v2639_v28 = vrot.slane %v5181_v52, 5 }
 0x4d7   : > { %7079 = vst [vmem:[#allocation31_spill] sm:$0xff] %v6126_v2 }
 0x4d8   : > { %v2640_v20 = vsel %vm2601_vm4, %v2637_v34, %v2639_v28  ;;  %v2642_v46 = vsel %vm2601_vm4, %v2639_v28, %v7086_v35 }
 0x4d9   : > { %v6131_v53 = vpop.f32.mrf.mxu3 }
 0x4da   : > { %7080 = vst [vmem:[#allocation21_spill] sm:$0xff] %v6131_v53 }
 0x4db   : > { %v6135_v49 = vpop.f32.mrf.mxu1  ;;  %4373 = vmatmul.msk.f32.gmra.mxu2 %vm1472_vm5, %v2638_v61 }
 0x4de   : > { %4347 = vmatmul.msk.f32.gmra.mxu1 %vm1472_vm5, %v2444_v32  ;;  %v6140_v43 = vpop.f32.mrf.mxu2  ;;  %4397 = vmatmul.msk.f32.gmra.mxu3 %vm1472_vm5, %v5906_v41 }
 0x4df   : > { %7081 = vst [vmem:[#allocation13_spill] sm:$0xff] %v6140_v43 }
 0x4e1   : > { %v6145_v29 = vpop.f32.mrf.mxu3 }
 0x4e2   : > { %7082 = vst [vmem:[#allocation30_spill] sm:$0xff] %v6145_v29 }
 0x4e3   : > { %v6149_v4 = vpop.f32.mrf.mxu1  ;;  %4374 = vmatmul.msk.f32.gmra.mxu2 %vm1472_vm5, %v2640_v20 }
 0x4e6   : > { %4348 = vmatmul.msk.f32.gmra.mxu1 %vm1472_vm5, %v2446_v10  ;;  %v6154_v0 = vpop.f32.mrf.mxu2  ;;  %4398 = vmatmul.msk.f32.gmra.mxu3 %vm1472_vm5, %v5920_v3 }
 0x4e7   : > { %7083 = vst [vmem:[#allocation32_spill] sm:$0xff] %v6154_v0 }
 0x4e9   : > { %v6158_v41 = vpop.f32.mrf.mxu3 }
 0x4ea   : > { %7084 = vst [vmem:[#allocation22_spill] sm:$0xff] %v6158_v41 }
 0x4eb   : > { %v6164_v22 = vpop.f32.mrf.mxu1  ;;  %4375 = vmatmul.msk.f32.gmra.mxu2 %vm1472_vm5, %v2642_v46 }
 0x4ee   : > { %4349 = vmatmul.msk.f32.gmra.mxu1 %vm1472_vm5, %v2448_v44  ;;  %v6169_v33 = vpop.f32.mrf.mxu2  ;;  %4399 = vmatmul.msk.f32.gmra.mxu3 %vm1472_vm5, %v5936_v23 }
 0x4f1   : > { %v6173_v3 = vpop.f32.mrf.mxu3 }
 0x4f2   : > { %7087 = vst [vmem:[#allocation14_spill] sm:$0xff] %v6173_v3 }
 0x4f3   : > { %v6175_v52 = vpop.f32.mrf.mxu1  ;;  %4376 = vmatmul.msk.f32.gmra.mxu2 %vm1472_vm5, %v7088_v31 }
 0x4f6   : > { %4350 = vmatmul.msk.f32.gmra.mxu1 %vm1472_vm5, %v2450_v13  ;;  %v6183_v1 = vpop.f32.mrf.mxu2  ;;  %4400 = vmatmul.msk.f32.gmra.mxu3 %vm1472_vm5, %v7090_v17 }
 0x4f9   : > { %v6187_v42 = vpop.f32.mrf.mxu3 }
 0x4fa   : > { %7091 = vst [vmem:[#allocation6_spill] sm:$0xff] %v6187_v42 }
 0x4fb   : > { %v6189_v23 = vpop.f32.mrf.mxu1 }
 0x4fe   : > { %4351 = vmatmul.msk.f32.gmra.mxu1 %vm1472_vm5, %v7092_v63  ;;  %v6193_v30 = vpop.f32.mrf.mxu2  ;;  %4401 = vmatmul.msk.f32.gmra.mxu3 %vm1472_vm5, %v7093_v16 }
 0x501   : > { %v6197_v47 = vpop.f32.mrf.mxu3 }
 0x503   : > { %v6199_v38 = vpop.f32.mrf.mxu1 }
 0x506   : > { %v6201_v18 = vpop.f32.mrf.mxu2 }
 0x509   : > { %v6203_v12 = vpop.f32.mrf.mxu3 }
 0x50b   : > { %v2530_v37 = vpop.f32.mrf.mxu1 }
 0x50e   : > { %v6205_v8 = vpop.f32.mrf.mxu2 }
 0x511   : > { %v6207_v34 = vpop.f32.mrf.mxu3 }
 0x513   : > { %v2533_v21 = vpop.f32.mrf.mxu1 }
 0x516   : > { %v2728_v61 = vpop.f32.mrf.mxu2 }
 0x519   : > { %v6209_v32 = vpop.f32.mrf.mxu3 }
 0x51b   : > { %v2536_v28 = vpop.f32.mrf.mxu1 }
 0x51e   : > { %v2731_v14 = vpop.f32.mrf.mxu2 }
 0x521   : > { %v6211_v20 = vpop.f32.mrf.mxu3 }
 0x523   : > { %v2539_v10 = vpop.f32.mrf.mxu1 }
 0x526   : > { %v2734_v55 = vpop.f32.mrf.mxu2 }
 0x529   : > { %v2845_v24 = vpop.f32.mrf.mxu3 }
 0x52b   : > { %v2542_v35 = vpop.f32.mrf.mxu1 }
 0x52e   : > { %v2737_v46 = vpop.f32.mrf.mxu2 }
 0x531   : > { %v2848_v44 = vpop.f32.mrf.mxu3 }
 0x533   : > { %v2545_v31 = vpop.f32.mrf.mxu1 }
 0x534   : > { %v2586_v59 = vadd.f32 %v2545_v31, %v6022_v19 }
 0x536   : > { %v2740_v54 = vpop.f32.mrf.mxu2 }
 0x539   : > { %v2851_v13 = vpop.f32.mrf.mxu3 }
 0x53b   : > { %v2548_v17 = vpop.f32.mrf.mxu1 }
 0x53c   : > { %v2587_v25 = vadd.f32 %v2548_v17, %v6033_v51  ;;  %v2584_v51 = vadd.f32 %v2539_v10, %v6000_v27 }
 0x53e   : > { %v2743_v63 = vpop.f32.mrf.mxu2 }
 0x541   : > { %v2854_v16 = vpop.f32.mrf.mxu3 }
 0x543   : > { %v2551_v11 = vpop.f32.mrf.mxu1 }
 0x544   : > { %v2588_v29 = vadd.f32 %v2551_v11, %v6044_v39  ;;  %v2585_v39 = vadd.f32 %v2542_v35, %v6011_v9  ;;  %v2779_v11 = vadd.f32 %v2740_v54, %v2587_v25  ;;  %v2582_v25 = vadd.f32 %v2533_v21, %v5978_v26 }
 0x546   : > { %v2746_v48 = vpop.f32.mrf.mxu2  ;;  %v2780_v3 = vadd.f32 %v2743_v63, %v2588_v29  ;;  %v2893_v19 = vadd.f32 %v2854_v16, %v2779_v11 }
 0x549   : > { %v2857_v53 = vpop.f32.mrf.mxu3 }
 0x54b   : > { %v2554_v40 = vpop.f32.mrf.mxu1 }
 0x54c   : > { %v2589_v36 = vadd.f32 %v2554_v40, %v6055_v50  ;;  %v6223_v50 = vld [vmem:[%s7094_s4] ss:$0 sm:$0xff]  ;;  %s4591_s4 = scalar_lea.hbm %s4590_s27, 1 }
 0x54d   : > { %p4592_p11 = scmp.ne.s32.totalorder %s4590_s27, %s4591_s4  ;;  %p4597_p1 = scmp.lt.s32.totalorder %s4595_s30, %s4591_s4 }
 0x54e   : > { %v2749_v6 = vpop.f32.mrf.mxu2  ;;  %v2781_v41 = vadd.f32 %v2746_v48, %v2589_v36  ;;  %v2778_v48 = vadd.f32 %v2737_v46, %v2586_v59 }
 0x54f   : > { %p4593_p12 = pnand %p4592_p11, %p4757_p5  ;;  %p4598_p2 = por %p4597_p1, %p4596_p0 }
 0x550   : > { %v2892_v29 = vadd.f32 %v2851_v13, %v2778_v48 }
 0x551   : > { %v2860_v15 = vpop.f32.mrf.mxu3  ;;  %p4594_p13 = pneg %p4593_p12 }
 0x552   : > { %v2895_v43 = vadd.f32 %v2860_v15, %v2781_v41  ;;  %v2583_v15 = vadd.f32 %v2536_v28, %v5989_v60  ;;  %v2581_v60 = vadd.f32 %v2530_v37, %v5967_v7  ;;  %v2917_v26 = vadd.f32 %v6223_v50, %v2892_v29  ;;  %v7103_v29 = vld [vmem:[#allocation11_spill] sm:$0xff] }
 0x553   : > { %v2557_v56 = vpop.f32.mrf.mxu1  ;;  %v2774_v7 = vadd.f32 %v6205_v8, %v2582_v25  ;;  %p4599_p3 = pnand %p4598_p2, %p4594_p13 }
 0x554   : > { %v2590_v57 = vadd.f32 %v2557_v56, %v6066_v62  ;;  %v2894_v62 = vadd.f32 %v2857_v53, %v2780_v3  ;;  %v2920_v40 = vadd.f32 %v6223_v50, %v2895_v43  ;;  %v2776_v53 = vadd.f32 %v2731_v14, %v2584_v51 }
 0x555   : > { %v2580_v14 = vadd.f32 %v6199_v38, %v5956_v45  ;;  %v2773_v35 = vadd.f32 %v6201_v18, %v2581_v60  ;;  %v2888_v45 = vadd.f32 %v6209_v32, %v2774_v7  ;;  %v6267_v8 = vmax.f32 %v2917_v26, 0.0  ;;  %v7095_v18 = vld [vmem:[#allocation9_spill] sm:$0xff]  ;;  %v7106_v26 = vld [vmem:[#allocation15_spill] sm:$0xff] }
 0x556   : > { %v6217_v2 = vpop.f32.mrf.mxu2  ;;  %v2782_v42 = vadd.f32 %v2749_v6, %v2590_v57  ;;  %v2777_v57 = vadd.f32 %v2734_v55, %v2585_v39  ;;  %v2919_v41 = vadd.f32 %v6223_v50, %v2894_v62  ;;  %v6237_v59 = vmax.f32 %v2920_v40, 0.0  ;;  %v7097_v39 = vld [vmem:[#allocation25_spill] sm:$0xff]  ;;  %v7098_v62 = vld [vmem:[#allocation32_spill] sm:$0xff]  ;;  %v7101_v40 = vld [vmem:[#allocation14_spill] sm:$0xff] }
 0x557   : > { %v2890_v28 = vadd.f32 %v2845_v24, %v2776_v53  ;;  %v2579_v24 = vadd.f32 %v6189_v23, %v5944_v5  ;;  %v2772_v46 = vadd.f32 %v6193_v30, %v2580_v14  ;;  %v2577_v32 = vadd.f32 %v6164_v22, %v7095_v18  ;;  %v7104_v53 = vld [vmem:[#allocation31_spill] sm:$0xff]  ;;  %v7107_v14 = vld [vmem:[#allocation10_spill] sm:$0xff] }
 0x558   : > { %v2891_v27 = vadd.f32 %v2848_v44, %v2777_v57  ;;  %v6247_v21 = vmax.f32 %v2919_v41, 0.0  ;;  %v2887_v44 = vadd.f32 %v6207_v34, %v2773_v35  ;;  %v7096_v34 = vld [vmem:[#allocation17_spill] sm:$0xff]  ;;  %v2575_v11 = vadd.f32 %v6135_v49, %v7097_v39  ;;  %v7102_v49 = vld [vmem:[#allocation24_spill] sm:$0xff] }
 0x559   : > { %v2863_v0 = vpop.f32.mrf.mxu3  ;;  %v2915_v38 = vadd.f32 %v6223_v50, %v2890_v28  ;;  %v2771_v54 = vadd.f32 %v6183_v1, %v2579_v24  ;;  %v2576_v13 = vadd.f32 %v6149_v4, %v7096_v34  ;;  %v2769_v4 = vadd.f32 %v7098_v62, %v2577_v32  ;;  %v7109_v24 = vld [vmem:[#allocation12_spill] sm:$0xff]  ;;  %v7115_v62 = vld [vmem:[#allocation19_spill] sm:$0xff] }
 0x55a   : > { %v2896_v56 = vadd.f32 %v2863_v0, %v2782_v42  ;;  %v2918_v0 = vadd.f32 %v6223_v50, %v2893_v19  ;;  %v2775_v42 = vadd.f32 %v2728_v61, %v2583_v15  ;;  %v2916_v61 = vadd.f32 %v6223_v50, %v2891_v27  ;;  %v7113_v34 = vld [vmem:[#allocation20_spill] sm:$0xff] }
 0x55b   : > { %v6227_v36 = vpop.f32.mrf.mxu1  ;;  %v6287_v30 = vmax.f32 %v2915_v38, 0.0  ;;  %v2885_v1 = vadd.f32 %v6197_v47, %v2771_v54  ;;  %v7100_v47 = vld [vmem:[#allocation13_spill] sm:$0xff]  ;;  %v2100_v41 = vadd.f32 %v7103_v29, %v7102_v49  ;;  %v2767_v27 = vadd.f32 %v7104_v53, %v2575_v11  ;;  %v4407_v29 = vld [vmem:[%s6965_s7 + $0x50] sm:$0xff] }
 0x55c   : > { %v2921_v6 = vadd.f32 %v6223_v50, %v2896_v56  ;;  %v2889_v37 = vadd.f32 %v6211_v20, %v2775_v42  ;;  %v6258_v55 = vmax.f32 %v2918_v0, 0.0  ;;  %v2578_v20 = vadd.f32 %v6175_v52, %v5928_v58  ;;  %v7099_v56 = vld [vmem:[#allocation6_spill] sm:$0xff] }
 0x55d   : > { %v6276_v23 = vmax.f32 %v2916_v61, 0.0  ;;  %v2886_v58 = vadd.f32 %v6203_v12, %v2772_v46  ;;  %v2913_v52 = vadd.f32 %v6223_v50, %v2888_v45  ;;  %v2912_v12 = vadd.f32 %v6223_v50, %v2887_v44  ;;  %v7105_v0 = vld [vmem:[#allocation22_spill] sm:$0xff]  ;;  %v7108_v61 = vld [vmem:[#allocation8_spill] sm:$0xff] }
 0x55e   : > { %v6233_v9 = vmax.f32 %v2921_v6, 0.0  ;;  %v6242_v43 = vpop.f32.mrf.mxu2  ;;  %v2914_v5 = vadd.f32 %v6223_v50, %v2889_v37  ;;  %v2770_v63 = vadd.f32 %v6169_v33, %v2578_v20  ;;  %v2768_v19 = vadd.f32 %v7100_v47, %v2576_v13  ;;  %v7110_v45 = vld [vmem:[#allocation30_spill] sm:$0xff] }
 0x55f   : > { %v2911_v48 = vadd.f32 %v6223_v50, %v2886_v58  ;;  %v6307_v33 = vmax.f32 %v2913_v52, 0.0  ;;  %v2883_v6 = vadd.f32 %v7101_v40, %v2769_v4  ;;  %v2910_v15 = vadd.f32 %v6223_v50, %v2885_v1  ;;  %v7112_v58 = vld [vmem:[#allocation27_spill] sm:$0xff]  ;;  %v2948_v49 = vld [vmem:[%s6965_s7] sm:$0xff] }
 0x560   : > { %2974 = vmatpush.msra.mxu1 %v6233_v9  ;;  %3064 = vmatpush.msra.mxu3 %v6233_v9  ;;  %v6298_v16 = vmax.f32 %v2914_v5, 0.0  ;;  %v2884_v51 = vadd.f32 %v7099_v56, %v2770_v63  ;;  %v6314_v57 = vmax.f32 %v2912_v12, 0.0  ;;  %v2882_v60 = vadd.f32 %v7105_v0, %v2768_v19  ;;  %v7111_v5 = vld [vmem:[#allocation28_spill] sm:$0xff]  ;;  %v7114_v63 = vld [vmem:[#allocation29_spill] sm:$0xff]  ;;  %v7118_v0 = vld [vmem:[#allocation26_spill] sm:$0xff] }
 0x561   : > { %v6244_v3 = vpop.f32.mrf.mxu3  ;;  %v6323_v28 = vmax.f32 %v2911_v48, 0.0  ;;  %v2099_v7 = vadd.f32 %v7107_v14, %v7106_v26  ;;  %v2101_v35 = vadd.f32 %v7109_v24, %v7108_v61  ;;  %v2881_v38 = vadd.f32 %v7110_v45, %v2767_v27  ;;  %v7116_v56 = vld [vmem:[#allocation21_spill] sm:$0xff] }
 0x562   : > { %2975 = vmatpush.msra.mxu1 %v6237_v59  ;;  %3065 = vmatpush.msra.mxu3 %v6237_v59  ;;  %v2909_v42 = vadd.f32 %v6223_v50, %v2884_v51  ;;  %v2908_v20 = vadd.f32 %v6223_v50, %v2883_v6  ;;  %v6333_v46 = vmax.f32 %v2910_v15, 0.0  ;;  %v2291_v18 = vadd.f32 %v7111_v5, %v2100_v41  ;;  %v7117_v41 = vld [vmem:[#allocation18_spill] sm:$0xff] }
 0x563   : > { %v6253_v10 = vpop.f32.mrf.mxu1  ;;  %v2907_v32 = vadd.f32 %v6223_v50, %v2882_v60  ;;  %v2290_v52 = vadd.f32 %v7112_v58, %v2099_v7  ;;  %v2292_v1 = vadd.f32 %v7114_v63, %v2101_v35  ;;  %v2906_v12 = vadd.f32 %v6223_v50, %v2881_v38  ;;  %v4411_v58 = vld [vmem:[%s6965_s7 + $0x70] sm:$0xff] }
 0x564   : > { %2976 = vmatpush.msra.mxu1 %v6247_v21  ;;  %3066 = vmatpush.msra.mxu3 %v6247_v21  ;;  %v6339_v54 = vmax.f32 %v2909_v42, 0.0  ;;  %v2401_v13 = vadd.f32 %v7113_v34, %v2291_v18  ;;  %v6347_v39 = vmax.f32 %v2908_v20, 0.0  ;;  %v2592_v53 = vadd.f32 %v6253_v10, %v7117_v41  ;;  %v2952_v18 = vld [vmem:[%s6965_s7 + $0x20] sm:$0xff]  ;;  %v2951_v34 = vld [vmem:[%s6965_s7 + $0x18] sm:$0xff]  ;;  %v4424_v63 = vld [vmem:[%s6965_s7 + $0xb0] sm:$0xff] }
 0x565   : > { %v2400_v4 = vadd.f32 %v7115_v62, %v2290_v52  ;;  %v2402_v51 = vadd.f32 %v7116_v56, %v2292_v1  ;;  %v6353_v48 = vmax.f32 %v2907_v32, 0.0  ;;  %v6357_v40 = vmax.f32 %v2906_v12, 0.0  ;;  %v2949_v32 = vld [vmem:[%s6965_s7 + $0x8] sm:$0xff]  ;;  %v2954_v52 = vld [vmem:[%s6965_s7 + $0x30] sm:$0xff]  ;;  %v4429_v1 = vld [vmem:[%s6965_s7 + $0xd8] sm:$0xff] }
 0x566   : > { %2977 = vmatpush.msra.mxu1 %v6258_v55  ;;  %3067 = vmatpush.msra.mxu3 %v6258_v55  ;;  %v6293_v17 = vpop.f32.mrf.mxu2  ;;  %v2591_v60 = vadd.f32 %v6227_v36, %v7118_v0  ;;  %v2950_v36 = vld [vmem:[%s6965_s7 + $0x10] sm:$0xff]  ;;  %v4416_v12 = vld [vmem:[%s6965_s7 + $0x98] sm:$0xf]  ;;  %v4439_v56 = vld [vmem:[%s6965_s7 + $0x100] sm:$0xff] }
 0x567   : > { %v4437_v62 = vld [vmem:[%s6965_s7 + $0xf0] sm:$0xff]  ;;  %v4446_v41 = vld [vmem:[%s6965_s7 + $0x138] sm:$0xf] }
 0x568   : > { %2978 = vmatpush.msra.mxu1 %v6267_v8  ;;  %3068 = vmatpush.msra.mxu3 %v6267_v8  ;;  %v2783_v24 = vadd.f32 %v6217_v2, %v2591_v60 }
 0x569   : > { %v6282_v31 = vpop.f32.mrf.mxu3 }
 0x56a   : > { %2979 = vmatpush.msra.mxu1 %v6276_v23  ;;  %3069 = vmatpush.msra.mxu3 %v6276_v23 }
 0x56b   : > { %v2566_v22 = vpop.f32.mrf.mxu1 }
 0x56c   : > { %2980 = vmatpush.msra.mxu1 %v6287_v30  ;;  %3070 = vmatpush.msra.mxu3 %v6287_v30  ;;  %v2593_v6 = vadd.f32 %v2566_v22, %v2400_v4  ;;  %v4428_v4 = vld [vmem:[%s6965_s7 + $0xd0] sm:$0xff] }
 0x56e   : > { %2981 = vmatpush.msra.mxu1 %v6298_v16  ;;  %3071 = vmatpush.msra.mxu3 %v6298_v16  ;;  %v2761_v44 = vpop.f32.mrf.mxu2  ;;  %v2785_v42 = vadd.f32 %v6293_v17, %v2593_v6  ;;  %v4409_v17 = vld [vmem:[%s6965_s7 + $0x60] sm:$0xff]  ;;  %v4445_v6 = vld [vmem:[%s6965_s7 + $0x130] sm:$0xf] }
 0x570   : > { %2982 = vmatpush.msra.mxu1 %v6307_v33  ;;  %3072 = vmatpush.msra.mxu3 %v6307_v33 }
 0x571   : > { %v2872_v25 = vpop.f32.mrf.mxu3 }
 0x572   : > { %2983 = vmatpush.msra.mxu1 %v6314_v57  ;;  %3073 = vmatpush.msra.mxu3 %v6314_v57  ;;  %v2899_v61 = vadd.f32 %v2872_v25, %v2785_v42 }
 0x573   : > { %v2569_v37 = vpop.f32.mrf.mxu1 }
 0x574   : > { %2984 = vmatpush.msra.mxu1 %v6323_v28  ;;  %3074 = vmatpush.msra.mxu3 %v6323_v28  ;;  %v2594_v47 = vadd.f32 %v2569_v37, %v2401_v13  ;;  %v2784_v37 = vadd.f32 %v6242_v43, %v2592_v53  ;;  %v2897_v43 = vadd.f32 %v6244_v3, %v2783_v24  ;;  %v4414_v13 = vld [vmem:[%s6965_s7 + $0x88] sm:$0xff] }
 0x575   : > { %v2924_v25 = vadd.f32 %v6223_v50, %v2899_v61 }
 0x576   : > { %2985 = vmatpush.msra.mxu1 %v6333_v46  ;;  %3075 = vmatpush.msra.mxu3 %v6333_v46  ;;  %v2786_v27 = vadd.f32 %v2761_v44, %v2594_v47  ;;  %v2764_v22 = vpop.f32.mrf.mxu2  ;;  %v2898_v35 = vadd.f32 %v6282_v31, %v2784_v37  ;;  %v2922_v44 = vadd.f32 %v6223_v50, %v2897_v43  ;;  %v4438_v47 = vld [vmem:[%s6965_s7 + $0xf8] sm:$0xff] }
 0x577   : > { %v6396_v5 = vmax.f32 %v2924_v25, 0.0 }
 0x578   : > { %2986 = vmatpush.msra.mxu1 %v6339_v54  ;;  %3076 = vmatpush.msra.mxu3 %v6339_v54  ;;  %v2923_v2 = vadd.f32 %v6223_v50, %v2898_v35 }
 0x579   : > { %v2875_v11 = vpop.f32.mrf.mxu3 }
 0x57a   : > { %2987 = vmatpush.msra.mxu1 %v6347_v39  ;;  %3077 = vmatpush.msra.mxu3 %v6347_v39  ;;  %v2900_v26 = vadd.f32 %v2875_v11, %v2786_v27  ;;  %v6401_v3 = vmax.f32 %v2923_v2, 0.0  ;;  %v4431_v11 = vld [vmem:[%s6965_s7 + $0xe8] sm:$0xf] }
 0x57b   : > { %v2572_v19 = vpop.f32.mrf.mxu1 }
 0x57c   : > { %v2595_v15 = vadd.f32 %v2572_v19, %v2402_v51  ;;  %2988 = vmatpush.msra.mxu1 %v6353_v48  ;;  %3078 = vmatpush.msra.mxu3 %v6353_v48  ;;  %v2925_v45 = vadd.f32 %v6223_v50, %v2900_v26  ;;  %v4430_v51 = vld [vmem:[%s6965_s7 + $0xe0] sm:$0xf] }
 0x57d   : > { %v4443_v19 = vld [vmem:[%s6965_s7 + $0x120] sm:$0xff] }
 0x57e   : > { %2989 = vmatpush.msra.mxu1 %v6357_v40  ;;  %3079 = vmatpush.msra.mxu3 %v6357_v40  ;;  %v2787_v14 = vadd.f32 %v2764_v22, %v2595_v15  ;;  %v6390_v31 = vmax.f32 %v2925_v45, 0.0  ;;  %v4442_v15 = vld [vmem:[%s6965_s7 + $0x118] sm:$0xff] }
 0x57f   : > { %2990 = vmatmul.f32.vlgmr.msra.gmra.mxu1 %v2948_v49  ;;  %3080 = vmatmul.f32.vlgmr.msra.gmra.mxu3 %v4407_v29  ;;  %v4444_v49 = vld [vmem:[%s6965_s7 + $0x128] sm:$0xff] }
 0x581   : > { %v2878_v7 = vpop.f32.mrf.mxu3 }
 0x582   : > { %v2901_v10 = vadd.f32 %v2878_v7, %v2787_v14 }
 0x584   : > { %v2926_v38 = vadd.f32 %v6223_v50, %v2901_v10  ;;  %v6409_v50 = vmax.f32 %v2922_v44, 0.0 }
 0x586   : > { %v6387_v20 = vmax.f32 %v2926_v38, 0.0 }
 0x587   : > { %2993 = vmatmul.f32.gmra.mxu1 %v2950_v36  ;;  %3083 = vmatmul.f32.gmra.mxu3 %v4409_v17 }
 0x588   : > { %3017 = vmatpush.msra.mxu2 %v6387_v20  ;;  %3107 = vmatpush.msrb.mxu1 %v6387_v20 }
 0x589   : > { %3202 = vmatpush.msrb.mxu3 %v6387_v20 }
 0x58a   : > { %3018 = vmatpush.msra.mxu2 %v6390_v31  ;;  %3108 = vmatpush.msrb.mxu1 %v6390_v31 }
 0x58b   : > { %3203 = vmatpush.msrb.mxu3 %v6390_v31 }
 0x58c   : > { %3019 = vmatpush.msra.mxu2 %v6396_v5  ;;  %3109 = vmatpush.msrb.mxu1 %v6396_v5 }
 0x58d   : > { %3204 = vmatpush.msrb.mxu3 %v6396_v5 }
 0x58e   : > { %3020 = vmatpush.msra.mxu2 %v6401_v3  ;;  %3110 = vmatpush.msrb.mxu1 %v6401_v3 }
 0x58f   : > { %3205 = vmatpush.msrb.mxu3 %v6401_v3  ;;  %2996 = vmatmul.f32.gmra.mxu1 %v2952_v18  ;;  %v4472_v18 = vld [vmem:[%s6963_s5 + $0x78] sm:$0xff] }
 0x590   : > { %3021 = vmatpush.msra.mxu2 %v6409_v50  ;;  %3111 = vmatpush.msrb.mxu1 %v6409_v50 }
 0x591   : > { %3206 = vmatpush.msrb.mxu3 %v6409_v50  ;;  %4402 = vmatmul.msk.f32.vlgmr.msra.gmra.mxu2 %vm2958_vm8, %v2949_v32  ;;  %v4453_v32 = vld [vmem:[%s6963_s5 + $0x28] sm:$0xff] }
 0x592   : > { %3159 = vmatpush.msrb.mxu2 %v6233_v9  ;;  %3254 = vmatpush.msra.mxu1 %v6233_v9  ;;  %v4413_v9 = vld [vmem:[%s6965_s7 + $0x80] sm:$0xff] }
 0x593   : > { %3086 = vmatmul.f32.gmra.mxu3 %v4411_v58  ;;  %v4464_v58 = vld [vmem:[%s6963_s5 + $0x50] sm:$0xff] }
 0x594   : > { %3160 = vmatpush.msrb.mxu2 %v6237_v59  ;;  %3255 = vmatpush.msra.mxu1 %v6237_v59  ;;  %v2956_v59 = vld [vmem:[%s6965_s7 + $0x40] sm:$0xf] }
 0x596   : > { %3161 = vmatpush.msrb.mxu2 %v6247_v21  ;;  %3256 = vmatpush.msra.mxu1 %v6247_v21  ;;  %v2953_v21 = vld [vmem:[%s6965_s7 + $0x28] sm:$0xff] }
 0x597   : > { %2999 = vmatmul.f32.gmra.mxu1 %v2954_v52  ;;  %v4471_v52 = vld [vmem:[%s6963_s5 + $0x70] sm:$0xff] }
 0x598   : > { %3162 = vmatpush.msrb.mxu2 %v6258_v55  ;;  %3257 = vmatpush.msra.mxu1 %v6258_v55  ;;  %v4415_v55 = vld [vmem:[%s6965_s7 + $0x90] sm:$0xf] }
 0x599   : > { %4403 = vmatmul.msk.f32.gmra.mxu2 %vm2958_vm8, %v2951_v34 }
 0x59a   : > { %3163 = vmatpush.msrb.mxu2 %v6267_v8  ;;  %3258 = vmatpush.msra.mxu1 %v6267_v8  ;;  %v4408_v8 = vld [vmem:[%s6965_s7 + $0x58] sm:$0xff] }
 0x59b   : > { %3089 = vmatmul.f32.gmra.mxu3 %v4413_v9  ;;  %v4452_v9 = vld [vmem:[%s6963_s5 + $0x20] sm:$0xff] }
 0x59c   : > { %3164 = vmatpush.msrb.mxu2 %v6276_v23  ;;  %3259 = vmatpush.msra.mxu1 %v6276_v23  ;;  %v2955_v23 = vld [vmem:[%s6965_s7 + $0x38] sm:$0xff] }
 0x59e   : > { %3165 = vmatpush.msrb.mxu2 %v6287_v30  ;;  %3260 = vmatpush.msra.mxu1 %v6287_v30  ;;  %v4423_v30 = vld [vmem:[%s6965_s7 + $0xa8] sm:$0xff] }
 0x59f   : > { %3002 = vmatmul.f32.gmra.mxu1 %v2956_v59  ;;  %v4463_v59 = vld [vmem:[%s6963_s5 + $0x48] sm:$0xff] }
 0x5a0   : > { %3166 = vmatpush.msrb.mxu2 %v6298_v16  ;;  %3261 = vmatpush.msra.mxu1 %v6298_v16  ;;  %v4410_v16 = vld [vmem:[%s6965_s7 + $0x68] sm:$0xff] }
 0x5a1   : > { %4404 = vmatmul.msk.f32.gmra.mxu2 %vm2958_vm8, %v2953_v21  ;;  %v4470_v21 = vld [vmem:[%s6963_s5 + $0x68] sm:$0xff] }
 0x5a2   : > { %3167 = vmatpush.msrb.mxu2 %v6307_v33  ;;  %3262 = vmatpush.msra.mxu1 %v6307_v33  ;;  %v2957_v33 = vld [vmem:[%s6965_s7 + $0x48] sm:$0xf] }
 0x5a3   : > { %3092 = vmatmul.f32.gmra.mxu3 %v4415_v55 }
 0x5a4   : > { %3168 = vmatpush.msrb.mxu2 %v6314_v57  ;;  %3263 = vmatpush.msra.mxu1 %v6314_v57  ;;  %v4425_v57 = vld [vmem:[%s6965_s7 + $0xb8] sm:$0xff] }
 0x5a6   : > { %3169 = vmatpush.msrb.mxu2 %v6323_v28  ;;  %3264 = vmatpush.msra.mxu1 %v6323_v28  ;;  %v4412_v28 = vld [vmem:[%s6965_s7 + $0x78] sm:$0xff] }
 0x5a7   : > { %4417 = vmatmul.msk.f32.vlgmr.msrb.gmra.mxu1 %vm2958_vm8, %v4408_v8  ;;  %v4462_v8 = vld [vmem:[%s6963_s5 + $0x40] sm:$0xff] }
 0x5a8   : > { %3170 = vmatpush.msrb.mxu2 %v6333_v46  ;;  %3265 = vmatpush.msra.mxu1 %v6333_v46  ;;  %v4422_v46 = vld [vmem:[%s6965_s7 + $0xa0] sm:$0xff] }
 0x5a9   : > { %4405 = vmatmul.msk.f32.gmra.mxu2 %vm2958_vm8, %v2955_v23  ;;  %v4469_v23 = vld [vmem:[%s6963_s5 + $0x60] sm:$0xff] }
 0x5aa   : > { %3171 = vmatpush.msrb.mxu2 %v6339_v54  ;;  %3266 = vmatpush.msra.mxu1 %v6339_v54  ;;  %v4427_v54 = vld [vmem:[%s6965_s7 + $0xc8] sm:$0xff] }
 0x5ab   : > { %4432 = vmatmul.msk.f32.vlgmr.msrb.gmra.mxu3 %vm2958_vm8, %v4423_v30 }
 0x5ac   : > { %3172 = vmatpush.msrb.mxu2 %v6347_v39  ;;  %3267 = vmatpush.msra.mxu1 %v6347_v39  ;;  %v4426_v39 = vld [vmem:[%s6965_s7 + $0xc0] sm:$0xff] }
 0x5ae   : > { %3173 = vmatpush.msrb.mxu2 %v6353_v48  ;;  %3268 = vmatpush.msra.mxu1 %v6353_v48  ;;  %v4441_v48 = vld [vmem:[%s6965_s7 + $0x110] sm:$0xff] }
 0x5af   : > { %4418 = vmatmul.msk.f32.gmra.mxu1 %vm2958_vm8, %v4410_v16 }
 0x5b0   : > { %3174 = vmatpush.msrb.mxu2 %v6357_v40  ;;  %3269 = vmatpush.msra.mxu1 %v6357_v40  ;;  %v4440_v40 = vld [vmem:[%s6965_s7 + $0x108] sm:$0xff] }
 0x5b1   : > { %4406 = vmatmul.msk.f32.gmra.mxu2 %vm2958_vm8, %v2957_v33 }
 0x5b2   : > { %3297 = vmatpush.msra.mxu2 %v6387_v20 }
 0x5b3   : > { %4433 = vmatmul.msk.f32.gmra.mxu3 %vm2958_vm8, %v4425_v57 }
 0x5b4   : > { %3298 = vmatpush.msra.mxu2 %v6390_v31 }
 0x5b6   : > { %3299 = vmatpush.msra.mxu2 %v6396_v5  ;;  %v4455_v5 = vld [vmem:[%s6963_s5 + $0x38] sm:$0xff] }
 0x5b7   : > { %4419 = vmatmul.msk.f32.gmra.mxu1 %vm2958_vm8, %v4412_v28  ;;  %3362 = vmatpush.msra.mxu3 %v4455_v5 }
 0x5b8   : > { %3300 = vmatpush.msra.mxu2 %v6401_v3  ;;  %v4465_v3 = vld [vmem:[%s6963_s5 + $0x58] sm:$0xff] }
 0x5b9   : > { %3175 = vmatmul.f32.vlgmr.msrb.gmra.mxu2 %v4422_v46  ;;  %3438 = vmatpush.msrb.mxu1 %v4465_v3 }
 0x5ba   : > { %3301 = vmatpush.msra.mxu2 %v6409_v50  ;;  %v4454_v50 = vld [vmem:[%s6963_s5 + $0x30] sm:$0xff] }
 0x5bb   : > { %4434 = vmatmul.msk.f32.gmra.mxu3 %vm2958_vm8, %v4427_v54  ;;  %3439 = vmatpush.msrb.mxu1 %v4464_v58 }
 0x5bc   : > { %3485 = vmatpush.msrb.mxu2 %v4472_v18  ;;  %3363 = vmatpush.msra.mxu3 %v4454_v50 }
 0x5bd   : > { %3440 = vmatpush.msrb.mxu1 %v4463_v59 }
 0x5be   : > { %3486 = vmatpush.msrb.mxu2 %v4471_v52  ;;  %3364 = vmatpush.msra.mxu3 %v4453_v32 }
 0x5bf   : > { %4420 = vmatmul.msk.f32.gmra.mxu1 %vm2958_vm8, %v4414_v13  ;;  %v3327_v13 = vld [vmem:[%s6963_s5 + $0x18] sm:$0xff] }
 0x5c0   : > { %3487 = vmatpush.msrb.mxu2 %v4470_v21  ;;  %3365 = vmatpush.msra.mxu3 %v4452_v9 }
 0x5c1   : > { %3178 = vmatmul.f32.gmra.mxu2 %v4424_v63  ;;  %3441 = vmatpush.msrb.mxu1 %v4462_v8  ;;  %v3326_v63 = vld [vmem:[%s6963_s5 + $0x10] sm:$0xff] }
 0x5c2   : > { %3488 = vmatpush.msrb.mxu2 %v4469_v23  ;;  %3394 = vmatpush.msrb.mxu3 %v3327_v13  ;;  %v4479_v13 = vld [vmem:[%s6963_s5 + $0x98] sm:$0xff] }
 0x5c3   : > { %4435 = vmatmul.msk.f32.gmra.mxu3 %vm2958_vm8, %v4429_v1 }
 0x5c4   : > { %3395 = vmatpush.msrb.mxu3 %v3326_v63 }
 0x5c7   : > { %4421 = vmatmul.msk.f32.gmra.mxu1 %vm2958_vm8, %v4416_v12 }
 0x5c9   : > { %3181 = vmatmul.f32.gmra.mxu2 %v4426_v39  ;;  %v3325_v39 = vld [vmem:[%s6963_s5 + $0x8] sm:$0xff] }
 0x5ca   : > { %3396 = vmatpush.msrb.mxu3 %v3325_v39  ;;  %v4507_v39 = vld [vmem:[%s6963_s5 + $0x118] sm:$0xff] }
 0x5cb   : > { %4436 = vmatmul.msk.f32.gmra.mxu3 %vm2958_vm8, %v4431_v11  ;;  %v4486_v11 = vld [vmem:[%s6963_s5 + $0xb8] sm:$0xff] }
 0x5cf   : > { %3270 = vmatmul.f32.vlgmr.msra.gmra.mxu1 %v4437_v62  ;;  %v4493_v62 = vld [vmem:[%s6963_s5 + $0xd8] sm:$0xff] }
 0x5d0   : > { %3568 = vmatpush.msra.mxu1 %v4486_v11 }
 0x5d1   : > { %3184 = vmatmul.f32.gmra.mxu2 %v4428_v4 }
 0x5d7   : > { %3273 = vmatmul.f32.gmra.mxu1 %v4439_v56 }
 0x5d9   : > { %3187 = vmatmul.f32.gmra.mxu2 %v4430_v51 }
 0x5df   : > { %3276 = vmatmul.f32.gmra.mxu1 %v4441_v48  ;;  %v3324_v48 = vld [vmem:[%s6963_s5] sm:$0xff] }
 0x5e0   : > { %3397 = vmatpush.msrb.mxu3 %v3324_v48 }
 0x5e1   : > { %4447 = vmatmul.msk.f32.vlgmr.msra.gmra.mxu2 %vm2958_vm8, %v4438_v47  ;;  %v4485_v47 = vld [vmem:[%s6963_s5 + $0xb0] sm:$0xff] }
 0x5e2   : > { %3616 = vmatpush.msra.mxu2 %v4493_v62  ;;  %3569 = vmatpush.msra.mxu1 %v4485_v47 }
 0x5e7   : > { %3279 = vmatmul.f32.gmra.mxu1 %v4443_v19  ;;  %v4492_v19 = vld [vmem:[%s6963_s5 + $0xd0] sm:$0xff] }
 0x5e8   : > { %3617 = vmatpush.msra.mxu2 %v4492_v19 }
 0x5e9   : > { %4448 = vmatmul.msk.f32.gmra.mxu2 %vm2958_vm8, %v4440_v40 }
 0x5ef   : > { %3282 = vmatmul.f32.gmra.mxu1 %v4445_v6 }
 0x5f1   : > { %4449 = vmatmul.msk.f32.gmra.mxu2 %vm2958_vm8, %v4442_v15 }
 0x5f9   : > { %4450 = vmatmul.msk.f32.gmra.mxu2 %vm2958_vm8, %v4444_v49 }
 0x5fc   : > { %v6575_v29 = vpop.f32.mrf.mxu1 }
 0x601   : > { %4451 = vmatmul.msk.f32.gmra.mxu2 %vm2958_vm8, %v4446_v41  ;;  %v4491_v41 = vld [vmem:[%s6963_s5 + $0xc8] sm:$0xff] }
 0x602   : > { %v3081_v14 = vpop.f32.mrf.mxu3  ;;  %3618 = vmatpush.msra.mxu2 %v4491_v41 }
 0x604   : > { %v6581_v53 = vpop.f32.mrf.mxu1 }
 0x60a   : > { %v3084_v24 = vpop.f32.mrf.mxu3 }
 0x60c   : > { %v2997_v27 = vpop.f32.mrf.mxu1 }
 0x614   : > { %v3023_v22 = vpop.f32.mrf.mxu2  ;;  %v3000_v0 = vpop.f32.mrf.mxu1 }
 0x615   : > { %v3024_v1 = vadd.f32 %v3023_v22, %v6575_v29  ;;  %v4484_v29 = vld [vmem:[%s6963_s5 + $0xa8] sm:$0xff] }
 0x616   : > { %v6591_v36 = vpop.f32.mrf.mxu3  ;;  %3570 = vmatpush.msra.mxu1 %v4484_v29 }
 0x61c   : > { %v6583_v60 = vpop.f32.mrf.mxu2  ;;  %v3003_v42 = vpop.f32.mrf.mxu1 }
 0x61d   : > { %v3027_v40 = vadd.f32 %v6583_v60, %v6581_v53  ;;  %v4490_v60 = vld [vmem:[%s6963_s5 + $0xc0] sm:$0xff] }
 0x61e   : > { %v6595_v25 = vpop.f32.mrf.mxu3  ;;  %3619 = vmatpush.msra.mxu2 %v4490_v60 }
 0x624   : > { %v3029_v26 = vpop.f32.mrf.mxu2  ;;  %v3113_v37 = vpop.f32.mrf.mxu1 }
 0x625   : > { %v6585_v7 = vadd.f32 %v3029_v26, %v2997_v27  ;;  %v3114_v28 = vadd.f32 %v3113_v37, %v3081_v14 }
 0x626   : > { %v6599_v31 = vpop.f32.mrf.mxu3 }
 0x627   : > { %v3128_v56 = vmax.f32 %v3024_v1, %v3114_v28 }
 0x62c   : > { %v3032_v61 = vpop.f32.mrf.mxu2  ;;  %v3116_v45 = vpop.f32.mrf.mxu1 }
 0x62d   : > { %v6587_v10 = vadd.f32 %v3032_v61, %v3000_v0  ;;  %v3117_v4 = vadd.f32 %v3116_v45, %v3084_v24  ;;  %v4483_v0 = vld [vmem:[%s6963_s5 + $0xa0] sm:$0xff] }
 0x62e   : > { %v3208_v30 = vpop.f32.mrf.mxu3  ;;  %3571 = vmatpush.msra.mxu1 %v4483_v0  ;;  %v4504_v0 = vld [vmem:[%s6963_s5 + $0x100] sm:$0xff] }
 0x62f   : > { %v3129_v27 = vmax.f32 %v3027_v40, %v3117_v4  ;;  %v4476_v4 = vld [vmem:[%s6963_s5 + $0x80] sm:$0xff] }
 0x634   : > { %v3035_v35 = vpop.f32.mrf.mxu2  ;;  %v6593_v43 = vpop.f32.mrf.mxu1 }
 0x635   : > { %v6589_v38 = vadd.f32 %v3035_v35, %v3003_v42  ;;  %v3120_v37 = vadd.f32 %v6593_v43, %v6591_v36 }
 0x636   : > { %v3211_v57 = vpop.f32.mrf.mxu3 }
 0x637   : > { %v3130_v18 = vmax.f32 %v6585_v7, %v3120_v37 }
 0x63c   : > { %v3176_v17 = vpop.f32.mrf.mxu2  ;;  %v6597_v2 = vpop.f32.mrf.mxu1 }
 0x63d   : > { %v3209_v12 = vadd.f32 %v3208_v30, %v3176_v17  ;;  %v3123_v9 = vadd.f32 %v6597_v2, %v6595_v25 }
 0x63e   : > { %v3214_v15 = vpop.f32.mrf.mxu3 }
 0x63f   : > { %v3223_v49 = vmax.f32 %v3128_v56, %v3209_v12  ;;  %v3131_v28 = vmax.f32 %v6587_v10, %v3123_v9  ;;  %v4478_v10 = vld [vmem:[%s6963_s5 + $0x90] sm:$0xff] }
 0x640   : > { %v4506_v56 = vld [vmem:[%s6963_s5 + $0x110] sm:$0xff] }
 0x644   : > { %v3179_v20 = vpop.f32.mrf.mxu2  ;;  %v6624_v34 = vpop.f32.mrf.mxu1 }
 0x645   : > { %v3212_v6 = vadd.f32 %v3211_v57, %v3179_v20 }
 0x646   : > { %v3217_v43 = vpop.f32.mrf.mxu3 }
 0x647   : > { %v3224_v42 = vmax.f32 %v3129_v27, %v3212_v6 }
 0x64c   : > { %v6601_v44 = vpop.f32.mrf.mxu2  ;;  %v3271_v16 = vpop.f32.mrf.mxu1 }
 0x64d   : > { %v3215_v24 = vadd.f32 %v3214_v15, %v6601_v44  ;;  %v4505_v15 = vld [vmem:[%s6963_s5 + $0x108] sm:$0xff] }
 0x64f   : > { %v3225_v58 = vmax.f32 %v3130_v18, %v3215_v24 }
 0x654   : > { %v6635_v55 = vpop.f32.mrf.mxu2  ;;  %v3274_v54 = vpop.f32.mrf.mxu1 }
 0x655   : > { %v3218_v21 = vadd.f32 %v3217_v43, %v6635_v55  ;;  %v3126_v55 = vadd.f32 %v6624_v34, %v6599_v31  ;;  %v3220_v31 = vpop.f32.mrf.mxu3  ;;  %v4477_v34 = vld [vmem:[%s6963_s5 + $0x88] sm:$0xff] }
 0x657   : > { %v3226_v1 = vmax.f32 %v3131_v28, %v3218_v21  ;;  %v3132_v62 = vmax.f32 %v6589_v38, %v3126_v55 }
 0x65c   : > { %v6643_v33 = vpop.f32.mrf.mxu2  ;;  %v3277_v14 = vpop.f32.mrf.mxu1 }
 0x664   : > { %v3303_v46 = vpop.f32.mrf.mxu2  ;;  %v3280_v59 = vpop.f32.mrf.mxu1 }
 0x665   : > { %v3304_v51 = vadd.f32 %v3303_v46, %v3271_v16 }
 0x667   : > { %v6678_v22 = vmax.f32 %v3223_v49, %v3304_v51  ;;  %v3221_v51 = vadd.f32 %v3220_v31, %v6643_v33 }
 0x669   : > { %v3337_v35 = vrot.slane %v6678_v22, 1  ;;  %v3413_v45 = vrot.slane %v6678_v22, 2  ;;  %v3460_v5 = vrot.slane %v6678_v22, 6  ;;  %v3227_v37 = vmax.f32 %v3132_v62, %v3221_v51 }
 0x66c   : > { %v3306_v53 = vpop.f32.mrf.mxu2  ;;  %v3283_v49 = vpop.f32.mrf.mxu1 }
 0x66d   : > { %v3307_v26 = vadd.f32 %v3306_v53, %v3274_v54 }
 0x66f   : > { %v6688_v61 = vmax.f32 %v3224_v42, %v3307_v26 }
 0x671   : > { %v3338_v17 = vrot.slane %v6688_v61, 1  ;;  %v3414_v20 = vrot.slane %v6688_v61, 2  ;;  %v3461_v3 = vrot.slane %v6688_v61, 6  ;;  %v3638_v16 = vrot.slane %v6688_v61, 5 }
 0x672   : > { %v3508_v9 = vrot.slane %v6688_v61, 7 }
 0x673   : > { %v3339_v36 = vsel %vm1428_vm6, %v3337_v35, %v3338_v17  ;;  %v3415_v50 = vsel %vm1722_vm7, %v3413_v45, %v3414_v20  ;;  %v3462_v44 = vsel %vm1915_vm2, %v3460_v5, %v3461_v3  ;;  %v3591_v45 = vrot.slane %v6688_v61, 4 }
 0x674   : > { %v3309_v32 = vpop.f32.mrf.mxu2  ;;  %4456 = vmatmul.msk.f32.vlgmr.msra.gmra.mxu3 %vm1472_vm5, %v3339_v36  ;;  %4466 = vmatmul.msk.f32.vlgmr.msrb.gmra.mxu1 %vm1472_vm5, %v3415_v50 }
 0x675   : > { %v3310_v52 = vadd.f32 %v3309_v32, %v3277_v14  ;;  %4473 = vmatmul.msk.f32.vlgmr.msrb.gmra.mxu2 %vm1472_vm5, %v3462_v44  ;;  %3532 = vmatpush.msra.mxu3 %v4479_v13  ;;  %v4500_v44 = vld [vmem:[%s6963_s5 + $0xf8] sm:$0xff]  ;;  %v4499_v32 = vld [vmem:[%s6963_s5 + $0xf0] sm:$0xff] }
 0x676   : > { %3701 = vmatpush.msrb.mxu1 %v4507_v39 }
 0x677   : > { %v6706_v7 = vmax.f32 %v3225_v58, %v3310_v52  ;;  %3533 = vmatpush.msra.mxu3 %v4478_v10  ;;  %v4498_v58 = vld [vmem:[%s6963_s5 + $0xe8] sm:$0xff]  ;;  %v4497_v52 = vld [vmem:[%s6963_s5 + $0xe0] sm:$0xff] }
 0x678   : > { %3702 = vmatpush.msrb.mxu1 %v4506_v56 }
 0x679   : > { %v3340_v8 = vrot.slane %v6706_v7, 1  ;;  %v3416_v23 = vrot.slane %v6706_v7, 2  ;;  %v3463_v30 = vrot.slane %v6706_v7, 6  ;;  %v3639_v57 = vrot.slane %v6706_v7, 5  ;;  %3534 = vmatpush.msra.mxu3 %v4477_v34 }
 0x67a   : > { %v3510_v6 = vrot.slane %v6706_v7, 7  ;;  %v3592_v38 = vrot.slane %v6706_v7, 4  ;;  %3703 = vmatpush.msrb.mxu1 %v4505_v15 }
 0x67b   : > { %v3341_v46 = vsel %vm1428_vm6, %v3338_v17, %v3340_v8  ;;  %v3417_v25 = vsel %vm1722_vm7, %v3414_v20, %v3416_v23  ;;  %v6718_v2 = vsel %vm1915_vm2, %v3461_v3, %v3463_v30  ;;  %v6731_v63 = vsel %vm2601_vm4, %v3638_v16, %v3639_v57  ;;  %3535 = vmatpush.msra.mxu3 %v4476_v4 }
 0x67c   : > { %v3312_v54 = vpop.f32.mrf.mxu2  ;;  %4457 = vmatmul.msk.f32.gmra.mxu3 %vm1472_vm5, %v3341_v46  ;;  %4467 = vmatmul.msk.f32.gmra.mxu1 %vm1472_vm5, %v3417_v25  ;;  %v3593_v18 = vsel %vm1395_vm3, %v3591_v45, %v3592_v38 }
 0x67d   : > { %v3313_v12 = vadd.f32 %v3312_v54, %v3280_v59  ;;  %4474 = vmatmul.msk.f32.gmra.mxu2 %vm1472_vm5, %v6718_v2  ;;  %3704 = vmatpush.msrb.mxu1 %v4504_v0  ;;  %v3507_v59 = vrot.slane %v6678_v22, 7 }
 0x67f   : > { %v3321_v11 = vmax.f32 %v3226_v1, %v3313_v12  ;;  %v3509_v21 = vsel %vm899_vm0, %v3507_v59, %v3508_v9  ;;  %v4516_v59 = vld [vmem:[%s6966_s8 + $0xc] sm:$0xf] }
 0x681   : > { %v3342_v48 = vrot.slane %v3321_v11, 1  ;;  %v3418_v47 = vrot.slane %v3321_v11, 2  ;;  %v3465_v19 = vrot.slane %v3321_v11, 6  ;;  %v3512_v40 = vrot.slane %v3321_v11, 7 }
 0x682   : > { %v3594_v29 = vrot.slane %v3321_v11, 4  ;;  %v3641_v41 = vrot.slane %v3321_v11, 5 }
 0x683   : > { %v3343_v27 = vsel %vm1428_vm6, %v3340_v8, %v3342_v48  ;;  %v3419_v33 = vsel %vm1722_vm7, %v3416_v23, %v3418_v47  ;;  %v3466_v53 = vsel %vm1915_vm2, %v3463_v30, %v3465_v19  ;;  %v3513_v42 = vsel %vm899_vm0, %v3510_v6, %v3512_v40 }
 0x684   : > { %4458 = vmatmul.msk.f32.gmra.mxu3 %vm1472_vm5, %v3343_v27  ;;  %4468 = vmatmul.msk.f32.gmra.mxu1 %vm1472_vm5, %v3419_v33  ;;  %v3315_v60 = vpop.f32.mrf.mxu2  ;;  %v3595_v26 = vsel %vm1395_vm3, %v3592_v38, %v3594_v29  ;;  %v3642_v14 = vsel %vm2601_vm4, %v3639_v57, %v3641_v41  ;;  %v3511_v8 = vsel %vm899_vm0, %v3508_v9, %v3510_v6  ;;  %v4512_v9 = vld [vmem:[%s6966_s8 + $0x4] sm:$0xf] }
 0x685   : > { %4475 = vmatmul.msk.f32.gmra.mxu2 %vm1472_vm5, %v3466_v53  ;;  %v3316_v24 = vadd.f32 %v3315_v60, %v3283_v49 }
 0x687   : > { %v3322_v35 = vmax.f32 %v3227_v37, %v3316_v24 }
 0x689   : > { %v3323_v17 = vsel %vm1395_vm3, %v3322_v35, 0.0 }
 0x68a   : > { %v3596_v20 = vrot.slane %v3323_v17, 4  ;;  %v3643_v5 = vrot.slane %v3323_v17, 5  ;;  %v3685_v3 = vrot.slane %v3323_v17, 6 }
 0x68c   : > { %4459 = vmatmul.msk.f32.vlgmr.msrb.gmra.mxu3 %vm1472_vm5, %v6678_v22  ;;  %4487 = vmatmul.msk.f32.vlgmr.msra.gmra.mxu1 %vm1472_vm5, %v6688_v61  ;;  %v3597_v36 = vsel %vm1395_vm3, %v3594_v29, %v3596_v20  ;;  %v3686_v43 = vsel %vm1915_vm2, %v3465_v19, %v3685_v3  ;;  %v3644_v50 = vsel %vm2601_vm4, %v3641_v41, %v3643_v5  ;;  %v4574_v5 = vld [vmem:[%s6964_s6] ss:$0 sm:$0xff] }
 0x68d   : > { %4494 = vmatmul.msk.f32.vlgmr.msra.gmra.mxu2 %vm1472_vm5, %v3593_v18  ;;  %3663 = vmatpush.msrb.mxu3 %v4500_v44 }
 0x68f   : > { %3664 = vmatpush.msrb.mxu3 %v4499_v32 }
 0x691   : > { %3665 = vmatpush.msrb.mxu3 %v4498_v58  ;;  %v4514_v58 = vld [vmem:[%s6966_s8 + $0x8] sm:$0xf] }
 0x693   : > { %3666 = vmatpush.msrb.mxu3 %v4497_v52  ;;  %v3728_v52 = vld [vmem:[%s6966_s8] sm:$0xf] }
 0x694   : > { %4460 = vmatmul.msk.f32.gmra.mxu3 %vm1472_vm5, %v6688_v61  ;;  %4488 = vmatmul.msk.f32.gmra.mxu1 %vm1472_vm5, %v6706_v7 }
 0x695   : > { %4495 = vmatmul.msk.f32.gmra.mxu2 %vm1472_vm5, %v3595_v26 }
 0x69c   : > { %4461 = vmatmul.msk.f32.gmra.mxu3 %vm1472_vm5, %v6706_v7  ;;  %4489 = vmatmul.msk.f32.gmra.mxu1 %vm1472_vm5, %v3321_v11 }
 0x69d   : > { %4496 = vmatmul.msk.f32.gmra.mxu2 %vm1472_vm5, %v3597_v36 }
 0x6a4   : > { %4480 = vmatmul.msk.f32.vlgmr.msra.gmra.mxu3 %vm1472_vm5, %v3509_v21  ;;  %4508 = vmatmul.msk.f32.vlgmr.msrb.gmra.mxu1 %vm1472_vm5, %v6718_v2  ;;  %v3838_v21 = vld [vmem:[%s6967_s9 + $0x38] sm:$0xff] }
 0x6ac   : > { %4481 = vmatmul.msk.f32.gmra.mxu3 %vm1472_vm5, %v3511_v8  ;;  %4509 = vmatmul.msk.f32.gmra.mxu1 %vm1472_vm5, %v3466_v53  ;;  %v3834_v8 = vld [vmem:[%s6967_s9 + $0x18] sm:$0xff] }
 0x6ad   : > { %3877 = vmatpush.msra.mxu1 %v3834_v8 }
 0x6b4   : > { %4482 = vmatmul.msk.f32.gmra.mxu3 %vm1472_vm5, %v3513_v42  ;;  %4510 = vmatmul.msk.f32.gmra.mxu1 %vm1472_vm5, %v3686_v43 }
 0x6bc   : > { %4501 = vmatmul.msk.f32.vlgmr.msrb.gmra.mxu3 %vm1472_vm5, %v6731_v63 }
 0x6c4   : > { %4502 = vmatmul.msk.f32.gmra.mxu3 %vm1472_vm5, %v3642_v14 }
 0x6cc   : > { %4503 = vmatmul.msk.f32.gmra.mxu3 %vm1472_vm5, %v3644_v50 }
 0x6f1   : > { %v3443_v7 = vpop.f32.mrf.mxu1 }
 0x6f7   : > { %v3367_v22 = vpop.f32.mrf.mxu3 }
 0x6f8   : > { %v3490_v46 = vpop.f32.mrf.mxu2 }
 0x6f9   : > { %v3446_v30 = vpop.f32.mrf.mxu1 }
 0x6ff   : > { %v3370_v61 = vpop.f32.mrf.mxu3 }
 0x700   : > { %v3493_v55 = vpop.f32.mrf.mxu2 }
 0x701   : > { %v3449_v57 = vpop.f32.mrf.mxu1 }
 0x707   : > { %v3373_v23 = vpop.f32.mrf.mxu3 }
 0x708   : > { %v3496_v10 = vpop.f32.mrf.mxu2 }
 0x709   : > { %v3573_v25 = vpop.f32.mrf.mxu1 }
 0x70f   : > { %v3399_v16 = vpop.f32.mrf.mxu3 }
 0x710   : > { %v3621_v34 = vpop.f32.mrf.mxu2  ;;  %v3400_v39 = vadd.f32 %v3399_v16, %v3367_v22  ;;  %v3888_v22 = vld [vmem:[%s6967_s9 + $0x58] sm:$0xff]  ;;  %v3836_v16 = vld [vmem:[%s6967_s9 + $0x28] sm:$0xff] }
 0x711   : > { %v3576_v13 = vpop.f32.mrf.mxu1 }
 0x712   : > { %v3452_v56 = vadd.f32 %v3443_v7, %v3400_v39  ;;  %v3837_v7 = vld [vmem:[%s6967_s9 + $0x30] sm:$0xff] }
 0x714   : > { %v3499_v19 = vadd.f32 %v3490_v46, %v3452_v56  ;;  %v3835_v46 = vld [vmem:[%s6967_s9 + $0x20] sm:$0xff]  ;;  %v3951_v56 = vld [vmem:[%s6969_s11 + $0x38] sm:$0xff] }
 0x717   : > { %v3402_v28 = vpop.f32.mrf.mxu3 }
 0x718   : > { %v3403_v31 = vadd.f32 %v3402_v28, %v3370_v61  ;;  %v3624_v6 = vpop.f32.mrf.mxu2  ;;  %v3833_v61 = vld [vmem:[%s6967_s9 + $0x10] sm:$0xff]  ;;  %v3831_v28 = vld [vmem:[%s6967_s9] sm:$0xff] }
 0x719   : > { %v3579_v1 = vpop.f32.mrf.mxu1  ;;  %3878 = vmatpush.msra.mxu1 %v3833_v61 }
 0x71a   : > { %v3453_v62 = vadd.f32 %v3446_v30, %v3403_v31  ;;  %v3832_v30 = vld [vmem:[%s6967_s9 + $0x8] sm:$0xff] }
 0x71b   : > { %3879 = vmatpush.msra.mxu1 %v3832_v30 }
 0x71c   : > { %v3500_v48 = vadd.f32 %v3493_v55, %v3453_v62  ;;  %v3915_v55 = vld [vmem:[%s6967_s9 + $0x70] sm:$0xff] }
 0x71d   : > { %3880 = vmatpush.msra.mxu1 %v3831_v28 }
 0x71f   : > { %v3405_v2 = vpop.f32.mrf.mxu3  ;;  %3965 = vmatpush.msrb.mxu1 %v3951_v56 }
 0x720   : > { %v3406_v11 = vadd.f32 %v3405_v2, %v3373_v23  ;;  %v3627_v26 = vpop.f32.mrf.mxu2  ;;  %v3887_v23 = vld [vmem:[%s6967_s9 + $0x50] sm:$0xff]  ;;  %v3916_v2 = vld [vmem:[%s6967_s9 + $0x78] sm:$0xff] }
 0x721   : > { %v3706_v4 = vpop.f32.mrf.mxu1 }
 0x722   : > { %v3454_v47 = vadd.f32 %v3449_v57, %v3406_v11  ;;  %v3886_v57 = vld [vmem:[%s6967_s9 + $0x48] sm:$0xff] }
 0x724   : > { %v3501_v15 = vadd.f32 %v3496_v10, %v3454_v47  ;;  %v3948_v47 = vld [vmem:[%s6969_s11 + $0x20] sm:$0xff] }
 0x727   : > { %v3537_v54 = vpop.f32.mrf.mxu3 }
 0x728   : > { %v3546_v38 = vadd.f32 %v3537_v54, %v3499_v19  ;;  %v3914_v54 = vld [vmem:[%s6967_s9 + $0x68] sm:$0xff]  ;;  %v3947_v19 = vld [vmem:[%s6969_s11 + $0x18] sm:$0xff] }
 0x729   : > { %v3709_v41 = vpop.f32.mrf.mxu1 }
 0x72a   : > { %v3582_v33 = vadd.f32 %v3573_v25, %v3546_v38  ;;  %v3885_v25 = vld [vmem:[%s6967_s9 + $0x40] sm:$0xff] }
 0x72b   : > { %v3944_v38 = vld [vmem:[%s6969_s11] sm:$0xff] }
 0x72c   : > { %v3630_v60 = vadd.f32 %v3621_v34, %v3582_v33 }
 0x72f   : > { %v3540_v63 = vpop.f32.mrf.mxu3 }
 0x730   : > { %v3547_v40 = vadd.f32 %v3540_v63, %v3500_v48  ;;  %v3949_v48 = vld [vmem:[%s6969_s11 + $0x28] sm:$0xff] }
 0x731   : > { %v3712_v17 = vpop.f32.mrf.mxu1 }
 0x732   : > { %v3583_v29 = vadd.f32 %v3576_v13, %v3547_v40  ;;  %v3913_v13 = vld [vmem:[%s6967_s9 + $0x60] sm:$0xff]  ;;  %v3946_v40 = vld [vmem:[%s6969_s11 + $0x10] sm:$0xff] }
 0x734   : > { %v3631_v53 = vadd.f32 %v3624_v6, %v3583_v29  ;;  %v3945_v6 = vld [vmem:[%s6969_s11 + $0x8] sm:$0xff] }
 0x737   : > { %v3543_v12 = vpop.f32.mrf.mxu3 }
 0x738   : > { %v3548_v49 = vadd.f32 %v3543_v12, %v3501_v15  ;;  %v3981_v15 = vld [vmem:[%s6971_s13 + $0x18] sm:$0xff] }
 0x73a   : > { %v3584_v0 = vadd.f32 %v3579_v1, %v3548_v49 }
 0x73c   : > { %v3632_v37 = vadd.f32 %v3627_v26, %v3584_v0  ;;  %v3941_v0 = vld [vmem:[%s6968_s10] sm:$0x1] }
 0x73f   : > { %v3668_v51 = vpop.f32.mrf.mxu3 }
 0x740   : > { %v3677_v14 = vadd.f32 %v3668_v51, %v3630_v60  ;;  %v3950_v51 = vld [vmem:[%s6969_s11 + $0x30] sm:$0xff] }
 0x741   : > { %3966 = vmatpush.msrb.mxu1 %v3950_v51 }
 0x742   : > { %v3715_v20 = vadd.f32 %v3706_v4, %v3677_v14  ;;  %v3980_v14 = vld [vmem:[%s6971_s13 + $0x10] sm:$0xff] }
 0x743   : > { %3967 = vmatpush.msrb.mxu1 %v3949_v48 }
 0x744   : > { %v3722_v43 = vadd.f32 %v4574_v5, %v3715_v20 }
 0x745   : > { %3968 = vmatpush.msrb.mxu1 %v3948_v47 }
 0x746   : > { %v3725_v32 = vmax.f32 %v3722_v43, 0.0 }
 0x747   : > { %v3671_v27 = vpop.f32.mrf.mxu3  ;;  %3969 = vmatpush.msrb.mxu1 %v3947_v19 }
 0x748   : > { %v3678_v42 = vadd.f32 %v3671_v27, %v3631_v53 }
 0x749   : > { %3970 = vmatpush.msrb.mxu1 %v3946_v40 }
 0x74a   : > { %v3716_v35 = vadd.f32 %v3709_v41, %v3678_v42 }
 0x74b   : > { %3971 = vmatpush.msrb.mxu1 %v3945_v6 }
 0x74c   : > { %v3723_v18 = vadd.f32 %v4574_v5, %v3716_v35  ;;  %v3952_v35 = vld [vmem:[%s6970_s12] sm:$0x1] }
 0x74d   : > { %3972 = vmatpush.msrb.mxu1 %v3944_v38 }
 0x74e   : > { %v3726_v44 = vmax.f32 %v3723_v18, 0.0 }
 0x74f   : > { %v3674_v24 = vpop.f32.mrf.mxu3 }
 0x750   : > { %v3679_v45 = vadd.f32 %v3674_v24, %v3632_v37  ;;  %v3979_v37 = vld [vmem:[%s6971_s13 + $0x8] sm:$0xff]  ;;  %v3978_v24 = vld [vmem:[%s6971_s13] sm:$0xff] }
 0x752   : > { %v3717_v3 = vadd.f32 %v3712_v17, %v3679_v45 }
 0x754   : > { %v3724_v36 = vadd.f32 %v4574_v5, %v3717_v3  ;;  %v3982_v5 = vld [vmem:[%s6972_s14] sm:$0x1] }
 0x756   : > { %v3727_v50 = vmax.f32 %v3724_v36, 0.0 }
 0x758   : > { %3746 = vmatpush.msrb.mxu2 %v3727_v50  ;;  %3797 = vmatpush.msra.mxu3 %v3727_v50 }
 0x75a   : > { %3747 = vmatpush.msrb.mxu2 %v3726_v44  ;;  %3798 = vmatpush.msra.mxu3 %v3726_v44 }
 0x75c   : > { %3748 = vmatpush.msrb.mxu2 %v3725_v32  ;;  %3799 = vmatpush.msra.mxu3 %v3725_v32 }
 0x75d   : > { %4515 = vmatmul.msk.f32.vlgmr.msra.gmra.mxu3 %vm3729_vm9, %v4514_v58  ;;  %4511 = vmatmul.msk.f32.vlgmr.msrb.gmra.mxu2 %vm3729_vm9, %v3728_v52 }
 0x75e   : > { %3771 = vmatpush.msra.mxu2 %v3727_v50  ;;  %3855 = vmatpush.msrb.mxu3 %v3838_v21 }
 0x760   : > { %3772 = vmatpush.msra.mxu2 %v3726_v44  ;;  %3856 = vmatpush.msrb.mxu3 %v3837_v7 }
 0x762   : > { %3773 = vmatpush.msra.mxu2 %v3725_v32  ;;  %3857 = vmatpush.msrb.mxu3 %v3836_v16 }
 0x764   : > { %3823 = vmatpush.msrb.mxu2 %v3727_v50  ;;  %3858 = vmatpush.msrb.mxu3 %v3835_v46 }
 0x765   : > { %4513 = vmatmul.msk.f32.vlgmr.msra.gmra.mxu2 %vm3729_vm9, %v4512_v9 }
 0x766   : > { %3824 = vmatpush.msrb.mxu2 %v3726_v44  ;;  %3932 = vmatpush.msra.mxu3 %v3916_v2 }
 0x768   : > { %3825 = vmatpush.msrb.mxu2 %v3725_v32  ;;  %3933 = vmatpush.msra.mxu3 %v3915_v55 }
 0x76a   : > { %3904 = vmatpush.msra.mxu2 %v3888_v22  ;;  %3934 = vmatpush.msra.mxu3 %v3914_v54 }
 0x76c   : > { %3905 = vmatpush.msra.mxu2 %v3887_v23  ;;  %3935 = vmatpush.msra.mxu3 %v3913_v13 }
 0x76d   : > { %4517 = vmatmul.msk.f32.vlgmr.msrb.gmra.mxu2 %vm3729_vm9, %v4516_v59 }
 0x76e   : > { %3906 = vmatpush.msra.mxu2 %v3886_v57 }
 0x770   : > { %3907 = vmatpush.msra.mxu2 %v3885_v25 }
 0x772   : > { %3998 = vmatpush.msrb.mxu2 %v3981_v15 }
 0x774   : > { %3999 = vmatpush.msrb.mxu2 %v3980_v14 }
 0x776   : > { %4000 = vmatpush.msrb.mxu2 %v3979_v37 }
 0x778   : > { %4001 = vmatpush.msrb.mxu2 %v3978_v24 }
 0x7e0   : > { %v3750_v10 = vpop.f32.mrf.mxu2  ;;  %v3801_v12 = vpop.f32.mrf.mxu3 }
 0x7e8   : > { %v3775_v63 = vpop.f32.mrf.mxu2 }
 0x7e9   : > { %v3778_v1 = vmax.f32 %v3750_v10, %v3775_v63 }
 0x7eb   : > { %v3804_v31 = vmax.f32 %v3778_v1, %v3801_v12 }
 0x7f0   : > { %v3827_v34 = vpop.f32.mrf.mxu2 }
 0x7f1   : > { %v3830_v39 = vmax.f32 %v3804_v31, %v3827_v34 }
 0x7f3   : > { %v3840_v11 = vrot.slane %v3830_v39, 1  ;;  %v3889_v62 = vrot.slane %v3830_v39, 2  ;;  %4519 = vmatmul.msk.f32.vlgmr.msra.gmra.mxu1 %vm1472_vm5, %v3830_v39  ;;  %v3917_v4 = vrot.slane %v3830_v39, 3 }
 0x7f5   : > { %4518 = vmatmul.msk.f32.vlgmr.msrb.gmra.mxu3 %vm1472_vm5, %v3840_v11  ;;  %4520 = vmatmul.msk.f32.vlgmr.msra.gmra.mxu2 %vm1472_vm5, %v3889_v62 }
 0x7fd   : > { %4521 = vmatmul.msk.f32.vlgmr.msra.gmra.mxu3 %vm1472_vm5, %v3917_v4 }
 0x870   : > { %v3882_v29 = vpop.f32.mrf.mxu1 }
 0x878   : > { %v3860_v49 = vpop.f32.mrf.mxu3  ;;  %v3909_v27 = vpop.f32.mrf.mxu2 }
 0x879   : > { %v3883_v41 = vadd.f32 %v3882_v29, %v3860_v49 }
 0x87b   : > { %v3912_v33 = vadd.f32 %v3909_v27, %v3883_v41 }
 0x880   : > { %v3937_v53 = vpop.f32.mrf.mxu3 }
 0x881   : > { %v3940_v60 = vadd.f32 %v3937_v53, %v3912_v33 }
 0x883   : > { %v3942_v42 = vadd.f32 %v3941_v0, %v3940_v60 }
 0x885   : > { %v3943_v26 = vmax.f32 %v3942_v42, 0.0 }
 0x887   : > { %4522 = vmatmul.msk.f32.vlgmr.msrb.gmra.mxu1 %vm3953_vm10, %v3943_v26 }
 0x904   : > { %v3974_v45 = vpop.f32.mrf.mxu1 }
 0x905   : > { %v3975_v17 = vadd.f32 %v3974_v45, %v3952_v35 }
 0x907   : > { %v3977_v20 = vmax.f32 %v3975_v17, 0.0 }
 0x909   : > { %4523 = vmatmul.msk.f32.vlgmr.msrb.gmra.mxu2 %vm1472_vm5, %v3977_v20 }
 0x98c   : > { %v4003_v3 = vpop.f32.mrf.mxu2 }
 0x98d   : > { %v4004_v18 = vadd.f32 %v4003_v3, %v3982_v5 }
 0x98f   : > { %4006 = vst [vmem:[%s486_s17] sm:$0x1] %v4004_v18 }
 0x990   : > { %4602 = shalt.err (!%p4599_p3)
}
 0x991   : > { %4533 = dma.vmem_to_hbm [thread:$0]  (%p4757_p5), %s4019_s0, 16, %s4021_s3, %s4008_s1  }
 0x992 PF: > { %p4539_p4 = scmp.ge.s32.totalorder %s4637_s21, 2  ;;  %s4032_s2 = sand.u32 1, %s4625_s18  }
 0x993   : > { %s4033_s16 = scalar_lea.sflag [#allocation3], %s4032_s2 }
 0x994   : > { %p4536_p7 = pnand %p4539_p4, %p4761_p6 }
 0x996   : > { %p4537_p8 = pneg %p4536_p7 }
 0x998   : > { %4620 = dma.done.wait (%p4537_p8), %s4033_s16, 16  }
 0x999   : > { %4622 = vsyncadd (%p4537_p8), %s4033_s16, 4294967280  ;;  %s7119_s4 = sld [smem:[#allocation5_spill]]  ;;  %p25_p9 = scmp.ge.s32.totalorder %s4744_s24, 4  }
 0x99a   : > { %s7120_s18 = smov %s4629_s19  ;;  %s7121_s19 = smov %s4633_s20 }
 0x99b   : > { %s7123_s21 = smov %s4744_s24  ;;  %27 = sbr.rel (!%p25_p9) target bundleno = 9 (0x9), region = 137 }
 0x99f   : > { %s7122_s20 = smov %s7119_s4 }
 0x9a0   :  { %4038 = vsyncpa [#allocation3], 1 }
 0x9a1   :  { %4040 = vsyncpa [#allocation3 + $0x1], 1 }

</bundles_post_ra>
